<compile_context>
chip_gen: v7x
topology: tpu7x:2x2x1
jax: 0.10.0
libtpu: 0.0.40
codegen_flags: <defaults>
</compile_context>

<pallas_src>
import functools

import jax
import jax.numpy as jnp
from jax.experimental import pallas as pl
from jax.experimental.pallas import tpu as pltpu

BN_EPS = 1e-5
LANE = 128


def _round_up(x, m):
    return (x + m - 1) // m * m


def _pad2(x, rows, cols):
    r, c = x.shape
    return jnp.pad(x, ((0, rows - r), (0, cols - c)))


def _head(pooled, w1_ref, b1_ref, gamma_ref, beta_ref, w2_ref, b2_ref, out_ref):
    """Linear -> BatchNorm1d (batch stats) -> ReLU -> Linear on pooled (B, D) f32.

    Invariant: gamma/beta/b1/b2/w2 are zero-padded beyond the real H/C columns, so
    padded lanes stay exactly 0 (0 * rsqrt(0 + eps) = 0) and never leak into output.
    """
    h = (jnp.dot(pooled.astype(w1_ref.dtype), w1_ref[...],
                 preferred_element_type=jnp.float32) + b1_ref[...])
    mu = jnp.mean(h, axis=0, keepdims=True)
    # E[h^2] - mu^2 can dip slightly negative from f32 cancellation -> clamp.
    var = jnp.maximum(jnp.mean(h * h, axis=0, keepdims=True) - mu * mu, 0.0)
    scale = gamma_ref[...] * jax.lax.rsqrt(var + BN_EPS)          # rsqrt -> EUP slot
    shift = beta_ref[...] - mu * scale
    hr = jnp.maximum(h * scale + shift, 0.0)
    out_ref[...] = (jnp.dot(hr.astype(w2_ref.dtype), w2_ref[...],
                            preferred_element_type=jnp.float32)
                    + b2_ref[...]).astype(out_ref.dtype)


# ----------------------------------------------------------------------------- bag
def _bag_kernel(tok_ref, embed_ref, w1_ref, b1_ref, gamma_ref, beta_ref,
                w2_ref, b2_ref, out_ref, acc_ref, *, seq_len, v_chunk, v_slab):
    """Grid axis 0 iterates vocab chunks (reduction axis -> 'arbitrary')."""
    v = pl.program_id(0)
    nv = pl.num_programs(0)

    @pl.when(v == 0)
    def _init():
        acc_ref[...] = jnp.zeros_like(acc_ref)

    # Shift tokens into chunk-local ids (a cheap (B, S) op) instead of rebuilding a
    # (B, v_chunk) absolute iota every grid step.
    tok_local = tok_ref[...] - v * v_chunk                        # (B, S) int32
    bsz = tok_local.shape[0]
    iota = jax.lax.broadcasted_iota(jnp.int32, (1, v_slab), 1)    # hoisted, 1 row

    # bf16 counts are exact only while counts <= 256 (counts <= seq_len).
    count_dtype = embed_ref.dtype if seq_len <= 256 else jnp.float32

    n_slabs = v_chunk // v_slab

    # Slab-tiled bag build: live counts slab is (B, v_slab) f32 ~16 vregs, so the
    # seq loop never spills; each slab feeds one MXU matmul into the f32 accumulator.
    @pl.loop(0, n_slabs)
    def _slab(si):
        base = pl.multiple_of(si * v_slab, v_slab)
        tok_slab = tok_local - si * v_slab                        # (B, S)
        counts = jnp.zeros((bsz, v_slab), jnp.float32)
        for s in range(seq_len):                                  # small static loop
            counts = counts + (iota == tok_slab[:, s:s + 1]).astype(jnp.float32)
        acc_ref[...] += jnp.dot(counts.astype(count_dtype),
                                embed_ref[pl.ds(base, v_slab), :],
                                preferred_element_type=jnp.float32)

    @pl.when(v == nv - 1)
    def _finalize():
        pooled = acc_ref[...] * (1.0 / seq_len)                   # mean over seq (f32)
        _head(pooled, w1_ref, b1_ref, gamma_ref, beta_ref, w2_ref, b2_ref, out_ref)


# -------------------------------------------------------------------------- gather
def _gather_kernel(tok_ref, embed_hbm, w1_ref, b1_ref, gamma_ref, beta_ref,
                   w2_ref, b2_ref, out_ref, rowbuf, sem, pooled_ref,
                   *, batch, seq_len):
    """Manual double-buffered row gather; only B*S table rows ever leave HBM.

    tok_ref is the (B*S,) int32 scalar-prefetch arg (SMEM); embed_hbm stays in HBM.
    """
    def issue(b, slot):
        for s in range(seq_len):
            row = tok_ref[b * seq_len + s]
            pltpu.make_async_copy(embed_hbm.at[pl.ds(row, 1), :],
                                  rowbuf.at[slot, pl.ds(s, 1), :],
                                  sem.at[slot]).start()

    issue(0, 0)

    @pl.loop(0, batch)
    def _row(b):
        slot = b & 1
        # All seq_len copies of this slot share one DMA semaphore; wait per copy.
        for s in range(seq_len):
            pltpu.make_async_copy(embed_hbm.at[pl.ds(0, 1), :],
                                  rowbuf.at[slot, pl.ds(s, 1), :],
                                  sem.at[slot]).wait()

        @pl.when(b + 1 < batch)
        def _prefetch():
            issue(b + 1, 1 - slot)

        pooled_ref[pl.ds(b, 1), :] = jnp.sum(
            rowbuf[slot].astype(jnp.float32), axis=0, keepdims=True)

    pooled = pooled_ref[...] * (1.0 / seq_len)
    _head(pooled, w1_ref, b1_ref, gamma_ref, beta_ref, w2_ref, b2_ref, out_ref)


# ------------------------------------------------------------------------- wrapper
def fasttext_forward(tokens, embed, w1, b1, gamma, beta, w2, b2,
                     *, path=None, v_chunk=2048, v_slab=128):
    B, S = tokens.shape
    V, D = embed.shape
    H = w1.shape[1]
    C = w2.shape[1]
    assert B % 8 == 0, "batch must be a multiple of 8 (sublane width)"
    assert v_slab % LANE == 0

    H_p = _round_up(H, LANE)
    C_p = _round_up(C, LANE)

    # bf16 weights for MXU operands (f32 accumulation); bias / BN params stay f32.
    # H, C are zero-padded to lane width (padded lanes provably stay 0, see _head).
    # D is NOT padded: the embed block last dim equals the full array dim (legal) and
    # a K=D matmul is legal, so no zero bytes are streamed from HBM.
    w1_p = _pad2(w1.astype(jnp.bfloat16), D, H_p)
    w2_p = _pad2(w2.astype(jnp.bfloat16), H_p, C_p)
    b1_p = _pad2(b1.reshape(1, -1).astype(jnp.float32), 1, H_p)
    gamma_p = _pad2(gamma.reshape(1, -1).astype(jnp.float32), 1, H_p)
    beta_p = _pad2(beta.reshape(1, -1).astype(jnp.float32), 1, H_p)
    b2_p = _pad2(b2.reshape(1, -1).astype(jnp.float32), 1, C_p)
    tokens = tokens.astype(jnp.int32)

    if path is None:
        # Bag path streams the whole table once per call; only worth it when the
        # table has no more rows than the number of gathered rows.
        path = "bag" if V <= B * S else "gather"

    head_bytes = ((w1_p.size + w2_p.size) * 2
                  + (b1_p.size + gamma_p.size + beta_p.size + b2_p.size) * 4)
    head_flops = 2 * B * D * H_p + 2 * B * H_p * C_p + 6 * B * H_p

    if path == "bag":
        v_chunk = _round_up(min(v_chunk, _round_up(V, v_slab)), v_slab)
        V_p = _round_up(V, v_chunk)
        n_chunks = V_p // v_chunk
        embed_p = _pad2(embed.astype(jnp.bfloat16), V_p, D)

        kernel = functools.partial(_bag_kernel, seq_len=S, v_chunk=v_chunk,
                                   v_slab=v_slab)

        # VMEM budget from the actual (double-buffered) block sizes, with headroom.
        vmem_bytes = (2 * (B * S * 4 + v_chunk * D * 2 + head_bytes + B * C_p * 4)
                      + B * D * 4)
        cost = pl.CostEstimate(
            flops=int(2 * B * V_p * D + B * V_p * S + head_flops),
            transcendentals=int(H_p),
            bytes_accessed=int(V_p * D * 2 + B * S * 4 + head_bytes + B * C_p * 4))

        out_p = pl.pallas_call(
            kernel,
            out_shape=jax.ShapeDtypeStruct((B, C_p), jnp.float32),
            grid_spec=pltpu.PrefetchScalarGridSpec(
                num_scalar_prefetch=0,
                grid=(n_chunks,),
                in_specs=[
                    pl.BlockSpec((B, S), lambda v: (0, 0)),        # tokens (resident)
                    # On v5e, add pipeline_mode=pl.Buffered(3) here if xprof shows
                    # exposed DMA on the table stream.
                    pl.BlockSpec((v_chunk, D), lambda v: (v, 0)),  # embed chunk
                    pl.BlockSpec((D, H_p), lambda v: (0, 0)),      # w1
                    pl.BlockSpec((1, H_p), lambda v: (0, 0)),      # b1
                    pl.BlockSpec((1, H_p), lambda v: (0, 0)),      # gamma
                    pl.BlockSpec((1, H_p), lambda v: (0, 0)),      # beta
                    pl.BlockSpec((H_p, C_p), lambda v: (0, 0)),    # w2
                    pl.BlockSpec((1, C_p), lambda v: (0, 0)),      # b2
                ],
                out_specs=pl.BlockSpec((B, C_p), lambda v: (0, 0)),
                scratch_shapes=[pltpu.VMEM((B, D), jnp.float32)],  # pooled-sum acc
            ),
            compiler_params=pltpu.CompilerParams(
                dimension_semantics=("arbitrary",),                # vocab reduction
                vmem_limit_bytes=int(min(64 << 20, max(8 << 20, 2 * vmem_bytes))),
            ),
            cost_estimate=cost,
        )(tokens, embed_p, w1_p, b1_p, gamma_p, beta_p, w2_p, b2_p)

    elif path == "gather":
        # Table values are bf16-rounded (numerics match the bag path) but stored as
        # f32 rows so the single-row gather DMAs are plain 32-bit lane writes.
        embed_g = embed.astype(jnp.bfloat16).astype(jnp.float32)
        kernel = functools.partial(_gather_kernel, batch=B, seq_len=S)

        vmem_bytes = (2 * head_bytes + 2 * S * D * 4 + B * D * 4 + 2 * B * C_p * 4)
        cost = pl.CostEstimate(
            flops=int(B * S * D + head_flops),
            transcendentals=int(H_p),
            bytes_accessed=int(B * S * D * 4 + B * S * 4 + head_bytes + B * C_p * 4))

        out_p = pl.pallas_call(
            kernel,
            out_shape=jax.ShapeDtypeStruct((B, C_p), jnp.float32),
            grid_spec=pltpu.PrefetchScalarGridSpec(
                num_scalar_prefetch=1,                             # tokens -> SMEM
                grid=(1,),
                in_specs=[
                    pl.BlockSpec(memory_space=pl.ANY),             # embed table (HBM)
                    pl.BlockSpec((D, H_p), lambda i, tok: (0, 0)),
                    pl.BlockSpec((1, H_p), lambda i, tok: (0, 0)),
                    pl.BlockSpec((1, H_p), lambda i, tok: (0, 0)),
                    pl.BlockSpec((1, H_p), lambda i, tok: (0, 0)),
                    pl.BlockSpec((H_p, C_p), lambda i, tok: (0, 0)),
                    pl.BlockSpec((1, C_p), lambda i, tok: (0, 0)),
                ],
                out_specs=pl.BlockSpec((B, C_p), lambda i, tok: (0, 0)),
                scratch_shapes=[
                    pltpu.VMEM((2, S, D), jnp.float32),            # row double-buffer
                    pltpu.SemaphoreType.DMA((2,)),
                    pltpu.VMEM((B, D), jnp.float32),               # pooled rows
                ],
            ),
            compiler_params=pltpu.CompilerParams(
                dimension_semantics=("arbitrary",),
                vmem_limit_bytes=int(min(64 << 20, max(8 << 20, 2 * vmem_bytes))),
            ),
            cost_estimate=cost,
        )(tokens.reshape(-1), embed_g, w1_p, b1_p, gamma_p, beta_p, w2_p, b2_p)
    else:
        raise ValueError(f"unknown path: {path!r}")

    return out_p[:, :C]


def reference_forward(tokens, embed, w1, b1, gamma, beta, w2, b2):
    """Pure-JAX reference using the same bf16 weight values as the kernels."""
    emb = embed[tokens].astype(jnp.float32)                        # (B, S, D)
    pooled = jnp.mean(emb, axis=1)                                 # (B, D)
    h = jnp.dot(pooled.astype(w1.dtype), w1,
                preferred_element_type=jnp.float32) + b1
    mu = jnp.mean(h, axis=0, keepdims=True)
    var = jnp.mean((h - mu) ** 2, axis=0, keepdims=True)
    hn = (h - mu) / jnp.sqrt(var + BN_EPS) * gamma + beta
    hr = jnp.maximum(hn, 0.0)
    return jnp.dot(hr.astype(w2.dtype), w2,
                   preferred_element_type=jnp.float32) + b2


if __name__ == "__main__":
    # MXU-friendly demo shapes; callers on v6e/v7x should prefer batch=256 per call.
    vocab_size, embed_dim, hidden_size, classes = 500, 64, 48, 10
    batch, seq = 128, 16

    key = jax.random.PRNGKey(0)
    k_tok, k_emb, k_w1, k_b1, k_g, k_bt, k_w2, k_b2 = jax.random.split(key, 8)

    tokens = jax.random.randint(k_tok, (batch, seq), 0, vocab_size, dtype=jnp.int32)
    embed = jax.random.normal(k_emb, (vocab_size, embed_dim), jnp.float32) * 0.1
    w1 = jax.random.normal(k_w1, (embed_dim, hidden_size), jnp.float32) * 0.1
    b1 = jax.random.normal(k_b1, (hidden_size,), jnp.float32) * 0.1
    gamma = 1.0 + 0.1 * jax.random.normal(k_g, (hidden_size,), jnp.float32)
    beta = 0.1 * jax.random.normal(k_bt, (hidden_size,), jnp.float32)
    w2 = jax.random.normal(k_w2, (hidden_size, classes), jnp.float32) * 0.1
    b2 = jax.random.normal(k_b2, (classes,), jnp.float32) * 0.1

    ref = reference_forward(tokens, embed.astype(jnp.bfloat16),
                            w1.astype(jnp.bfloat16), b1, gamma, beta,
                            w2.astype(jnp.bfloat16), b2)

    # Bag path (the auto-selected path here, since V <= B*S).
    out_bag = jax.block_until_ready(
        fasttext_forward(tokens, embed, w1, b1, gamma, beta, w2, b2, path="bag"))
    assert out_bag.shape == (batch, classes)
    assert jnp.allclose(out_bag, ref, atol=2e-3, rtol=2e-3), \
        float(jnp.max(jnp.abs(out_bag - ref)))

    # Gather path (auto-selected for realistic V > B*S vocabularies); forced here to
    # exercise it at demo shapes against the same reference.
    out_gather = jax.block_until_ready(
        fasttext_forward(tokens, embed, w1, b1, gamma, beta, w2, b2, path="gather"))
    assert out_gather.shape == (batch, classes)
    assert jnp.allclose(out_gather, ref, atol=2e-3, rtol=2e-3), \
        float(jnp.max(jnp.abs(out_gather - ref)))

    print("KERNEL_OK")
</pallas_src>

<mosaic_0001>
module attributes {stable_mosaic.version = 11 : i64} {
  func.func @_bag_kernel(%arg0: i32, %arg1: memref<128x16xi32, #tpu.memory_space<vmem>>, %arg2: memref<512x64xbf16, #tpu.memory_space<vmem>>, %arg3: memref<64x128xbf16, #tpu.memory_space<vmem>>, %arg4: memref<1x128xf32, #tpu.memory_space<vmem>>, %arg5: memref<1x128xf32, #tpu.memory_space<vmem>>, %arg6: memref<1x128xf32, #tpu.memory_space<vmem>>, %arg7: memref<128x128xbf16, #tpu.memory_space<vmem>>, %arg8: memref<1x128xf32, #tpu.memory_space<vmem>>, %arg9: memref<128x128xf32, #tpu.memory_space<vmem>>, %arg10: memref<128x64xf32, #tpu.memory_space<vmem>>) attributes {dimension_semantics = [#tpu.dimension_semantics<arbitrary>], iteration_bounds = array<i64: 1>, scalar_prefetch = 0 : i64, scratch_operands = 1 : i64, tpu.core_type = #tpu.core_type<tc>, window_params = [{pipeline_mode = #tpu.pipeline_mode<synchronous>, transform_indices = @transform_0, window_bounds = array<i64: 128, 16>}, {transform_indices = @transform_1, window_bounds = array<i64: 512, 64>}, {pipeline_mode = #tpu.pipeline_mode<synchronous>, transform_indices = @transform_2, window_bounds = array<i64: 64, 128>}, {pipeline_mode = #tpu.pipeline_mode<synchronous>, transform_indices = @transform_3, window_bounds = array<i64: 1, 128>}, {pipeline_mode = #tpu.pipeline_mode<synchronous>, transform_indices = @transform_4, window_bounds = array<i64: 1, 128>}, {pipeline_mode = #tpu.pipeline_mode<synchronous>, transform_indices = @transform_5, window_bounds = array<i64: 1, 128>}, {pipeline_mode = #tpu.pipeline_mode<synchronous>, transform_indices = @transform_6, window_bounds = array<i64: 128, 128>}, {pipeline_mode = #tpu.pipeline_mode<synchronous>, transform_indices = @transform_7, window_bounds = array<i64: 1, 128>}, {pipeline_mode = #tpu.pipeline_mode<synchronous>, transform_indices = @transform_8, window_bounds = array<i64: 128, 128>}]} {
    %c0_i32 = arith.constant 0 : i32
    %0 = arith.cmpi eq, %arg0, %c0_i32 : i32
    %1 = arith.extui %0 : i1 to i32
    %c0_i32_0 = arith.constant 0 : i32
    %2 = arith.cmpi ne, %1, %c0_i32_0 : i32
    scf.if %2 {
      %cst = arith.constant 0.000000e+00 : f32
      %12 = vector.broadcast %cst : f32 to vector<128x64xf32>
      %c0_6 = arith.constant 0 : index
      %c0_7 = arith.constant 0 : index
      %13 = vector.load %arg10[%c0_6, %c0_7] : memref<128x64xf32, #tpu.memory_space<vmem>>, vector<128x64xf32>
      tpu.vector_store %arg10[%c0_6, %c0_7], %12 {strides = array<i32>} : memref<128x64xf32, #tpu.memory_space<vmem>>, vector<128x64xf32>,
    } else {
    }
    %c0 = arith.constant 0 : index
    %c0_1 = arith.constant 0 : index
    %3 = vector.load %arg1[%c0, %c0_1] : memref<128x16xi32, #tpu.memory_space<vmem>>, vector<128x16xi32>
    %c512_i32 = arith.constant 512 : i32
    %4 = arith.muli %arg0, %c512_i32 : i32
    %5 = vector.broadcast %4 : i32 to vector<128x16xi32>
    %6 = arith.subi %3, %5 : vector<128x16xi32>
    %7 = tpu.iota {dimensions = array<i32: 1>} : vector<1x128xi32>
    %c0_i32_2 = arith.constant 0 : i32
    %c4_i32 = arith.constant 4 : i32
    %8 = arith.addi %c0_i32_2, %c4_i32 : i32
    %c1_i32 = arith.constant 1 : i32
    scf.for %arg11 = %c0_i32_2 to %8 step %c1_i32  : i32 {
      %c1_i32_6 = arith.constant 1 : i32
      %12 = arith.muli %arg11, %c1_i32_6 : i32
      %c0_i32_7 = arith.constant 0 : i32
      %13 = arith.addi %c0_i32_7, %12 : i32
      %c128_i32 = arith.constant 128 : i32
      %14 = arith.muli %13, %c128_i32 : i32
      %15 = tpu.assume_multiple %14, 128 : i32
      %c128_i32_8 = arith.constant 128 : i32
      %16 = arith.muli %13, %c128_i32_8 : i32
      %17 = vector.broadcast %16 : i32 to vector<128x16xi32>
      %18 = arith.subi %6, %17 : vector<128x16xi32>
      %cst = arith.constant 0.000000e+00 : f32
      %19 = vector.broadcast %cst : f32 to vector<128x128xf32>
      %20 = vector.extract_strided_slice %18 {offsets = [0, 0], sizes = [128, 1], strides = [1, 1]} : vector<128x16xi32> to vector<128x1xi32>
      %21 = vector.broadcast %7 : vector<1x128xi32> to vector<128x128xi32>
      %22 = vector.broadcast %20 : vector<128x1xi32> to vector<128x128xi32>
      %23 = arith.cmpi eq, %21, %22 : vector<128x128xi32>
      %24 = arith.extui %23 : vector<128x128xi1> to vector<128x128xi32>
      %25 = arith.sitofp %24 : vector<128x128xi32> to vector<128x128xf32>
      %26 = arith.addf %19, %25 : vector<128x128xf32>
      %27 = vector.extract_strided_slice %18 {offsets = [0, 1], sizes = [128, 1], strides = [1, 1]} : vector<128x16xi32> to vector<128x1xi32>
      %28 = vector.broadcast %7 : vector<1x128xi32> to vector<128x128xi32>
      %29 = vector.broadcast %27 : vector<128x1xi32> to vector<128x128xi32>
      %30 = arith.cmpi eq, %28, %29 : vector<128x128xi32>
      %31 = arith.extui %30 : vector<128x128xi1> to vector<128x128xi32>
      %32 = arith.sitofp %31 : vector<128x128xi32> to vector<128x128xf32>
      %33 = arith.addf %26, %32 : vector<128x128xf32>
      %34 = vector.extract_strided_slice %18 {offsets = [0, 2], sizes = [128, 1], strides = [1, 1]} : vector<128x16xi32> to vector<128x1xi32>
      %35 = vector.broadcast %7 : vector<1x128xi32> to vector<128x128xi32>
      %36 = vector.broadcast %34 : vector<128x1xi32> to vector<128x128xi32>
      %37 = arith.cmpi eq, %35, %36 : vector<128x128xi32>
      %38 = arith.extui %37 : vector<128x128xi1> to vector<128x128xi32>
      %39 = arith.sitofp %38 : vector<128x128xi32> to vector<128x128xf32>
      %40 = arith.addf %33, %39 : vector<128x128xf32>
      %41 = vector.extract_strided_slice %18 {offsets = [0, 3], sizes = [128, 1], strides = [1, 1]} : vector<128x16xi32> to vector<128x1xi32>
      %42 = vector.broadcast %7 : vector<1x128xi32> to vector<128x128xi32>
      %43 = vector.broadcast %41 : vector<128x1xi32> to vector<128x128xi32>
      %44 = arith.cmpi eq, %42, %43 : vector<128x128xi32>
      %45 = arith.extui %44 : vector<128x128xi1> to vector<128x128xi32>
      %46 = arith.sitofp %45 : vector<128x128xi32> to vector<128x128xf32>
      %47 = arith.addf %40, %46 : vector<128x128xf32>
      %48 = vector.extract_strided_slice %18 {offsets = [0, 4], sizes = [128, 1], strides = [1, 1]} : vector<128x16xi32> to vector<128x1xi32>
      %49 = vector.broadcast %7 : vector<1x128xi32> to vector<128x128xi32>
      %50 = vector.broadcast %48 : vector<128x1xi32> to vector<128x128xi32>
      %51 = arith.cmpi eq, %49, %50 : vector<128x128xi32>
      %52 = arith.extui %51 : vector<128x128xi1> to vector<128x128xi32>
      %53 = arith.sitofp %52 : vector<128x128xi32> to vector<128x128xf32>
      %54 = arith.addf %47, %53 : vector<128x128xf32>
      %55 = vector.extract_strided_slice %18 {offsets = [0, 5], sizes = [128, 1], strides = [1, 1]} : vector<128x16xi32> to vector<128x1xi32>
      %56 = vector.broadcast %7 : vector<1x128xi32> to vector<128x128xi32>
      %57 = vector.broadcast %55 : vector<128x1xi32> to vector<128x128xi32>
      %58 = arith.cmpi eq, %56, %57 : vector<128x128xi32>
      %59 = arith.extui %58 : vector<128x128xi1> to vector<128x128xi32>
      %60 = arith.sitofp %59 : vector<128x128xi32> to vector<128x128xf32>
      %61 = arith.addf %54, %60 : vector<128x128xf32>
      %62 = vector.extract_strided_slice %18 {offsets = [0, 6], sizes = [128, 1], strides = [1, 1]} : vector<128x16xi32> to vector<128x1xi32>
      %63 = vector.broadcast %7 : vector<1x128xi32> to vector<128x128xi32>
      %64 = vector.broadcast %62 : vector<128x1xi32> to vector<128x128xi32>
      %65 = arith.cmpi eq, %63, %64 : vector<128x128xi32>
      %66 = arith.extui %65 : vector<128x128xi1> to vector<128x128xi32>
      %67 = arith.sitofp %66 : vector<128x128xi32> to vector<128x128xf32>
      %68 = arith.addf %61, %67 : vector<128x128xf32>
      %69 = vector.extract_strided_slice %18 {offsets = [0, 7], sizes = [128, 1], strides = [1, 1]} : vector<128x16xi32> to vector<128x1xi32>
      %70 = vector.broadcast %7 : vector<1x128xi32> to vector<128x128xi32>
      %71 = vector.broadcast %69 : vector<128x1xi32> to vector<128x128xi32>
      %72 = arith.cmpi eq, %70, %71 : vector<128x128xi32>
      %73 = arith.extui %72 : vector<128x128xi1> to vector<128x128xi32>
      %74 = arith.sitofp %73 : vector<128x128xi32> to vector<128x128xf32>
      %75 = arith.addf %68, %74 : vector<128x128xf32>
      %76 = vector.extract_strided_slice %18 {offsets = [0, 8], sizes = [128, 1], strides = [1, 1]} : vector<128x16xi32> to vector<128x1xi32>
      %77 = vector.broadcast %7 : vector<1x128xi32> to vector<128x128xi32>
      %78 = vector.broadcast %76 : vector<128x1xi32> to vector<128x128xi32>
      %79 = arith.cmpi eq, %77, %78 : vector<128x128xi32>
      %80 = arith.extui %79 : vector<128x128xi1> to vector<128x128xi32>
      %81 = arith.sitofp %80 : vector<128x128xi32> to vector<128x128xf32>
      %82 = arith.addf %75, %81 : vector<128x128xf32>
      %83 = vector.extract_strided_slice %18 {offsets = [0, 9], sizes = [128, 1], strides = [1, 1]} : vector<128x16xi32> to vector<128x1xi32>
      %84 = vector.broadcast %7 : vector<1x128xi32> to vector<128x128xi32>
      %85 = vector.broadcast %83 : vector<128x1xi32> to vector<128x128xi32>
      %86 = arith.cmpi eq, %84, %85 : vector<128x128xi32>
      %87 = arith.extui %86 : vector<128x128xi1> to vector<128x128xi32>
      %88 = arith.sitofp %87 : vector<128x128xi32> to vector<128x128xf32>
      %89 = arith.addf %82, %88 : vector<128x128xf32>
      %90 = vector.extract_strided_slice %18 {offsets = [0, 10], sizes = [128, 1], strides = [1, 1]} : vector<128x16xi32> to vector<128x1xi32>
      %91 = vector.broadcast %7 : vector<1x128xi32> to vector<128x128xi32>
      %92 = vector.broadcast %90 : vector<128x1xi32> to vector<128x128xi32>
      %93 = arith.cmpi eq, %91, %92 : vector<128x128xi32>
      %94 = arith.extui %93 : vector<128x128xi1> to vector<128x128xi32>
      %95 = arith.sitofp %94 : vector<128x128xi32> to vector<128x128xf32>
      %96 = arith.addf %89, %95 : vector<128x128xf32>
      %97 = vector.extract_strided_slice %18 {offsets = [0, 11], sizes = [128, 1], strides = [1, 1]} : vector<128x16xi32> to vector<128x1xi32>
      %98 = vector.broadcast %7 : vector<1x128xi32> to vector<128x128xi32>
      %99 = vector.broadcast %97 : vector<128x1xi32> to vector<128x128xi32>
      %100 = arith.cmpi eq, %98, %99 : vector<128x128xi32>
      %101 = arith.extui %100 : vector<128x128xi1> to vector<128x128xi32>
      %102 = arith.sitofp %101 : vector<128x128xi32> to vector<128x128xf32>
      %103 = arith.addf %96, %102 : vector<128x128xf32>
      %104 = vector.extract_strided_slice %18 {offsets = [0, 12], sizes = [128, 1], strides = [1, 1]} : vector<128x16xi32> to vector<128x1xi32>
      %105 = vector.broadcast %7 : vector<1x128xi32> to vector<128x128xi32>
      %106 = vector.broadcast %104 : vector<128x1xi32> to vector<128x128xi32>
      %107 = arith.cmpi eq, %105, %106 : vector<128x128xi32>
      %108 = arith.extui %107 : vector<128x128xi1> to vector<128x128xi32>
      %109 = arith.sitofp %108 : vector<128x128xi32> to vector<128x128xf32>
      %110 = arith.addf %103, %109 : vector<128x128xf32>
      %111 = vector.extract_strided_slice %18 {offsets = [0, 13], sizes = [128, 1], strides = [1, 1]} : vector<128x16xi32> to vector<128x1xi32>
      %112 = vector.broadcast %7 : vector<1x128xi32> to vector<128x128xi32>
      %113 = vector.broadcast %111 : vector<128x1xi32> to vector<128x128xi32>
      %114 = arith.cmpi eq, %112, %113 : vector<128x128xi32>
      %115 = arith.extui %114 : vector<128x128xi1> to vector<128x128xi32>
      %116 = arith.sitofp %115 : vector<128x128xi32> to vector<128x128xf32>
      %117 = arith.addf %110, %116 : vector<128x128xf32>
      %118 = vector.extract_strided_slice %18 {offsets = [0, 14], sizes = [128, 1], strides = [1, 1]} : vector<128x16xi32> to vector<128x1xi32>
      %119 = vector.broadcast %7 : vector<1x128xi32> to vector<128x128xi32>
      %120 = vector.broadcast %118 : vector<128x1xi32> to vector<128x128xi32>
      %121 = arith.cmpi eq, %119, %120 : vector<128x128xi32>
      %122 = arith.extui %121 : vector<128x128xi1> to vector<128x128xi32>
      %123 = arith.sitofp %122 : vector<128x128xi32> to vector<128x128xf32>
      %124 = arith.addf %117, %123 : vector<128x128xf32>
      %125 = vector.extract_strided_slice %18 {offsets = [0, 15], sizes = [128, 1], strides = [1, 1]} : vector<128x16xi32> to vector<128x1xi32>
      %126 = vector.broadcast %7 : vector<1x128xi32> to vector<128x128xi32>
      %127 = vector.broadcast %125 : vector<128x1xi32> to vector<128x128xi32>
      %128 = arith.cmpi eq, %126, %127 : vector<128x128xi32>
      %129 = arith.extui %128 : vector<128x128xi1> to vector<128x128xi32>
      %130 = arith.sitofp %129 : vector<128x128xi32> to vector<128x128xf32>
      %131 = arith.addf %124, %130 : vector<128x128xf32>
      %c0_9 = arith.constant 0 : index
      %c0_10 = arith.constant 0 : index
      %132 = vector.load %arg10[%c0_9, %c0_10] : memref<128x64xf32, #tpu.memory_space<vmem>>, vector<128x64xf32>
      %133 = arith.truncf %131 : vector<128x128xf32> to vector<128x128xbf16>
      %134 = arith.index_cast %15 : i32 to index
      %c0_11 = arith.constant 0 : index
      %135 = vector.load %arg2[%134, %c0_11] : memref<512x64xbf16, #tpu.memory_space<vmem>>, vector<128x64xbf16>
      %cst_12 = arith.constant dense<0.000000e+00> : vector<128x64xf32>
      %136 = tpu.matmul %133, %135, %cst_12 {dimension_numbers = #tpu.dot_dimension_numbers<[1], [0], [0], [1], [0, 0, 1, 1], [], []>} : vector<128x128xbf16>, vector<128x64xbf16>, vector<128x64xf32> -> vector<128x64xf32>
      %137 = arith.addf %132, %136 : vector<128x64xf32>
      %c0_13 = arith.constant 0 : index
      %c0_14 = arith.constant 0 : index
      %138 = vector.load %arg10[%c0_13, %c0_14] : memref<128x64xf32, #tpu.memory_space<vmem>>, vector<128x64xf32>
      tpu.vector_store %arg10[%c0_13, %c0_14], %137 {strides = array<i32>} : memref<128x64xf32, #tpu.memory_space<vmem>>, vector<128x64xf32>,
    }
    %c4_i32_3 = arith.constant 4 : i32
    %c0_i32_4 = arith.constant 0 : i32
    %9 = arith.cmpi eq, %arg0, %c0_i32_4 : i32
    %10 = arith.extui %9 : i1 to i32
    %c0_i32_5 = arith.constant 0 : i32
    %11 = arith.cmpi ne, %10, %c0_i32_5 : i32
    scf.if %11 {
      %c0_6 = arith.constant 0 : index
      %c0_7 = arith.constant 0 : index
      %12 = vector.load %arg10[%c0_6, %c0_7] : memref<128x64xf32, #tpu.memory_space<vmem>>, vector<128x64xf32>
      %cst = arith.constant 6.250000e-02 : f32
      %13 = vector.broadcast %cst : f32 to vector<128x64xf32>
      %14 = arith.mulf %12, %13 : vector<128x64xf32>
      %15 = arith.truncf %14 : vector<128x64xf32> to vector<128x64xbf16>
      %c0_8 = arith.constant 0 : index
      %c0_9 = arith.constant 0 : index
      %16 = vector.load %arg3[%c0_8, %c0_9] : memref<64x128xbf16, #tpu.memory_space<vmem>>, vector<64x128xbf16>
      %cst_10 = arith.constant dense<0.000000e+00> : vector<128x128xf32>
      %17 = tpu.matmul %15, %16, %cst_10 {dimension_numbers = #tpu.dot_dimension_numbers<[1], [0], [0], [1], [0, 0, 1, 1], [], []>} : vector<128x64xbf16>, vector<64x128xbf16>, vector<128x128xf32> -> vector<128x128xf32>
      %c0_11 = arith.constant 0 : index
      %c0_12 = arith.constant 0 : index
      %18 = vector.load %arg4[%c0_11, %c0_12] : memref<1x128xf32, #tpu.memory_space<vmem>>, vector<1x128xf32>
      %19 = vector.broadcast %18 : vector<1x128xf32> to vector<128x128xf32>
      %20 = arith.addf %17, %19 : vector<128x128xf32>
      %cst_13 = arith.constant dense<0.000000e+00> : vector<128xf32>
      %21 = vector.multi_reduction <add>, %20, %cst_13 [0] : vector<128x128xf32> to vector<128xf32>
      %22 = vector.shape_cast %21 : vector<128xf32> to vector<1x128xf32>
      %cst_14 = arith.constant 1.280000e+02 : f32
      %23 = vector.broadcast %cst_14 : f32 to vector<1x128xf32>
      %24 = arith.divf %22, %23 : vector<1x128xf32>
      %25 = arith.mulf %20, %20 : vector<128x128xf32>
      %cst_15 = arith.constant dense<0.000000e+00> : vector<128xf32>
      %26 = vector.multi_reduction <add>, %25, %cst_15 [0] : vector<128x128xf32> to vector<128xf32>
      %27 = vector.shape_cast %26 : vector<128xf32> to vector<1x128xf32>
      %cst_16 = arith.constant 1.280000e+02 : f32
      %28 = vector.broadcast %cst_16 : f32 to vector<1x128xf32>
      %29 = arith.divf %27, %28 : vector<1x128xf32>
      %30 = arith.mulf %24, %24 : vector<1x128xf32>
      %31 = arith.subf %29, %30 : vector<1x128xf32>
      %cst_17 = arith.constant 0.000000e+00 : f32
      %32 = vector.broadcast %cst_17 : f32 to vector<1x128xf32>
      %33 = arith.maximumf %31, %32 : vector<1x128xf32>
      %c0_18 = arith.constant 0 : index
      %c0_19 = arith.constant 0 : index
      %34 = vector.load %arg5[%c0_18, %c0_19] : memref<1x128xf32, #tpu.memory_space<vmem>>, vector<1x128xf32>
      %cst_20 = arith.constant 9.99999974E-6 : f32
      %35 = vector.broadcast %cst_20 : f32 to vector<1x128xf32>
      %36 = arith.addf %33, %35 : vector<1x128xf32>
      %37 = math.rsqrt %36 : vector<1x128xf32>
      %38 = arith.mulf %34, %37 : vector<1x128xf32>
      %c0_21 = arith.constant 0 : index
      %c0_22 = arith.constant 0 : index
      %39 = vector.load %arg6[%c0_21, %c0_22] : memref<1x128xf32, #tpu.memory_space<vmem>>, vector<1x128xf32>
      %40 = arith.mulf %24, %38 : vector<1x128xf32>
      %41 = arith.subf %39, %40 : vector<1x128xf32>
      %42 = vector.broadcast %38 : vector<1x128xf32> to vector<128x128xf32>
      %43 = arith.mulf %20, %42 : vector<128x128xf32>
      %44 = vector.broadcast %41 : vector<1x128xf32> to vector<128x128xf32>
      %45 = arith.addf %43, %44 : vector<128x128xf32>
      %cst_23 = arith.constant 0.000000e+00 : f32
      %46 = vector.broadcast %cst_23 : f32 to vector<128x128xf32>
      %47 = arith.maximumf %45, %46 : vector<128x128xf32>
      %48 = arith.truncf %47 : vector<128x128xf32> to vector<128x128xbf16>
      %c0_24 = arith.constant 0 : index
      %c0_25 = arith.constant 0 : index
      %49 = vector.load %arg7[%c0_24, %c0_25] : memref<128x128xbf16, #tpu.memory_space<vmem>>, vector<128x128xbf16>
      %cst_26 = arith.constant dense<0.000000e+00> : vector<128x128xf32>
      %50 = tpu.matmul %48, %49, %cst_26 {dimension_numbers = #tpu.dot_dimension_numbers<[1], [0], [0], [1], [0, 0, 1, 1], [], []>} : vector<128x128xbf16>, vector<128x128xbf16>, vector<128x128xf32> -> vector<128x128xf32>
      %c0_27 = arith.constant 0 : index
      %c0_28 = arith.constant 0 : index
      %51 = vector.load %arg8[%c0_27, %c0_28] : memref<1x128xf32, #tpu.memory_space<vmem>>, vector<1x128xf32>
      %52 = vector.broadcast %51 : vector<1x128xf32> to vector<128x128xf32>
      %53 = arith.addf %50, %52 : vector<128x128xf32>
      %c0_29 = arith.constant 0 : index
      %c0_30 = arith.constant 0 : index
      %54 = vector.load %arg9[%c0_29, %c0_30] : memref<128x128xf32, #tpu.memory_space<vmem>>, vector<128x128xf32>
      tpu.vector_store %arg9[%c0_29, %c0_30], %53 {strides = array<i32>} : memref<128x128xf32, #tpu.memory_space<vmem>>, vector<128x128xf32>,
    } else {
    }
    return
  }
  func.func @transform_0(%arg0: i32) -> (i32, i32) {
    %c0_i32 = arith.constant 0 : i32
    %c0_i32_0 = arith.constant 0 : i32
    %c0_i32_1 = arith.constant 0 : i32
    return %c0_i32, %c0_i32_0 : i32, i32
  }
  func.func @transform_1(%arg0: i32) -> (i32, i32) {
    %c0_i32 = arith.constant 0 : i32
    %c0_i32_0 = arith.constant 0 : i32
    return %arg0, %c0_i32 : i32, i32
  }
  func.func @transform_2(%arg0: i32) -> (i32, i32) {
    %c0_i32 = arith.constant 0 : i32
    %c0_i32_0 = arith.constant 0 : i32
    %c0_i32_1 = arith.constant 0 : i32
    return %c0_i32, %c0_i32_0 : i32, i32
  }
  func.func @transform_3(%arg0: i32) -> (i32, i32) {
    %c0_i32 = arith.constant 0 : i32
    %c0_i32_0 = arith.constant 0 : i32
    %c0_i32_1 = arith.constant 0 : i32
    return %c0_i32, %c0_i32_0 : i32, i32
  }
  func.func @transform_4(%arg0: i32) -> (i32, i32) {
    %c0_i32 = arith.constant 0 : i32
    %c0_i32_0 = arith.constant 0 : i32
    %c0_i32_1 = arith.constant 0 : i32
    return %c0_i32, %c0_i32_0 : i32, i32
  }
  func.func @transform_5(%arg0: i32) -> (i32, i32) {
    %c0_i32 = arith.constant 0 : i32
    %c0_i32_0 = arith.constant 0 : i32
    %c0_i32_1 = arith.constant 0 : i32
    return %c0_i32, %c0_i32_0 : i32, i32
  }
  func.func @transform_6(%arg0: i32) -> (i32, i32) {
    %c0_i32 = arith.constant 0 : i32
    %c0_i32_0 = arith.constant 0 : i32
    %c0_i32_1 = arith.constant 0 : i32
    return %c0_i32, %c0_i32_0 : i32, i32
  }
  func.func @transform_7(%arg0: i32) -> (i32, i32) {
    %c0_i32 = arith.constant 0 : i32
    %c0_i32_0 = arith.constant 0 : i32
    %c0_i32_1 = arith.constant 0 : i32
    return %c0_i32, %c0_i32_0 : i32, i32
  }
  func.func @transform_8(%arg0: i32) -> (i32, i32) {
    %c0_i32 = arith.constant 0 : i32
    %c0_i32_0 = arith.constant 0 : i32
    %c0_i32_1 = arith.constant 0 : i32
    return %c0_i32, %c0_i32_0 : i32, i32
  }
}

</mosaic_0001>

<bundles_post_ra>
// kernel: tpu_custom_call.1
= control target key start
LH: loop header
LB: loop body
LE: loop exit
PB: predicated region body
PF: predicated region fallthrough
CT: control target
= control target key end

     0   :  { %13 = vsyncpa [#allocation4], 0  ;;  %vm35_vm0 = vcmask 523264   ;;  %v5362_v2 = vlaneseq  ;;  %v3250_v3 = vmov 0.0   ;;  %s3415_s15 = smov 0   ;;  %s5353_s0 = inlined_call_operand.vmem [shape: s32[128,16], index: 0, kind: input, shape index: {}]   ;;  %s5354_s1 = inlined_call_operand.vmem [shape: bf16[512,64], index: 1, kind: input, shape index: {}]   ;;  %s5355_s2 = inlined_call_operand.vmem [shape: bf16[64,128], index: 2, kind: input, shape index: {}]   ;;  %s5356_s3 = inlined_call_operand.vmem [shape: f32[1,128], index: 3, kind: input, shape index: {}]   ;;  %s5357_s4 = inlined_call_operand.vmem [shape: f32[1,128], index: 4, kind: input, shape index: {}]   ;;  %s5358_s5 = inlined_call_operand.vmem [shape: f32[1,128], index: 5, kind: input, shape index: {}]   ;;  %s5359_s6 = inlined_call_operand.vmem [shape: bf16[128,128], index: 6, kind: input, shape index: {}]   ;;  %s5360_s7 = inlined_call_operand.vmem [shape: f32[1,128], index: 7, kind: input, shape index: {}]   ;;  %s5361_s8 = inlined_call_operand.hbm [shape: f32[128,128], index: 8, kind: output, shape index: {}]  }
   0x1   :  { %v3319_v0 = vld [vmem:[%s5353_s0] sm:$0xff]  ;;  %v3324_v1 = vld [vmem:[%s5353_s0 + $0x8] sm:$0xff]  ;;  %36 = vst.msk [vmem:[#allocation2] sm:$0xff] %vm35_vm0, %v3250_v3  ;;  %37 = vst.msk [vmem:[#allocation2 + $0x8] sm:$0xff] %vm35_vm0, %v3250_v3 }
   0x2   :  { %5414 = vst [vmem:[#allocation6_spill] sm:$0xff] %v3319_v0  ;;  %5415 = vst [vmem:[#allocation7_spill] sm:$0xff] %v3324_v1  ;;  %v3345_v4 = vld [vmem:[%s5353_s0 + $0x10] sm:$0xff]  ;;  %v3350_v5 = vld [vmem:[%s5353_s0 + $0x18] sm:$0xff]  ;;  %v3373_v10 = vand.u32 127, %v5362_v2 }
   0x3   :  { %38 = vst.msk [vmem:[#allocation2 + $0x10] sm:$0xff] %vm35_vm0, %v3250_v3  ;;  %39 = vst.msk [vmem:[#allocation2 + $0x18] sm:$0xff] %vm35_vm0, %v3250_v3  ;;  %v3355_v6 = vld [vmem:[%s5353_s0 + $0x20] sm:$0xff]  ;;  %v3360_v7 = vld [vmem:[%s5353_s0 + $0x28] sm:$0xff] }
   0x4   :  { %40 = vst.msk [vmem:[#allocation2 + $0x20] sm:$0xff] %vm35_vm0, %v3250_v3  ;;  %41 = vst.msk [vmem:[#allocation2 + $0x28] sm:$0xff] %vm35_vm0, %v3250_v3  ;;  %v3365_v8 = vld [vmem:[%s5353_s0 + $0x30] sm:$0xff]  ;;  %v3370_v9 = vld [vmem:[%s5353_s0 + $0x38] sm:$0xff] }
   0x5   :  { %42 = vst.msk [vmem:[#allocation2 + $0x30] sm:$0xff] %vm35_vm0, %v3250_v3  ;;  %43 = vst.msk [vmem:[#allocation2 + $0x38] sm:$0xff] %vm35_vm0, %v3250_v3  ;;  %v3378_v11 = vld [vmem:[%s5353_s0 + $0x40] sm:$0xff]  ;;  %v3383_v12 = vld [vmem:[%s5353_s0 + $0x48] sm:$0xff] }
   0x6   :  { %44 = vst.msk [vmem:[#allocation2 + $0x40] sm:$0xff] %vm35_vm0, %v3250_v3  ;;  %45 = vst.msk [vmem:[#allocation2 + $0x48] sm:$0xff] %vm35_vm0, %v3250_v3  ;;  %v3388_v13 = vld [vmem:[%s5353_s0 + $0x50] sm:$0xff]  ;;  %v3393_v14 = vld [vmem:[%s5353_s0 + $0x58] sm:$0xff] }
   0x7   :  { %46 = vst.msk [vmem:[#allocation2 + $0x50] sm:$0xff] %vm35_vm0, %v3250_v3  ;;  %47 = vst.msk [vmem:[#allocation2 + $0x58] sm:$0xff] %vm35_vm0, %v3250_v3  ;;  %v3398_v15 = vld [vmem:[%s5353_s0 + $0x60] sm:$0xff]  ;;  %v3403_v16 = vld [vmem:[%s5353_s0 + $0x68] sm:$0xff] }
   0x8   :  { %48 = vst.msk [vmem:[#allocation2 + $0x60] sm:$0xff] %vm35_vm0, %v3250_v3  ;;  %49 = vst.msk [vmem:[#allocation2 + $0x68] sm:$0xff] %vm35_vm0, %v3250_v3  ;;  %v3408_v17 = vld [vmem:[%s5353_s0 + $0x70] sm:$0xff]  ;;  %v3413_v18 = vld [vmem:[%s5353_s0 + $0x78] sm:$0xff] }
   0x9   :  { %50 = vst.msk [vmem:[#allocation2 + $0x70] sm:$0xff] %vm35_vm0, %v3250_v3  ;;  %51 = vst.msk [vmem:[#allocation2 + $0x78] sm:$0xff] %vm35_vm0, %v3250_v3 }
   0xa   :  { %5416 = vst [vmem:[#allocation8_spill] sm:$0xff] %v3345_v4  ;;  %5417 = vst [vmem:[#allocation9_spill] sm:$0xff] %v3350_v5 }
   0xb   :  { %5418 = vst [vmem:[#allocation10_spill] sm:$0xff] %v3355_v6  ;;  %5419 = vst [vmem:[#allocation11_spill] sm:$0xff] %v3360_v7 }
   0xc   :  { %5420 = vst [vmem:[#allocation12_spill] sm:$0xff] %v3365_v8  ;;  %5421 = vst [vmem:[#allocation13_spill] sm:$0xff] %v3370_v9 }
   0xd   :  { %5422 = vst [vmem:[#allocation14_spill] sm:$0xff] %v3378_v11  ;;  %5423 = vst [vmem:[#allocation15_spill] sm:$0xff] %v3383_v12 }
   0xe   :  { %5424 = vst [vmem:[#allocation16_spill] sm:$0xff] %v3388_v13  ;;  %5425 = vst [vmem:[#allocation17_spill] sm:$0xff] %v3393_v14 }
   0xf   :  { %5426 = vst [vmem:[#allocation18_spill] sm:$0xff] %v3398_v15  ;;  %5427 = vst [vmem:[#allocation19_spill] sm:$0xff] %v3403_v16 }
  0x10   :  { %5428 = vst [vmem:[#allocation20_spill] sm:$0xff] %v3408_v17  ;;  %5429 = vst [vmem:[#allocation21_spill] sm:$0xff] %v3413_v18 }
  0x11 LB: > { %v3251_v19 = vmov 0   ;;  %s2676_s16 = sshll.u32 %s3248_s15, 7  ;;  %v5430_v4 = vld [vmem:[#allocation8_spill] sm:$0xff]  ;;  %v5431_v0 = vld [vmem:[#allocation6_spill] sm:$0xff]  ;;  %v5432_v5 = vld [vmem:[#allocation9_spill] sm:$0xff]  ;;  %v3252_v37 = vmov 1   ;;  %s3248_s15 = sphi %s3415_s15, %s93_s15  }
  0x12   : > { %3158 = vset.pattern.permute.xlu1 %v3251_v19  ;;  %3157 = vset.pattern.permute.xlu0 %v3251_v19  ;;  %v95_v20 = vstv %s2676_s16  ;;  %v5433_v1 = vld [vmem:[#allocation7_spill] sm:$0xff]  ;;  %v5435_v6 = vld [vmem:[#allocation10_spill] sm:$0xff]  ;;  %v3253_v38 = vmov 2   ;;  %v3254_v39 = vmov 3   ;;  %v3255_v41 = vmov 4   ;;  %s1928_s0 = sshra.s32 %s2676_s16, 3 }
  0x13   : > { %v3424_v21 = vsub.s32 %v5430_v4, %v95_v20  ;;  %v3427_v22 = vsub.s32 %v5431_v0, %v95_v20  ;;  %v3432_v23 = vsub.s32 %v5432_v5, %v95_v20  ;;  %v3435_v24 = vsub.s32 %v5433_v1, %v95_v20  ;;  %v5434_v7 = vld [vmem:[#allocation11_spill] sm:$0xff]  ;;  %v5437_v9 = vld [vmem:[#allocation13_spill] sm:$0xff]  ;;  %v5438_v8 = vld [vmem:[#allocation12_spill] sm:$0xff]  ;;  %s2933_s17 = sshll.u32 %s1928_s0, 2  ;;  %s93_s15 = sadd.s32 1, %s3248_s15  }
  0x14   : > { %v3440_v25 = vsub.s32 %v5434_v7, %v95_v20  ;;  %v3443_v26 = vsub.s32 %v5435_v6, %v95_v20  ;;  %v3448_v27 = vsub.s32 %v5437_v9, %v95_v20  ;;  %v3451_v28 = vsub.s32 %v5438_v8, %v95_v20  ;;  %v5439_v12 = vld [vmem:[#allocation15_spill] sm:$0xff]  ;;  %v5440_v11 = vld [vmem:[#allocation14_spill] sm:$0xff]  ;;  %s4324_s20 = scalar_lea.vmem %s5354_s1, %s2933_s17  ;;  %p90_p0 = scmp.ge.s32.totalorder %s93_s15, 4  }
  0x15   : > { %119 = vperm.xlu1 %3158, %v3424_v21   ;;  %113 = vperm.xlu0 %3157, %v3427_v22   ;;  %v3456_v29 = vsub.s32 %v5439_v12, %v95_v20  ;;  %v3459_v30 = vsub.s32 %v5440_v11, %v95_v20  ;;  %v5441_v14 = vld [vmem:[#allocation17_spill] sm:$0xff]  ;;  %v5442_v13 = vld [vmem:[#allocation16_spill] sm:$0xff]  ;;  %v3256_v57 = vmov 5   ;;  %v3257_v1 = vmov 6  }
  0x16   : > { %5436 = vst [vmem:[#allocation22_spill] sm:$0xff] %v3443_v26  ;;  %v3464_v31 = vsub.s32 %v5441_v14, %v95_v20  ;;  %v3467_v32 = vsub.s32 %v5442_v13, %v95_v20  ;;  %v5443_v16 = vld [vmem:[#allocation19_spill] sm:$0xff]  ;;  %v5445_v15 = vld [vmem:[#allocation18_spill] sm:$0xff] }
  0x17   : > { %v3472_v33 = vsub.s32 %v5443_v16, %v95_v20  ;;  %v3475_v34 = vsub.s32 %v5445_v15, %v95_v20  ;;  %v5447_v18 = vld [vmem:[#allocation21_spill] sm:$0xff]  ;;  %v5449_v17 = vld [vmem:[#allocation20_spill] sm:$0xff] }
  0x18   : > { %v3480_v35 = vsub.s32 %v5447_v18, %v95_v20  ;;  %v3483_v36 = vsub.s32 %v5449_v17, %v95_v20  ;;  %v3258_v18 = vmov 7  }
  0x19   : > { %122 = vperm.xlu1 %3158, %v3432_v23   ;;  %116 = vperm.xlu0 %3157, %v3435_v24   ;;  %5444 = vst [vmem:[#allocation23_spill] sm:$0xff] %v3472_v33  ;;  %5446 = vst [vmem:[#allocation24_spill] sm:$0xff] %v3475_v34 }
  0x1a   : > { %5448 = vst [vmem:[#allocation25_spill] sm:$0xff] %v3480_v35 }
  0x1d   : > { %128 = vperm.xlu1 %3158, %v3440_v25   ;;  %125 = vperm.xlu0 %3157, %v3443_v26  }
  0x21   : > { %134 = vperm.xlu1 %3158, %v3448_v27   ;;  %131 = vperm.xlu0 %3157, %v3451_v28  }
  0x25   : > { %140 = vperm.xlu1 %3158, %v3456_v29   ;;  %137 = vperm.xlu0 %3157, %v3459_v30  }
  0x29   : > { %146 = vperm.xlu1 %3158, %v3464_v31   ;;  %143 = vperm.xlu0 %3157, %v3467_v32  }
  0x2d   : > { %152 = vperm.xlu1 %3158, %v3472_v33   ;;  %149 = vperm.xlu0 %3157, %v3475_v34  }
  0x31   : > { %158 = vperm.xlu1 %3158, %v3480_v35   ;;  %155 = vperm.xlu0 %3157, %v3483_v36  }
  0x35   : > { %3160 = vset.pattern.permute.xlu1 %v3252_v37  ;;  %3159 = vset.pattern.permute.xlu0 %v3252_v37 }
  0x36   : > { %228 = vperm.xlu1 %3160, %v3435_v24   ;;  %225 = vperm.xlu0 %3159, %v3427_v22  }
  0x3a   : > { %231 = vperm.xlu1 %3160, %v3424_v21   ;;  %234 = vperm.xlu0 %3159, %v3432_v23  }
  0x3e   : > { %237 = vperm.xlu1 %3160, %v3443_v26   ;;  %240 = vperm.xlu0 %3159, %v3440_v25  }
  0x42   : > { %243 = vperm.xlu1 %3160, %v3451_v28   ;;  %246 = vperm.xlu0 %3159, %v3448_v27  }
  0x46   : > { %249 = vperm.xlu1 %3160, %v3459_v30   ;;  %252 = vperm.xlu0 %3159, %v3456_v29  }
  0x4a   : > { %255 = vperm.xlu1 %3160, %v3467_v32   ;;  %258 = vperm.xlu0 %3159, %v3464_v31  }
  0x4e   : > { %261 = vperm.xlu1 %3160, %v3475_v34   ;;  %264 = vperm.xlu0 %3159, %v3472_v33  }
  0x52   : > { %267 = vperm.xlu1 %3160, %v3483_v36   ;;  %270 = vperm.xlu0 %3159, %v3480_v35  }
  0x56   : > { %3161 = vset.pattern.permute.xlu1 %v3253_v38  ;;  %3162 = vset.pattern.permute.xlu0 %v3253_v38 }
  0x57   : > { %337 = vperm.xlu1 %3161, %v3427_v22   ;;  %340 = vperm.xlu0 %3162, %v3435_v24  }
  0x5b   : > { %343 = vperm.xlu1 %3161, %v3424_v21   ;;  %349 = vperm.xlu0 %3162, %v3443_v26  }
  0x5f   : > { %346 = vperm.xlu1 %3161, %v3432_v23   ;;  %355 = vperm.xlu0 %3162, %v3451_v28  }
  0x63   : > { %352 = vperm.xlu1 %3161, %v3440_v25   ;;  %361 = vperm.xlu0 %3162, %v3459_v30  }
  0x67   : > { %358 = vperm.xlu1 %3161, %v3448_v27   ;;  %367 = vperm.xlu0 %3162, %v3467_v32  }
  0x6b   : > { %364 = vperm.xlu1 %3161, %v3456_v29   ;;  %373 = vperm.xlu0 %3162, %v3475_v34  }
  0x6f   : > { %370 = vperm.xlu1 %3161, %v3464_v31   ;;  %379 = vperm.xlu0 %3162, %v3483_v36  }
  0x73   : > { %376 = vperm.xlu1 %3161, %v3472_v33   ;;  %3163 = vset.pattern.permute.xlu0 %v3254_v39 }
  0x74   : > { %449 = vperm.xlu0 %3163, %v3427_v22  }
  0x77   : > { %382 = vperm.xlu1 %3161, %v3480_v35  }
  0x78   : > { %458 = vperm.xlu0 %3163, %v3432_v23  }
  0x7b   : > { %3164 = vset.pattern.permute.xlu1 %v3254_v39 }
  0x7c   : > { %452 = vperm.xlu1 %3164, %v3435_v24   ;;  %464 = vperm.xlu0 %3163, %v3440_v25  }
  0x80   : > { %455 = vperm.xlu1 %3164, %v3424_v21   ;;  %470 = vperm.xlu0 %3163, %v3448_v27  }
  0x84   : > { %461 = vperm.xlu1 %3164, %v3443_v26   ;;  %476 = vperm.xlu0 %3163, %v3456_v29  }
  0x88   : > { %467 = vperm.xlu1 %3164, %v3451_v28   ;;  %482 = vperm.xlu0 %3163, %v3464_v31  }
  0x8c   : > { %473 = vperm.xlu1 %3164, %v3459_v30   ;;  %488 = vperm.xlu0 %3163, %v3472_v33  }
  0x90   : > { %479 = vperm.xlu1 %3164, %v3467_v32   ;;  %494 = vperm.xlu0 %3163, %v3480_v35  }
  0x94   : > { %v3533_v40 = vpop.permute.xlu1 %119  ;;  %485 = vperm.xlu1 %3164, %v3475_v34   ;;  %3166 = vset.pattern.permute.xlu0 %v3255_v41  ;;  %v3536_v42 = vpop.permute.xlu0 %113 }
  0x95   : > { %564 = vperm.xlu0 %3166, %v3435_v24   ;;  %vm162_vm1 = vcmp.eq.s32.totalorder %v3373_v10, %v3533_v40  ;;  %vm160_vm2 = vcmp.eq.s32.totalorder %v3373_v10, %v3536_v42 }
  0x98   : > { %v3539_v43 = vpop.permute.xlu1 %122  ;;  %491 = vperm.xlu1 %3164, %v3483_v36   ;;  %v3542_v44 = vpop.permute.xlu0 %116 }
  0x99   : > { %573 = vperm.xlu0 %3166, %v3443_v26   ;;  %vm163_vm3 = vcmp.eq.s32.totalorder %v3373_v10, %v3539_v43  ;;  %vm161_vm4 = vcmp.eq.s32.totalorder %v3373_v10, %v3542_v44 }
  0x9c   : > { %v3545_v45 = vpop.permute.xlu1 %128  ;;  %3165 = vset.pattern.permute.xlu1 %v3255_v41  ;;  %v3547_v46 = vpop.permute.xlu0 %125 }
  0x9d   : > { %5450 = vst [vmem:[#allocation26_spill] sm:$0xff] %v3545_v45  ;;  %561 = vperm.xlu1 %3165, %v3427_v22   ;;  %579 = vperm.xlu0 %3166, %v3451_v28   ;;  %vm164_vm5 = vcmp.eq.s32.totalorder %v3373_v10, %v3547_v46 }
  0xa0   : > { %v3551_v47 = vpop.permute.xlu1 %134  ;;  %v3553_v48 = vpop.permute.xlu0 %131 }
  0xa1   : > { %5451 = vst [vmem:[#allocation27_spill] sm:$0xff] %v3551_v47  ;;  %567 = vperm.xlu1 %3165, %v3424_v21   ;;  %585 = vperm.xlu0 %3166, %v3459_v30   ;;  %vm166_vm6 = vcmp.eq.s32.totalorder %v3373_v10, %v3553_v48 }
  0xa4   : > { %v3557_v49 = vpop.permute.xlu1 %140  ;;  %v3559_v50 = vpop.permute.xlu0 %137 }
  0xa5   : > { %570 = vperm.xlu1 %3165, %v3432_v23   ;;  %591 = vperm.xlu0 %3166, %v3467_v32   ;;  %vm169_vm7 = vcmp.eq.s32.totalorder %v3373_v10, %v3557_v49  ;;  %vm168_vm10 = vcmp.eq.s32.totalorder %v3373_v10, %v3559_v50 }
  0xa8   : > { %v3563_v51 = vpop.permute.xlu1 %146  ;;  %v3565_v52 = vpop.permute.xlu0 %143 }
  0xa9   : > { %576 = vperm.xlu1 %3165, %v3440_v25   ;;  %597 = vperm.xlu0 %3166, %v3475_v34   ;;  %vm171_vm11 = vcmp.eq.s32.totalorder %v3373_v10, %v3563_v51  ;;  %vm170_vm12 = vcmp.eq.s32.totalorder %v3373_v10, %v3565_v52 }
  0xac   : > { %v3569_v53 = vpop.permute.xlu1 %152  ;;  %v3571_v54 = vpop.permute.xlu0 %149 }
  0xad   : > { %5452 = vst [vmem:[#allocation28_spill] sm:$0xff] %v3571_v54  ;;  %582 = vperm.xlu1 %3165, %v3448_v27   ;;  %603 = vperm.xlu0 %3166, %v3483_v36   ;;  %vm173_vm13 = vcmp.eq.s32.totalorder %v3373_v10, %v3569_v53 }
  0xb0   : > { %v3575_v55 = vpop.permute.xlu1 %158  ;;  %v3577_v56 = vpop.permute.xlu0 %155 }
  0xb1   : > { %5453 = vst [vmem:[#allocation29_spill] sm:$0xff] %v3577_v56  ;;  %588 = vperm.xlu1 %3165, %v3456_v29   ;;  %3167 = vset.pattern.permute.xlu0 %v3256_v57  ;;  %vm175_vm14 = vcmp.eq.s32.totalorder %v3373_v10, %v3575_v55 }
  0xb2   : > { %673 = vperm.xlu0 %3167, %v3427_v22  }
  0xb5   : > { %v3581_v58 = vpop.permute.xlu1 %228  ;;  %594 = vperm.xlu1 %3165, %v3464_v31   ;;  %v3584_v59 = vpop.permute.xlu0 %225 }
  0xb6   : > { %682 = vperm.xlu0 %3167, %v3432_v23   ;;  %vm273_vm8 = vcmp.eq.s32.totalorder %v3373_v10, %v3581_v58  ;;  %vm272_vm9 = vcmp.eq.s32.totalorder %v3373_v10, %v3584_v59 }
  0xb9   : > { %v3587_v60 = vpop.permute.xlu1 %231  ;;  %600 = vperm.xlu1 %3165, %v3472_v33   ;;  %v3590_v61 = vpop.permute.xlu0 %234 }
  0xba   : > { %688 = vperm.xlu0 %3167, %v3440_v25   ;;  %vm274_vm15 = vcmp.eq.s32.totalorder %v3373_v10, %v3587_v60 }
  0xbd   : > { %v3593_v62 = vpop.permute.xlu1 %237  ;;  %606 = vperm.xlu1 %3165, %v3480_v35   ;;  %v3596_v63 = vpop.permute.xlu0 %240 }
  0xbe   : > { %5454 = vst [vmem:[#allocation30_spill] sm:$0xff] %v3596_v63  ;;  %694 = vperm.xlu0 %3167, %v3448_v27  }
  0xc1   : > { %v3599_v3 = vpop.permute.xlu1 %243  ;;  %3168 = vset.pattern.permute.xlu1 %v3256_v57  ;;  %v3601_v19 = vpop.permute.xlu0 %246 }
  0xc2   : > { %5455 = vst [vmem:[#allocation31_spill] sm:$0xff] %v3601_v19  ;;  %676 = vperm.xlu1 %3168, %v3435_v24   ;;  %700 = vperm.xlu0 %3167, %v3456_v29  }
  0xc5   : > { %v3605_v20 = vpop.permute.xlu1 %249  ;;  %v3607_v37 = vpop.permute.xlu0 %252 }
  0xc6   : > { %679 = vperm.xlu1 %3168, %v3424_v21   ;;  %706 = vperm.xlu0 %3167, %v3464_v31  }
  0xc9   : > { %v3611_v38 = vpop.permute.xlu1 %255  ;;  %v3613_v39 = vpop.permute.xlu0 %258 }
  0xca   : > { %685 = vperm.xlu1 %3168, %v3443_v26   ;;  %712 = vperm.xlu0 %3167, %v3472_v33  }
  0xcd   : > { %v3617_v41 = vpop.permute.xlu1 %261  ;;  %v3619_v57 = vpop.permute.xlu0 %264 }
  0xce   : > { %5456 = vst [vmem:[#allocation32_spill] sm:$0xff] %v3617_v41  ;;  %691 = vperm.xlu1 %3168, %v3451_v28   ;;  %718 = vperm.xlu0 %3167, %v3480_v35  }
  0xd1   : > { %v3623_v2 = vpop.permute.xlu1 %267  ;;  %v3625_v0 = vpop.permute.xlu0 %270 }
  0xd2   : > { %5457 = vst [vmem:[#allocation33_spill] sm:$0xff] %v3623_v2  ;;  %697 = vperm.xlu1 %3168, %v3459_v30   ;;  %3170 = vset.pattern.permute.xlu0 %v3257_v1 }
  0xd3   : > { %788 = vperm.xlu0 %3170, %v3435_v24  }
  0xd6   : > { %703 = vperm.xlu1 %3168, %v3467_v32   ;;  %v3630_v4 = vpop.permute.xlu1 %337  ;;  %v3632_v5 = vpop.permute.xlu0 %340 }
  0xd7   : > { %797 = vperm.xlu0 %3170, %v3443_v26  }
  0xda   : > { %709 = vperm.xlu1 %3168, %v3475_v34   ;;  %v3636_v6 = vpop.permute.xlu1 %343  ;;  %v3638_v7 = vpop.permute.xlu0 %349 }
  0xdb   : > { %803 = vperm.xlu0 %3170, %v3451_v28  }
  0xde   : > { %715 = vperm.xlu1 %3168, %v3483_v36   ;;  %v3642_v8 = vpop.permute.xlu1 %346  ;;  %v3644_v9 = vpop.permute.xlu0 %355 }
  0xdf   : > { %809 = vperm.xlu0 %3170, %v3459_v30  }
  0xe2   : > { %3169 = vset.pattern.permute.xlu1 %v3257_v1  ;;  %v3647_v11 = vpop.permute.xlu1 %352  ;;  %v3649_v12 = vpop.permute.xlu0 %361 }
  0xe3   : > { %5458 = vst [vmem:[#allocation34_spill] sm:$0xff] %v3647_v11  ;;  %785 = vperm.xlu1 %3169, %v3427_v22   ;;  %815 = vperm.xlu0 %3170, %v3467_v32  }
  0xe6   : > { %v3653_v13 = vpop.permute.xlu1 %358  ;;  %v3655_v14 = vpop.permute.xlu0 %367 }
  0xe7   : > { %5459 = vst [vmem:[#allocation35_spill] sm:$0xff] %v3653_v13  ;;  %791 = vperm.xlu1 %3169, %v3424_v21   ;;  %821 = vperm.xlu0 %3170, %v3475_v34  }
  0xea   : > { %v3659_v15 = vpop.permute.xlu1 %364  ;;  %v3661_v16 = vpop.permute.xlu0 %373 }
  0xeb   : > { %5460 = vst [vmem:[#allocation36_spill] sm:$0xff] %v3661_v16  ;;  %794 = vperm.xlu1 %3169, %v3432_v23   ;;  %827 = vperm.xlu0 %3170, %v3483_v36  }
  0xee   : > { %v3665_v1 = vpop.permute.xlu1 %370  ;;  %v3667_v17 = vpop.permute.xlu0 %379 }
  0xef   : > { %5461 = vst [vmem:[#allocation37_spill] sm:$0xff] %v3667_v17  ;;  %800 = vperm.xlu1 %3169, %v3440_v25   ;;  %3171 = vset.pattern.permute.xlu0 %v3258_v18 }
  0xf0   : > { %897 = vperm.xlu0 %3171, %v3427_v22  }
  0xf2   : > { %v3671_v13 = vpop.permute.xlu1 %376 }
  0xf3   : > { %806 = vperm.xlu1 %3169, %v3448_v27   ;;  %v3674_v2 = vpop.permute.xlu0 %449 }
  0xf4   : > { %906 = vperm.xlu0 %3171, %v3432_v23  }
  0xf6   : > { %v3677_v16 = vpop.permute.xlu1 %382 }
  0xf7   : > { %812 = vperm.xlu1 %3169, %v3456_v29   ;;  %v3680_v41 = vpop.permute.xlu0 %458 }
  0xf8   : > { %912 = vperm.xlu0 %3171, %v3440_v25  }
  0xfb   : > { %818 = vperm.xlu1 %3169, %v3464_v31   ;;  %v3684_v17 = vpop.permute.xlu1 %452  ;;  %v3686_v56 = vpop.permute.xlu0 %464 }
  0xfc   : > { %5462 = vst [vmem:[#allocation38_spill] sm:$0xff] %v3686_v56  ;;  %918 = vperm.xlu0 %3171, %v3448_v27  }
  0xff   : > { %824 = vperm.xlu1 %3169, %v3472_v33   ;;  %v3690_v11 = vpop.permute.xlu1 %455  ;;  %v3692_v54 = vpop.permute.xlu0 %470 }
 0x100   : > { %5463 = vst [vmem:[#allocation39_spill] sm:$0xff] %v3690_v11  ;;  %5464 = vst [vmem:[#allocation40_spill] sm:$0xff] %v3692_v54  ;;  %924 = vperm.xlu0 %3171, %v3456_v29   ;;  %v5377_v11 = vmov 11  }
 0x103   : > { %830 = vperm.xlu1 %3169, %v3480_v35   ;;  %v3696_v47 = vpop.permute.xlu1 %461  ;;  %v3698_v19 = vpop.permute.xlu0 %476 }
 0x104   : > { %5465 = vst [vmem:[#allocation41_spill] sm:$0xff] %v3696_v47  ;;  %5466 = vst [vmem:[#allocation42_spill] sm:$0xff] %v3698_v19  ;;  %930 = vperm.xlu0 %3171, %v3464_v31  }
 0x107   : > { %3172 = vset.pattern.permute.xlu1 %v3258_v18  ;;  %v3701_v56 = vpop.permute.xlu1 %467  ;;  %v3703_v45 = vpop.permute.xlu0 %482  ;;  %v3259_v18 = vmov 8  }
 0x108   : > { %5467 = vst [vmem:[#allocation43_spill] sm:$0xff] %v3701_v56  ;;  %5468 = vst [vmem:[#allocation44_spill] sm:$0xff] %v3703_v45  ;;  %900 = vperm.xlu1 %3172, %v3435_v24   ;;  %936 = vperm.xlu0 %3171, %v3472_v33  }
 0x10b   : > { %v3707_v54 = vpop.permute.xlu1 %473  ;;  %v3709_v63 = vpop.permute.xlu0 %488 }
 0x10c   : > { %5469 = vst [vmem:[#allocation45_spill] sm:$0xff] %v3707_v54  ;;  %5470 = vst [vmem:[#allocation46_spill] sm:$0xff] %v3709_v63  ;;  %903 = vperm.xlu1 %3172, %v3424_v21   ;;  %942 = vperm.xlu0 %3171, %v3480_v35  }
 0x10f   : > { %v3713_v19 = vpop.permute.xlu1 %479  ;;  %v3715_v47 = vpop.permute.xlu0 %494 }
 0x110   : > { %5471 = vst [vmem:[#allocation47_spill] sm:$0xff] %v3713_v19  ;;  %5472 = vst [vmem:[#allocation48_spill] sm:$0xff] %v3715_v47  ;;  %909 = vperm.xlu1 %3172, %v3443_v26   ;;  %3174 = vset.pattern.permute.xlu0 %v3259_v18 }
 0x111   : > { %1012 = vperm.xlu0 %3174, %v3435_v24  }
 0x113   : > { %v3719_v45 = vpop.permute.xlu1 %485 }
 0x114   : > { %5473 = vst [vmem:[#allocation49_spill] sm:$0xff] %v3719_v45  ;;  %915 = vperm.xlu1 %3172, %v3451_v28   ;;  %v3722_v54 = vpop.permute.xlu0 %564 }
 0x115   : > { %5474 = vst [vmem:[#allocation50_spill] sm:$0xff] %v3722_v54  ;;  %1021 = vperm.xlu0 %3174, %v3443_v26  }
 0x117   : > { %v3725_v63 = vpop.permute.xlu1 %491 }
 0x118   : > { %5475 = vst [vmem:[#allocation51_spill] sm:$0xff] %v3725_v63  ;;  %921 = vperm.xlu1 %3172, %v3459_v30   ;;  %v3728_v19 = vpop.permute.xlu0 %573 }
 0x119   : > { %5476 = vst [vmem:[#allocation52_spill] sm:$0xff] %v3728_v19  ;;  %1027 = vperm.xlu0 %3174, %v3451_v28  }
 0x11c   : > { %927 = vperm.xlu1 %3172, %v3467_v32   ;;  %v3732_v47 = vpop.permute.xlu1 %561  ;;  %v3734_v56 = vpop.permute.xlu0 %579 }
 0x11d   : > { %5477 = vst [vmem:[#allocation53_spill] sm:$0xff] %v3732_v47  ;;  %5478 = vst [vmem:[#allocation54_spill] sm:$0xff] %v3734_v56  ;;  %1033 = vperm.xlu0 %3174, %v3459_v30  }
 0x120   : > { %933 = vperm.xlu1 %3172, %v3475_v34   ;;  %v3738_v45 = vpop.permute.xlu1 %567  ;;  %v3740_v54 = vpop.permute.xlu0 %585 }
 0x121   : > { %5479 = vst [vmem:[#allocation55_spill] sm:$0xff] %v3738_v45  ;;  %5480 = vst [vmem:[#allocation56_spill] sm:$0xff] %v3740_v54  ;;  %1039 = vperm.xlu0 %3174, %v3467_v32  }
 0x124   : > { %939 = vperm.xlu1 %3172, %v3483_v36   ;;  %v3744_v63 = vpop.permute.xlu1 %570  ;;  %v3746_v19 = vpop.permute.xlu0 %591 }
 0x125   : > { %5481 = vst [vmem:[#allocation57_spill] sm:$0xff] %v3744_v63  ;;  %5482 = vst [vmem:[#allocation58_spill] sm:$0xff] %v3746_v19  ;;  %1045 = vperm.xlu0 %3174, %v3475_v34   ;;  %v3260_v63 = vmov 9  }
 0x128   : > { %3173 = vset.pattern.permute.xlu1 %v3259_v18  ;;  %v3749_v56 = vpop.permute.xlu1 %576  ;;  %v3751_v47 = vpop.permute.xlu0 %597 }
 0x129   : > { %5483 = vst [vmem:[#allocation59_spill] sm:$0xff] %v3749_v56  ;;  %5484 = vst [vmem:[#allocation60_spill] sm:$0xff] %v3751_v47  ;;  %1009 = vperm.xlu1 %3173, %v3427_v22   ;;  %1051 = vperm.xlu0 %3174, %v3483_v36  }
 0x12c   : > { %v3755_v54 = vpop.permute.xlu1 %582  ;;  %v3757_v45 = vpop.permute.xlu0 %603 }
 0x12d   : > { %5485 = vst [vmem:[#allocation61_spill] sm:$0xff] %v3755_v54  ;;  %5486 = vst [vmem:[#allocation62_spill] sm:$0xff] %v3757_v45  ;;  %1015 = vperm.xlu1 %3173, %v3424_v21   ;;  %3175 = vset.pattern.permute.xlu0 %v3260_v63 }
 0x12e   : > { %1121 = vperm.xlu0 %3175, %v3427_v22  }
 0x130   : > { %v3761_v19 = vpop.permute.xlu1 %588 }
 0x131   : > { %5487 = vst [vmem:[#allocation63_spill] sm:$0xff] %v3761_v19  ;;  %1018 = vperm.xlu1 %3173, %v3432_v23   ;;  %v3764_v18 = vpop.permute.xlu0 %673 }
 0x132   : > { %5488 = vst [vmem:[#allocation64_spill] sm:$0xff] %v3764_v18  ;;  %1130 = vperm.xlu0 %3175, %v3432_v23  }
 0x134   : > { %v3767_v47 = vpop.permute.xlu1 %594 }
 0x135   : > { %5489 = vst [vmem:[#allocation65_spill] sm:$0xff] %v3767_v47  ;;  %1024 = vperm.xlu1 %3173, %v3440_v25   ;;  %v3770_v54 = vpop.permute.xlu0 %682 }
 0x136   : > { %5490 = vst [vmem:[#allocation66_spill] sm:$0xff] %v3770_v54  ;;  %1136 = vperm.xlu0 %3175, %v3440_v25  }
 0x138   : > { %v3773_v45 = vpop.permute.xlu1 %600 }
 0x139   : > { %5491 = vst [vmem:[#allocation67_spill] sm:$0xff] %v3773_v45  ;;  %1030 = vperm.xlu1 %3173, %v3448_v27   ;;  %v3776_v56 = vpop.permute.xlu0 %688 }
 0x13a   : > { %5492 = vst [vmem:[#allocation68_spill] sm:$0xff] %v3776_v56  ;;  %1142 = vperm.xlu0 %3175, %v3448_v27  }
 0x13c   : > { %v3779_v19 = vpop.permute.xlu1 %606 }
 0x13d   : > { %5493 = vst [vmem:[#allocation69_spill] sm:$0xff] %v3779_v19  ;;  %1036 = vperm.xlu1 %3173, %v3456_v29   ;;  %v3782_v18 = vpop.permute.xlu0 %694 }
 0x13e   : > { %5494 = vst [vmem:[#allocation70_spill] sm:$0xff] %v3782_v18  ;;  %1148 = vperm.xlu0 %3175, %v3456_v29  }
 0x141   : > { %1042 = vperm.xlu1 %3173, %v3464_v31   ;;  %v3786_v54 = vpop.permute.xlu1 %676  ;;  %v3788_v47 = vpop.permute.xlu0 %700 }
 0x142   : > { %5495 = vst [vmem:[#allocation71_spill] sm:$0xff] %v3786_v54  ;;  %5496 = vst [vmem:[#allocation72_spill] sm:$0xff] %v3788_v47  ;;  %1154 = vperm.xlu0 %3175, %v3464_v31  }
 0x145   : > { %1048 = vperm.xlu1 %3173, %v3472_v33   ;;  %v3792_v56 = vpop.permute.xlu1 %679  ;;  %v3794_v45 = vpop.permute.xlu0 %706 }
 0x146   : > { %5497 = vst [vmem:[#allocation73_spill] sm:$0xff] %v3792_v56  ;;  %5498 = vst [vmem:[#allocation74_spill] sm:$0xff] %v3794_v45  ;;  %1160 = vperm.xlu0 %3175, %v3472_v33   ;;  %v3261_v56 = vmov 10  }
 0x149   : > { %1054 = vperm.xlu1 %3173, %v3480_v35   ;;  %v3798_v18 = vpop.permute.xlu1 %685  ;;  %v3800_v19 = vpop.permute.xlu0 %712 }
 0x14a   : > { %5499 = vst [vmem:[#allocation75_spill] sm:$0xff] %v3798_v18  ;;  %5500 = vst [vmem:[#allocation76_spill] sm:$0xff] %v3800_v19  ;;  %1166 = vperm.xlu0 %3175, %v3480_v35  }
 0x14d   : > { %3176 = vset.pattern.permute.xlu1 %v3260_v63  ;;  %v3803_v47 = vpop.permute.xlu1 %691  ;;  %v3805_v54 = vpop.permute.xlu0 %718 }
 0x14e   : > { %5501 = vst [vmem:[#allocation77_spill] sm:$0xff] %v3803_v47  ;;  %5502 = vst [vmem:[#allocation78_spill] sm:$0xff] %v3805_v54  ;;  %1124 = vperm.xlu1 %3176, %v3435_v24   ;;  %3178 = vset.pattern.permute.xlu0 %v3261_v56 }
 0x14f   : > { %1236 = vperm.xlu0 %3178, %v3435_v24  }
 0x151   : > { %v3809_v45 = vpop.permute.xlu1 %697 }
 0x152   : > { %5503 = vst [vmem:[#allocation79_spill] sm:$0xff] %v3809_v45  ;;  %1127 = vperm.xlu1 %3176, %v3424_v21   ;;  %v3812_v18 = vpop.permute.xlu0 %788 }
 0x153   : > { %5504 = vst [vmem:[#allocation80_spill] sm:$0xff] %v3812_v18  ;;  %1245 = vperm.xlu0 %3178, %v3443_v26  }
 0x155   : > { %v3815_v19 = vpop.permute.xlu1 %703 }
 0x156   : > { %5505 = vst [vmem:[#allocation81_spill] sm:$0xff] %v3815_v19  ;;  %1133 = vperm.xlu1 %3176, %v3443_v26   ;;  %v3818_v63 = vpop.permute.xlu0 %797 }
 0x157   : > { %5506 = vst [vmem:[#allocation82_spill] sm:$0xff] %v3818_v63  ;;  %1251 = vperm.xlu0 %3178, %v3451_v28  }
 0x159   : > { %v3821_v54 = vpop.permute.xlu1 %709 }
 0x15a   : > { %5507 = vst [vmem:[#allocation83_spill] sm:$0xff] %v3821_v54  ;;  %1139 = vperm.xlu1 %3176, %v3451_v28   ;;  %v3824_v47 = vpop.permute.xlu0 %803 }
 0x15b   : > { %5508 = vst [vmem:[#allocation84_spill] sm:$0xff] %v3824_v47  ;;  %1257 = vperm.xlu0 %3178, %v3459_v30  }
 0x15d   : > { %v3827_v45 = vpop.permute.xlu1 %715 }
 0x15e   : > { %5509 = vst [vmem:[#allocation85_spill] sm:$0xff] %v3827_v45  ;;  %1145 = vperm.xlu1 %3176, %v3459_v30   ;;  %v3830_v18 = vpop.permute.xlu0 %809 }
 0x15f   : > { %5510 = vst [vmem:[#allocation86_spill] sm:$0xff] %v3830_v18  ;;  %1263 = vperm.xlu0 %3178, %v3467_v32  }
 0x162   : > { %1151 = vperm.xlu1 %3176, %v3467_v32   ;;  %v3834_v63 = vpop.permute.xlu1 %785  ;;  %v3836_v19 = vpop.permute.xlu0 %815 }
 0x163   : > { %5511 = vst [vmem:[#allocation87_spill] sm:$0xff] %v3836_v19  ;;  %1269 = vperm.xlu0 %3178, %v3475_v34  }
 0x166   : > { %1157 = vperm.xlu1 %3176, %v3475_v34   ;;  %v3840_v54 = vpop.permute.xlu1 %791  ;;  %v3842_v47 = vpop.permute.xlu0 %821 }
 0x167   : > { %5512 = vst [vmem:[#allocation88_spill] sm:$0xff] %v3840_v54  ;;  %5513 = vst [vmem:[#allocation89_spill] sm:$0xff] %v3842_v47  ;;  %1275 = vperm.xlu0 %3178, %v3483_v36  }
 0x16a   : > { %1163 = vperm.xlu1 %3176, %v3483_v36   ;;  %v3846_v45 = vpop.permute.xlu1 %794  ;;  %v3848_v18 = vpop.permute.xlu0 %827 }
 0x16b   : > { %5514 = vst [vmem:[#allocation90_spill] sm:$0xff] %v3846_v45  ;;  %5515 = vst [vmem:[#allocation91_spill] sm:$0xff] %v3848_v18  ;;  %3179 = vset.pattern.permute.xlu0 %v5377_v11 }
 0x16c   : > { %1345 = vperm.xlu0 %3179, %v3427_v22  }
 0x16e   : > { %3177 = vset.pattern.permute.xlu1 %v3261_v56  ;;  %v3852_v19 = vpop.permute.xlu1 %800 }
 0x16f   : > { %5516 = vst [vmem:[#allocation92_spill] sm:$0xff] %v3852_v19  ;;  %1233 = vperm.xlu1 %3177, %v3427_v22   ;;  %v3855_v54 = vpop.permute.xlu0 %897 }
 0x170   : > { %5517 = vst [vmem:[#allocation93_spill] sm:$0xff] %v3855_v54  ;;  %1354 = vperm.xlu0 %3179, %v3432_v23  }
 0x172   : > { %v3858_v47 = vpop.permute.xlu1 %806 }
 0x173   : > { %5518 = vst [vmem:[#allocation94_spill] sm:$0xff] %v3858_v47  ;;  %1239 = vperm.xlu1 %3177, %v3424_v21   ;;  %v3861_v45 = vpop.permute.xlu0 %906 }
 0x174   : > { %5519 = vst [vmem:[#allocation95_spill] sm:$0xff] %v3861_v45  ;;  %1372 = vperm.xlu0 %3179, %v3456_v29  }
 0x176   : > { %v3864_v11 = vpop.permute.xlu1 %812 }
 0x177   : > { %5520 = vst [vmem:[#allocation96_spill] sm:$0xff] %v3864_v11  ;;  %1242 = vperm.xlu1 %3177, %v3432_v23   ;;  %v3867_v56 = vpop.permute.xlu0 %912 }
 0x178   : > { %5521 = vst [vmem:[#allocation97_spill] sm:$0xff] %v3867_v56  ;;  %1378 = vperm.xlu0 %3179, %v3464_v31  }
 0x17a   : > { %v3870_v18 = vpop.permute.xlu1 %818 }
 0x17b   : > { %5522 = vst [vmem:[#allocation98_spill] sm:$0xff] %v3870_v18  ;;  %1248 = vperm.xlu1 %3177, %v3440_v25   ;;  %v3873_v19 = vpop.permute.xlu0 %918 }
 0x17c   : > { %5523 = vst [vmem:[#allocation99_spill] sm:$0xff] %v3873_v19  ;;  %1357 = vperm.xlu0 %3179, %v3443_v26  }
 0x17e   : > { %v3876_v47 = vpop.permute.xlu1 %824 }
 0x17f   : > { %5524 = vst [vmem:[#allocation100_spill] sm:$0xff] %v3876_v47  ;;  %1254 = vperm.xlu1 %3177, %v3448_v27   ;;  %v3879_v45 = vpop.permute.xlu0 %924 }
 0x180   : > { %5525 = vst [vmem:[#allocation101_spill] sm:$0xff] %v3879_v45  ;;  %1384 = vperm.xlu0 %3179, %v3472_v33  }
 0x182   : > { %v3882_v11 = vpop.permute.xlu1 %830 }
 0x183   : > { %5526 = vst [vmem:[#allocation102_spill] sm:$0xff] %v3882_v11  ;;  %1260 = vperm.xlu1 %3177, %v3456_v29   ;;  %v3885_v56 = vpop.permute.xlu0 %930  ;;  %v5389_v11 = vmov 12  }
 0x184   : > { %5527 = vst [vmem:[#allocation103_spill] sm:$0xff] %v3885_v56  ;;  %1363 = vperm.xlu0 %3179, %v3451_v28  }
 0x187   : > { %1266 = vperm.xlu1 %3177, %v3464_v31   ;;  %v3889_v19 = vpop.permute.xlu1 %900  ;;  %v3891_v18 = vpop.permute.xlu0 %936 }
 0x188   : > { %5528 = vst [vmem:[#allocation104_spill] sm:$0xff] %v3889_v19  ;;  %5529 = vst [vmem:[#allocation105_spill] sm:$0xff] %v3891_v18  ;;  %1390 = vperm.xlu0 %3179, %v3480_v35   ;;  %v5534_v18 = vmov 11  }
 0x18b   : > { %1272 = vperm.xlu1 %3177, %v3472_v33   ;;  %v3895_v45 = vpop.permute.xlu1 %903  ;;  %v3897_v47 = vpop.permute.xlu0 %942 }
 0x18c   : > { %5530 = vst [vmem:[#allocation106_spill] sm:$0xff] %v3895_v45  ;;  %5531 = vst [vmem:[#allocation107_spill] sm:$0xff] %v3897_v47  ;;  %3187 = vset.pattern.permute.xlu0 %v5389_v11 }
 0x18d   : > { %1460 = vperm.xlu0 %3187, %v3435_v24  }
 0x18f   : > { %1278 = vperm.xlu1 %3177, %v3480_v35   ;;  %v3902_v56 = vpop.permute.xlu1 %909 }
 0x190   : > { %5532 = vst [vmem:[#allocation108_spill] sm:$0xff] %v3902_v56  ;;  %v3904_v19 = vpop.permute.xlu0 %1012 }
 0x191   : > { %5533 = vst [vmem:[#allocation109_spill] sm:$0xff] %v3904_v19  ;;  %1463 = vperm.xlu0 %3187, %v3424_v21  }
 0x193   : > { %3180 = vset.pattern.permute.xlu1 %v5534_v18  ;;  %v3908_v54 = vpop.permute.xlu1 %915 }
 0x194   : > { %5535 = vst [vmem:[#allocation110_spill] sm:$0xff] %v3908_v54  ;;  %1348 = vperm.xlu1 %3180, %v3435_v24   ;;  %v3911_v47 = vpop.permute.xlu0 %1021 }
 0x195   : > { %5536 = vst [vmem:[#allocation111_spill] sm:$0xff] %v3911_v47  ;;  %1487 = vperm.xlu0 %3187, %v3467_v32  }
 0x197   : > { %v3914_v11 = vpop.permute.xlu1 %921 }
 0x198   : > { %5537 = vst [vmem:[#allocation112_spill] sm:$0xff] %v3914_v11  ;;  %1351 = vperm.xlu1 %3180, %v3424_v21   ;;  %v3917_v45 = vpop.permute.xlu0 %1027 }
 0x199   : > { %5538 = vst [vmem:[#allocation113_spill] sm:$0xff] %v3917_v45  ;;  %1469 = vperm.xlu0 %3187, %v3443_v26   ;;  %v5544_v45 = vmov 12  }
 0x19b   : > { %v3920_v19 = vpop.permute.xlu1 %927 }
 0x19c   : > { %5539 = vst [vmem:[#allocation114_spill] sm:$0xff] %v3920_v19  ;;  %1369 = vperm.xlu1 %3180, %v3459_v30   ;;  %v3923_v56 = vpop.permute.xlu0 %1033 }
 0x19d   : > { %5540 = vst [vmem:[#allocation115_spill] sm:$0xff] %v3923_v56  ;;  %1496 = vperm.xlu0 %3187, %v3472_v33  }
 0x19f   : > { %v3926_v54 = vpop.permute.xlu1 %933 }
 0x1a0   : > { %5541 = vst [vmem:[#allocation116_spill] sm:$0xff] %v3926_v54  ;;  %1375 = vperm.xlu1 %3180, %v3467_v32   ;;  %v3929_v47 = vpop.permute.xlu0 %1039  ;;  %v5401_v54 = vmov 13  }
 0x1a1   : > { %5542 = vst [vmem:[#allocation117_spill] sm:$0xff] %v3929_v47  ;;  %1478 = vperm.xlu0 %3187, %v3448_v27  }
 0x1a3   : > { %v3932_v11 = vpop.permute.xlu1 %939 }
 0x1a4   : > { %5543 = vst [vmem:[#allocation118_spill] sm:$0xff] %v3932_v11  ;;  %3181 = vset.pattern.permute.xlu1 %v5544_v45  ;;  %v3935_v34 = vpop.permute.xlu0 %1045 }
 0x1a5   : > { %5545 = vst [vmem:[#allocation119_spill] sm:$0xff] %v3935_v34  ;;  %1457 = vperm.xlu1 %3181, %v3427_v22   ;;  %1502 = vperm.xlu0 %3187, %v3480_v35  }
 0x1a8   : > { %v3939_v19 = vpop.permute.xlu1 %1009  ;;  %v3941_v56 = vpop.permute.xlu0 %1051 }
 0x1a9   : > { %5546 = vst [vmem:[#allocation120_spill] sm:$0xff] %v3941_v56  ;;  %1481 = vperm.xlu1 %3181, %v3459_v30   ;;  %3190 = vset.pattern.permute.xlu0 %v5401_v54  ;;  %v3265_v56 = vmov 0.0  }
 0x1aa   : > { %1569 = vperm.xlu0 %3190, %v3427_v22   ;;  %v2679_v47 = vsel %vm162_vm1, 1.0, %v3265_v56  ;;  %v2680_v42 = vsel %vm163_vm3, 1.0, %v3265_v56  ;;  %v2678_v43 = vsel %vm161_vm4, 1.0, %v3265_v56  ;;  %v2681_v44 = vsel %vm164_vm5, 1.0, %v3265_v56 }
 0x1ab   : > { %v2683_v48 = vsel %vm166_vm6, 1.0, %v3265_v56  ;;  %v2686_v49 = vsel %vm169_vm7, 1.0, %v3265_v56  ;;  %v2694_v50 = vsel %vm273_vm8, 1.0, %v3265_v56  ;;  %v2693_v51 = vsel %vm272_vm9, 1.0, %v3265_v56 }
 0x1ac   : > { %v3946_v11 = vpop.permute.xlu1 %1015  ;;  %v2685_v52 = vsel %vm168_vm10, 1.0, %v3265_v56  ;;  %v2688_v53 = vsel %vm171_vm11, 1.0, %v3265_v56  ;;  %vm275_vm1 = vcmp.eq.s32.totalorder %v3373_v10, %v3590_v61  ;;  %v2687_v55 = vsel %vm170_vm12, 1.0, %v3265_v56 }
 0x1ad   : > { %5547 = vst [vmem:[#allocation121_spill] sm:$0xff] %v3946_v11  ;;  %1484 = vperm.xlu1 %3181, %v3456_v29   ;;  %v3949_v34 = vpop.permute.xlu0 %1121  ;;  %v2677_v11 = vsel %vm160_vm2, 1.0, %v3265_v56  ;;  %v2690_v59 = vsel %vm173_vm13, 1.0, %v3265_v56  ;;  %vm276_vm2 = vcmp.eq.s32.totalorder %v3373_v10, %v3593_v62  ;;  %vm278_vm3 = vcmp.eq.s32.totalorder %v3373_v10, %v3599_v3 }
 0x1ae   : > { %1596 = vperm.xlu0 %3190, %v3456_v29   ;;  %v320_v45 = vadd.f32 %v2693_v51, %v2677_v11  ;;  %vm280_vm4 = vcmp.eq.s32.totalorder %v3373_v10, %v3605_v20  ;;  %v2695_v61 = vsel %vm274_vm15, 1.0, %v3265_v56  ;;  %vm281_vm5 = vcmp.eq.s32.totalorder %v3373_v10, %v3607_v37 }
 0x1af   : > { %vm282_vm6 = vcmp.eq.s32.totalorder %v3373_v10, %v3611_v38  ;;  %v5552_v62 = vmov 13   ;;  %v2697_v3 = vsel %vm276_vm2, 1.0, %v3265_v56  ;;  %vm283_vm7 = vcmp.eq.s32.totalorder %v3373_v10, %v3613_v39 }
 0x1b0   : > { %v3960_v54 = vpop.permute.xlu1 %1018  ;;  %vm285_vm8 = vcmp.eq.s32.totalorder %v3373_v10, %v3619_v57  ;;  %vm287_vm9 = vcmp.eq.s32.totalorder %v3373_v10, %v3625_v0  ;;  %v2699_v20 = vsel %vm278_vm3, 1.0, %v3265_v56  ;;  %vm384_vm10 = vcmp.eq.s32.totalorder %v3373_v10, %v3630_v4 }
 0x1b1   : > { %1466 = vperm.xlu1 %3181, %v3432_v23   ;;  %v3967_v40 = vpop.permute.xlu0 %1130  ;;  %vm385_vm11 = vcmp.eq.s32.totalorder %v3373_v10, %v3632_v5  ;;  %v322_v39 = vadd.f32 %v2695_v61, %v2679_v47  ;;  %v2702_v0 = vsel %vm281_vm5, 1.0, %v3265_v56  ;;  %v2703_v57 = vsel %vm282_vm6, 1.0, %v3265_v56 }
 0x1b2   : > { %5548 = vst [vmem:[#allocation122_spill] sm:$0xff] %v3967_v40  ;;  %1578 = vperm.xlu0 %3190, %v3432_v23   ;;  %v2696_v40 = vsel %vm275_vm1, 1.0, %v3265_v56  ;;  %v2704_v4 = vsel %vm283_vm7, 1.0, %v3265_v56  ;;  %v2708_v5 = vsel %vm287_vm9, 1.0, %v3265_v56  ;;  %v2709_v37 = vsel %vm384_vm10, 1.0, %v3265_v56 }
 0x1b3   : > { %v2710_v61 = vsel %vm385_vm11, 1.0, %v3265_v56  ;;  %v329_v38 = vadd.f32 %v2702_v0, %v2686_v49  ;;  %vm386_vm12 = vcmp.eq.s32.totalorder %v3373_v10, %v3636_v6  ;;  %vm388_vm13 = vcmp.eq.s32.totalorder %v3373_v10, %v3638_v7 }
 0x1b4   : > { %v3991_v46 = vpop.permute.xlu1 %1024  ;;  %vm390_vm15 = vcmp.eq.s32.totalorder %v3373_v10, %v3644_v9  ;;  %vm392_vm1 = vcmp.eq.s32.totalorder %v3373_v10, %v3649_v12  ;;  %v2711_v7 = vsel %vm386_vm12, 1.0, %v3265_v56  ;;  %vm394_vm2 = vcmp.eq.s32.totalorder %v3373_v10, %v3655_v14 }
 0x1b5   : > { %5549 = vst [vmem:[#allocation123_spill] sm:$0xff] %v3991_v46  ;;  %1490 = vperm.xlu1 %3181, %v3464_v31   ;;  %v3998_v58 = vpop.permute.xlu0 %1136  ;;  %v2692_v46 = vsel %vm175_vm14, 1.0, %v3265_v56  ;;  %vm387_vm14 = vcmp.eq.s32.totalorder %v3373_v10, %v3642_v8  ;;  %vm393_vm3 = vcmp.eq.s32.totalorder %v3373_v10, %v3659_v15  ;;  %vm397_vm5 = vcmp.eq.s32.totalorder %v3373_v10, %v3671_v13 }
 0x1b6   : > { %5550 = vst [vmem:[#allocation124_spill] sm:$0xff] %v3998_v58  ;;  %1602 = vperm.xlu0 %3190, %v3464_v31   ;;  %v321_v58 = vadd.f32 %v2694_v50, %v2678_v43  ;;  %v2701_v43 = vsel %vm280_vm4, 1.0, %v3265_v56  ;;  %v323_v50 = vadd.f32 %v2696_v40, %v2680_v42  ;;  %v326_v40 = vadd.f32 %v2699_v20, %v2683_v48 }
 0x1b7   : > { %v328_v42 = vadd.f32 %v2701_v43, %v2685_v52  ;;  %v335_v48 = vadd.f32 %v2708_v5, %v2692_v46  ;;  %v432_v20 = vadd.f32 %v2709_v37, %v320_v45  ;;  %v2713_v46 = vsel %vm388_vm13, 1.0, %v3265_v56 }
 0x1b8   : > { %v4016_v60 = vpop.permute.xlu1 %1030  ;;  %v4069_v43 = vadd.f32 %v2710_v61, %v321_v58  ;;  %v2712_v8 = vsel %vm387_vm14, 1.0, %v3265_v56  ;;  %vm395_vm4 = vcmp.eq.s32.totalorder %v3373_v10, %v3665_v1  ;;  %v2715_v9 = vsel %vm390_vm15, 1.0, %v3265_v56 }
 0x1b9   : > { %5551 = vst [vmem:[#allocation125_spill] sm:$0xff] %v4016_v60  ;;  %3182 = vset.pattern.permute.xlu1 %v5552_v62  ;;  %v4025_v11 = vpop.permute.xlu0 %1142  ;;  %v2706_v60 = vsel %vm285_vm8, 1.0, %v3265_v56  ;;  %v2717_v12 = vsel %vm392_vm1, 1.0, %v3265_v56  ;;  %vm496_vm6 = vcmp.eq.s32.totalorder %v3373_v10, %v3674_v2  ;;  %vm399_vm7 = vcmp.eq.s32.totalorder %v3373_v10, %v3677_v16  ;;  %v5555_v16 = vld [vmem:[#allocation41_spill] sm:$0xff] }
 0x1ba   : > { %5553 = vst [vmem:[#allocation126_spill] sm:$0xff] %v4025_v11  ;;  %1572 = vperm.xlu1 %3182, %v3435_v24   ;;  %1584 = vperm.xlu0 %3190, %v3440_v25   ;;  %v324_v11 = vadd.f32 %v2697_v3, %v2681_v44  ;;  %v330_v44 = vadd.f32 %v2703_v57, %v2687_v55  ;;  %v2719_v45 = vsel %vm394_vm2, 1.0, %v3265_v56  ;;  %v2718_v1 = vsel %vm393_vm3, 1.0, %v3265_v56 }
 0x1bb   : > { %v331_v3 = vadd.f32 %v2704_v4, %v2688_v53  ;;  %v333_v62 = vadd.f32 %v2706_v60, %v2690_v59  ;;  %v434_v15 = vadd.f32 %v2711_v7, %v322_v39  ;;  %vm499_vm8 = vcmp.eq.s32.totalorder %v3373_v10, %v3680_v41  ;;  %v5556_v41 = vld [vmem:[#allocation42_spill] sm:$0xff]  ;;  %v5559_v7 = vld [vmem:[#allocation45_spill] sm:$0xff] }
 0x1bc   : > { %v4050_v51 = vpop.permute.xlu1 %1036  ;;  %v436_v49 = vadd.f32 %v2713_v46, %v324_v11  ;;  %v435_v58 = vadd.f32 %v2712_v8, %v323_v50  ;;  %v2720_v53 = vsel %vm395_vm4, 1.0, %v3265_v56  ;;  %v2722_v55 = vsel %vm397_vm5, 1.0, %v3265_v56  ;;  %v5560_v46 = vld [vmem:[#allocation46_spill] sm:$0xff]  ;;  %v5561_v8 = vld [vmem:[#allocation47_spill] sm:$0xff] }
 0x1bd   : > { %v4055_v47 = vpop.permute.xlu0 %1148  ;;  %v5405_v59 = vmov 14   ;;  %v438_v60 = vadd.f32 %v2715_v9, %v326_v40  ;;  %v440_v39 = vadd.f32 %v2717_v12, %v328_v42  ;;  %v2725_v0 = vsel %vm496_vm6, 1.0, %v3265_v56  ;;  %v5554_v42 = vld [vmem:[#allocation39_spill] sm:$0xff] }
 0x1be   : > { %1593 = vperm.xlu1 %3182, %v3459_v30   ;;  %1587 = vperm.xlu0 %3190, %v3451_v28   ;;  %v2724_v11 = vsel %vm399_vm7, 1.0, %v3265_v56  ;;  %v442_v50 = vadd.f32 %v2719_v45, %v330_v44  ;;  %v441_v57 = vadd.f32 %v2718_v1, %v329_v38  ;;  %v2728_v4 = vsel %vm499_vm8, 1.0, %v3265_v56  ;;  %v5557_v44 = vld [vmem:[#allocation43_spill] sm:$0xff]  ;;  %v5562_v45 = vld [vmem:[#allocation48_spill] sm:$0xff]  ;;  %v5563_v1 = vld [vmem:[#allocation50_spill] sm:$0xff] }
 0x1bf   : > { %vm497_vm9 = vcmp.eq.s32.totalorder %v3373_v10, %v3684_v17  ;;  %v443_v2 = vadd.f32 %v2720_v53, %v331_v3  ;;  %v445_v40 = vadd.f32 %v2722_v55, %v333_v62  ;;  %vm498_vm10 = vcmp.eq.s32.totalorder %v3373_v10, %v5554_v42  ;;  %v5558_v3 = vld [vmem:[#allocation44_spill] sm:$0xff] }
 0x1c0   : > { %v4067_v52 = vpop.permute.xlu1 %1042  ;;  %vm500_vm11 = vcmp.eq.s32.totalorder %v3373_v10, %v5555_v16  ;;  %v4131_v61 = vadd.f32 %v2725_v0, %v432_v20  ;;  %v447_v38 = vadd.f32 %v2724_v11, %v335_v48  ;;  %vm505_vm12 = vcmp.eq.s32.totalorder %v3373_v10, %v5556_v41  ;;  %v5564_v11 = vld [vmem:[#allocation52_spill] sm:$0xff] }
 0x1c1   : > { %v4075_v6 = vpop.permute.xlu0 %1154  ;;  %vm502_vm13 = vcmp.eq.s32.totalorder %v3373_v10, %v5557_v44  ;;  %v4138_v17 = vadd.f32 %v2728_v4, %v435_v58  ;;  %v2726_v62 = vsel %vm497_vm9, 1.0, %v3265_v56  ;;  %vm507_vm14 = vcmp.eq.s32.totalorder %v3373_v10, %v5558_v3 }
 0x1c2   : > { %1575 = vperm.xlu1 %3182, %v3424_v21   ;;  %1611 = vperm.xlu0 %3190, %v3483_v36   ;;  %vm504_vm15 = vcmp.eq.s32.totalorder %v3373_v10, %v5559_v7  ;;  %v2727_v48 = vsel %vm498_vm10, 1.0, %v3265_v56  ;;  %v2729_v20 = vsel %vm500_vm11, 1.0, %v3265_v56  ;;  %vm509_vm1 = vcmp.eq.s32.totalorder %v3373_v10, %v5560_v46 }
 0x1c3   : > { %vm506_vm2 = vcmp.eq.s32.totalorder %v3373_v10, %v5561_v8  ;;  %v2734_v9 = vsel %vm505_vm12, 1.0, %v3265_v56  ;;  %v2731_v12 = vsel %vm502_vm13, 1.0, %v3265_v56  ;;  %vm511_vm3 = vcmp.eq.s32.totalorder %v3373_v10, %v5562_v45  ;;  %v5568_v8 = vld [vmem:[#allocation54_spill] sm:$0xff] }
 0x1c4   : > { %v4096_v14 = vpop.permute.xlu1 %1048  ;;  %vm609_vm4 = vcmp.eq.s32.totalorder %v3373_v10, %v5563_v1  ;;  %v545_v53 = vadd.f32 %v2726_v62, %v4069_v43  ;;  %v2736_v55 = vsel %vm507_vm14, 1.0, %v3265_v56  ;;  %v2733_v0 = vsel %vm504_vm15, 1.0, %v3265_v56  ;;  %v5571_v1 = vld [vmem:[#allocation57_spill] sm:$0xff] }
 0x1c5   : > { %v4102_v13 = vpop.permute.xlu0 %1160  ;;  %vm612_vm5 = vcmp.eq.s32.totalorder %v3373_v10, %v5564_v11  ;;  %v546_v42 = vadd.f32 %v2727_v48, %v434_v15  ;;  %v548_v16 = vadd.f32 %v2729_v20, %v436_v49  ;;  %v2738_v41 = vsel %vm509_vm1, 1.0, %v3265_v56  ;;  %v5566_v20 = vld [vmem:[#allocation53_spill] sm:$0xff]  ;;  %v5574_v11 = vld [vmem:[#allocation64_spill] sm:$0xff] }
 0x1c6   : > { %1599 = vperm.xlu1 %3182, %v3467_v32   ;;  %3192 = vset.pattern.permute.xlu0 %v5405_v59  ;;  %v2735_v44 = vsel %vm506_vm2, 1.0, %v3265_v56  ;;  %v553_v43 = vadd.f32 %v2734_v9, %v441_v57  ;;  %v550_v62 = vadd.f32 %v2731_v12, %v438_v60  ;;  %v2740_v3 = vsel %vm511_vm3, 1.0, %v3265_v56  ;;  %v5569_v9 = vld [vmem:[#allocation55_spill] sm:$0xff] }
 0x1c7   : > { %1684 = vperm.xlu0 %3192, %v3435_v24   ;;  %v2742_v15 = vsel %vm609_vm4, 1.0, %v3265_v56  ;;  %v555_v49 = vadd.f32 %v2736_v55, %v443_v2  ;;  %v552_v7 = vadd.f32 %v2733_v0, %v440_v39  ;;  %v2745_v48 = vsel %vm612_vm5, 1.0, %v3265_v56  ;;  %v5570_v39 = vld [vmem:[#allocation56_spill] sm:$0xff]  ;;  %v5572_v55 = vld [vmem:[#allocation58_spill] sm:$0xff]  ;;  %v5573_v0 = vld [vmem:[#allocation63_spill] sm:$0xff] }
 0x1c8   : > { %v4123_v5 = vpop.permute.xlu1 %1054  ;;  %vm608_vm6 = vcmp.eq.s32.totalorder %v3373_v10, %v5566_v20  ;;  %v557_v60 = vadd.f32 %v2738_v41, %v445_v40  ;;  %v554_v57 = vadd.f32 %v2735_v44, %v442_v50  ;;  %vm614_vm7 = vcmp.eq.s32.totalorder %v3373_v10, %v5568_v8  ;;  %v5575_v44 = vld [vmem:[#allocation65_spill] sm:$0xff] }
 0x1c9   : > { %v4129_v37 = vpop.permute.xlu0 %1166  ;;  %vm610_vm8 = vcmp.eq.s32.totalorder %v3373_v10, %v5569_v9  ;;  %v559_v45 = vadd.f32 %v2740_v3, %v447_v38  ;;  %v4191_v2 = vadd.f32 %v2742_v15, %v545_v53  ;;  %vm616_vm9 = vcmp.eq.s32.totalorder %v3373_v10, %v5570_v39  ;;  %v5576_v3 = vld [vmem:[#allocation66_spill] sm:$0xff]  ;;  %v5577_v15 = vld [vmem:[#allocation67_spill] sm:$0xff]  ;;  %v5578_v39 = vld [vmem:[#allocation69_spill] sm:$0xff] }
 0x1ca   : > { %3183 = vset.pattern.permute.xlu1 %v5405_v59  ;;  %v4197_v40 = vadd.f32 %v2745_v48, %v548_v16  ;;  %v2741_v50 = vsel %vm608_vm6, 1.0, %v3265_v56  ;;  %vm611_vm10 = vcmp.eq.s32.totalorder %v3373_v10, %v5571_v1  ;;  %vm618_vm11 = vcmp.eq.s32.totalorder %v3373_v10, %v5572_v55  ;;  %v5581_v59 = vld [vmem:[#allocation72_spill] sm:$0xff] }
 0x1cb   : > { %1681 = vperm.xlu1 %3183, %v3427_v22   ;;  %1687 = vperm.xlu0 %3192, %v3424_v21   ;;  %v2747_v38 = vsel %vm614_vm7, 1.0, %v3265_v56  ;;  %v2743_v53 = vsel %vm610_vm8, 1.0, %v3265_v56  ;;  %vm617_vm12 = vcmp.eq.s32.totalorder %v3373_v10, %v5573_v0  ;;  %vm720_vm13 = vcmp.eq.s32.totalorder %v3373_v10, %v5574_v11 }
 0x1cc   : > { %v2749_v41 = vsel %vm616_vm9, 1.0, %v3265_v56  ;;  %vm619_vm14 = vcmp.eq.s32.totalorder %v3373_v10, %v5575_v44  ;;  %vm723_vm15 = vcmp.eq.s32.totalorder %v3373_v10, %v5576_v3  ;;  %vm621_vm1 = vcmp.eq.s32.totalorder %v3373_v10, %v5577_v15 }
 0x1cd   : > { %v4159_v58 = vpop.permute.xlu1 %1124  ;;  %v656_v20 = vadd.f32 %v2741_v50, %v4131_v61  ;;  %v2744_v8 = vsel %vm611_vm10, 1.0, %v3265_v56  ;;  %v2751_v9 = vsel %vm618_vm11, 1.0, %v3265_v56  ;;  %vm623_vm2 = vcmp.eq.s32.totalorder %v3373_v10, %v5578_v39  ;;  %v5579_v39 = vld [vmem:[#allocation71_spill] sm:$0xff] }
 0x1ce   : > { %v4166_v4 = vpop.permute.xlu0 %1236  ;;  %v4228_v1 = vadd.f32 %v2747_v38, %v550_v62  ;;  %v658_v55 = vadd.f32 %v2743_v53, %v546_v42  ;;  %v2750_v44 = vsel %vm617_vm12, 1.0, %v3265_v56  ;;  %v2757_v61 = vsel %vm720_vm13, 1.0, %v3265_v56 }
 0x1cf   : > { %5565 = vst [vmem:[#allocation39_spill] sm:$0xff] %v4166_v4  ;;  %1705 = vperm.xlu1 %3183, %v3459_v30   ;;  %1711 = vperm.xlu0 %3192, %v3467_v32   ;;  %v4238_v50 = vadd.f32 %v2749_v41, %v552_v7  ;;  %v2752_v3 = vsel %vm619_vm14, 1.0, %v3265_v56  ;;  %v2760_v15 = vsel %vm723_vm15, 1.0, %v3265_v56  ;;  %v2754_v62 = vsel %vm621_vm1, 1.0, %v3265_v56 }
 0x1d0   : > { %v659_v42 = vadd.f32 %v2744_v8, %v4138_v17  ;;  %v4246_v53 = vadd.f32 %v2751_v9, %v554_v57  ;;  %v2756_v0 = vsel %vm623_vm2, 1.0, %v3265_v56  ;;  %vm721_vm3 = vcmp.eq.s32.totalorder %v3373_v10, %v5579_v39  ;;  %v5582_v9 = vld [vmem:[#allocation73_spill] sm:$0xff] }
 0x1d1   : > { %v4183_v46 = vpop.permute.xlu1 %1127  ;;  %v665_v7 = vadd.f32 %v2750_v44, %v553_v43  ;;  %v4253_v41 = vadd.f32 %v2757_v61, %v656_v20  ;;  %vm729_vm4 = vcmp.eq.s32.totalorder %v3373_v10, %v5581_v59  ;;  %v667_v17 = vadd.f32 %v2752_v3, %v555_v49  ;;  %v5583_v43 = vld [vmem:[#allocation74_spill] sm:$0xff]  ;;  %v5584_v20 = vld [vmem:[#allocation75_spill] sm:$0xff]  ;;  %v5586_v44 = vld [vmem:[#allocation76_spill] sm:$0xff] }
 0x1d2   : > { %5567 = vst [vmem:[#allocation41_spill] sm:$0xff] %v4183_v46  ;;  %v4189_v12 = vpop.permute.xlu0 %1245  ;;  %v4259_v57 = vadd.f32 %v2760_v15, %v659_v42  ;;  %v669_v8 = vadd.f32 %v2754_v62, %v557_v60  ;;  %vm722_vm5 = vcmp.eq.s32.totalorder %v3373_v10, %v5582_v9  ;;  %v671_v39 = vadd.f32 %v2756_v0, %v559_v45  ;;  %v5587_v60 = vld [vmem:[#allocation77_spill] sm:$0xff]  ;;  %v5588_v45 = vld [vmem:[#allocation78_spill] sm:$0xff]  ;;  %v5590_v15 = vld [vmem:[#allocation79_spill] sm:$0xff] }
 0x1d3   : > { %1708 = vperm.xlu1 %3183, %v3456_v29   ;;  %1693 = vperm.xlu0 %3192, %v3443_v26   ;;  %vm731_vm6 = vcmp.eq.s32.totalorder %v3373_v10, %v5583_v43  ;;  %vm724_vm7 = vcmp.eq.s32.totalorder %v3373_v10, %v5584_v20  ;;  %v2766_v49 = vsel %vm729_vm4, 1.0, %v3265_v56  ;;  %vm733_vm8 = vcmp.eq.s32.totalorder %v3373_v10, %v5586_v44  ;;  %v5591_v62 = vld [vmem:[#allocation80_spill] sm:$0xff]  ;;  %v5592_v42 = vld [vmem:[#allocation81_spill] sm:$0xff]  ;;  %v5593_v43 = vld [vmem:[#allocation82_spill] sm:$0xff] }
 0x1d4   : > { %vm726_vm9 = vcmp.eq.s32.totalorder %v3373_v10, %v5587_v60  ;;  %vm735_vm10 = vcmp.eq.s32.totalorder %v3373_v10, %v5588_v45  ;;  %v2759_v3 = vsel %vm722_vm5, 1.0, %v3265_v56  ;;  %vm728_vm11 = vcmp.eq.s32.totalorder %v3373_v10, %v5590_v15  ;;  %v5594_v60 = vld [vmem:[#allocation84_spill] sm:$0xff] }
 0x1d5   : > { %v4210_v16 = vpop.permute.xlu1 %1133  ;;  %vm833_vm12 = vcmp.eq.s32.totalorder %v3373_v10, %v5591_v62  ;;  %vm730_vm13 = vcmp.eq.s32.totalorder %v3373_v10, %v5592_v42  ;;  %v2768_v0 = vsel %vm731_vm6, 1.0, %v3265_v56  ;;  %v2761_v9 = vsel %vm724_vm7, 1.0, %v3265_v56 }
 0x1d6   : > { %v4219_v48 = vpop.permute.xlu0 %1251  ;;  %vm836_vm14 = vcmp.eq.s32.totalorder %v3373_v10, %v5593_v43  ;;  %v2770_v20 = vsel %vm733_vm8, 1.0, %v3265_v56  ;;  %v2763_v44 = vsel %vm726_vm9, 1.0, %v3265_v56  ;;  %vm838_vm15 = vcmp.eq.s32.totalorder %v3373_v10, %v5594_v60  ;;  %v5601_v60 = vld [vmem:[#allocation90_spill] sm:$0xff] }
 0x1d7   : > { %1690 = vperm.xlu1 %3183, %v3432_v23   ;;  %1720 = vperm.xlu0 %3192, %v3472_v33   ;;  %v2758_v33 = vsel %vm721_vm3, 1.0, %v3265_v56  ;;  %vm832_vm1 = vcmp.eq.s32.totalorder %v3373_v10, %v3834_v63  ;;  %v2772_v26 = vsel %vm735_vm10, 1.0, %v3265_v56  ;;  %v4327_v15 = vadd.f32 %v2766_v49, %v665_v7  ;;  %v5598_v7 = vld [vmem:[#allocation24_spill] sm:$0xff]  ;;  %v5599_v49 = vld [vmem:[#allocation87_spill] sm:$0xff] }
 0x1d8   : > { %v769_v45 = vadd.f32 %v2758_v33, %v4191_v2  ;;  %v4329_v46 = vadd.f32 %v2759_v3, %v658_v55  ;;  %v2777_v62 = vsel %vm836_vm14, 1.0, %v3265_v56  ;;  %v5412_v42 = vmov 15   ;;  %v5597_v2 = vld [vmem:[#allocation86_spill] sm:$0xff]  ;;  %v5600_v3 = vld [vmem:[#allocation93_spill] sm:$0xff] }
 0x1d9   : > { %v4243_v38 = vpop.permute.xlu1 %1139  ;;  %v4337_v4 = vadd.f32 %v2768_v0, %v667_v17  ;;  %v2779_v33 = vsel %vm838_vm15, 1.0, %v3265_v56  ;;  %vm840_vm2 = vcmp.eq.s32.totalorder %v3373_v10, %v5597_v2  ;;  %v2773_v55 = vsel %vm832_vm1, 1.0, %v3265_v56 }
 0x1da   : > { %v4251_v11 = vpop.permute.xlu0 %1257  ;;  %v772_v17 = vadd.f32 %v2761_v9, %v4197_v40  ;;  %vm842_vm3 = vcmp.eq.s32.totalorder %v3373_v10, %v5599_v49  ;;  %vm944_vm4 = vcmp.eq.s32.totalorder %v3373_v10, %v5600_v3  ;;  %v4358_v43 = vadd.f32 %v2770_v20, %v669_v8 }
 0x1db   : > { %5580 = vst [vmem:[#allocation42_spill] sm:$0xff] %v4251_v11  ;;  %1714 = vperm.xlu1 %3183, %v3464_v31   ;;  %1702 = vperm.xlu0 %3192, %v3448_v27   ;;  %v2774_v11 = vsel %vm833_vm12, 1.0, %v3265_v56  ;;  %v774_v63 = vadd.f32 %v2763_v44, %v4228_v1  ;;  %vm835_vm5 = vcmp.eq.s32.totalorder %v3373_v10, %v5601_v60  ;;  %v3197_v1 = vld [vmem:[%s4324_s20 + $0x8] sm:$0xff]  }
 0x1dc   : > { %v4365_v40 = vadd.f32 %v2772_v26, %v671_v39  ;;  %vm1056_vm6 = vcmp.eq.s32.totalorder %v3373_v10, %v3939_v19  ;;  %v5602_v26 = vld [vmem:[#allocation88_spill] sm:$0xff]  ;;  %v5603_v39 = vmov 15   ;;  %vm1168_vm9 = vcmp.eq.s32.totalorder %v3373_v10, %v3949_v34 }
 0x1dd   : > { %v4268_v59 = vpop.permute.xlu1 %1145  ;;  %vm834_vm7 = vcmp.eq.s32.totalorder %v3373_v10, %v5602_v26  ;;  %v4402_v44 = vadd.f32 %v2779_v33, %v774_v63  ;;  %v2805_v2 = vsel %vm1056_vm6, 1.0, %v3265_v56  ;;  %v5606_v63 = vld [vmem:[#allocation98_spill] sm:$0xff]  ;;  %v5607_v34 = vld [vmem:[#allocation108_spill] sm:$0xff] }
 0x1de   : > { %5585 = vst [vmem:[#allocation43_spill] sm:$0xff] %v4268_v59  ;;  %v4277_v61 = vpop.permute.xlu0 %1263  ;;  %vm948_vm14 = vcmp.eq.s32.totalorder %v3373_v10, %v5607_v34 }
 0x1df   : > { %5589 = vst [vmem:[#allocation44_spill] sm:$0xff] %v4277_v61  ;;  %3184 = vset.pattern.permute.xlu1 %v5534_v18  ;;  %1726 = vperm.xlu0 %3192, %v3480_v35   ;;  %v2765_v61 = vsel %vm728_vm11, 1.0, %v3265_v56  ;;  %vm1059_vm11 = vcmp.eq.s32.totalorder %v3373_v10, %v3960_v54  ;;  %v2793_v54 = vsel %vm948_vm14, 1.0, %v3265_v56 }
 0x1e0   : > { %1360 = vperm.xlu1 %3184, %v3440_v25   ;;  %v776_v9 = vadd.f32 %v2765_v61, %v4238_v50  ;;  %v2789_v50 = vsel %vm944_vm4, 1.0, %v3265_v56  ;;  %v880_v61 = vadd.f32 %v2773_v55, %v4253_v41  ;;  %v884_v41 = vadd.f32 %v2777_v62, %v772_v17  ;;  %v3198_v62 = vld [vmem:[%s4324_s20 + $0x10] sm:$0xff]  }
 0x1e1   : > { %v4301_v35 = vpop.permute.xlu1 %1151  ;;  %v2821_v17 = vsel %vm1168_vm9, 1.0, %v3265_v56  ;;  %v2808_v26 = vsel %vm1059_vm11, 1.0, %v3265_v56  ;;  %vm1172_vm4 = vcmp.eq.s32.totalorder %v3373_v10, %v4210_v16 }
 0x1e2   : > { %5595 = vst [vmem:[#allocation45_spill] sm:$0xff] %v4301_v35  ;;  %v2767_v35 = vsel %vm730_vm13, 1.0, %v3265_v56  ;;  %v4319_v59 = vpop.permute.xlu0 %1269  ;;  %vm843_vm13 = vcmp.eq.s32.totalorder %v3373_v10, %v5606_v63  ;;  %v5612_v63 = vld [vmem:[#allocation110_spill] sm:$0xff] }
 0x1e3   : > { %5596 = vst [vmem:[#allocation46_spill] sm:$0xff] %v4319_v59  ;;  %3194 = vset.pattern.permute.xlu0 %v5412_v42  ;;  %v3196_v59 = vld [vmem:[%s4324_s20] sm:$0xff]   ;;  %v2781_v42 = vsel %vm840_vm2, 1.0, %v3265_v56  ;;  %v778_v8 = vadd.f32 %v2767_v35, %v4246_v53  ;;  %v2776_v35 = vsel %vm835_vm5, 1.0, %v3265_v56  ;;  %v5604_v53 = vld [vmem:[#allocation95_spill] sm:$0xff]  ;;  %vm950_vm6 = vcmp.eq.s32.totalorder %v3373_v10, %v5612_v63 }
 0x1e4   : > { %1381 = vperm.xlu1 %3184, %v5598_v7   ;;  %1796 = vperm.xlu0 %3194, %v3435_v24   ;;  %vm947_vm8 = vcmp.eq.s32.totalorder %v3373_v10, %v5604_v53  ;;  %v4408_v55 = vadd.f32 %v2781_v42, %v776_v9  ;;  %v883_v33 = vadd.f32 %v2776_v35, %v4259_v57  ;;  %v5605_v42 = vld [vmem:[#allocation96_spill] sm:$0xff]  ;;  %v2784_v35 = vsel %vm843_vm13, 1.0, %v3265_v56  ;;  %v5609_v53 = vld [vmem:[#allocation122_spill] sm:$0xff] }
 0x1e5   : > { %v4356_v0 = vpop.permute.xlu1 %1157  ;;  %3008 = vmatprep.subr.bf16.mxu0 %v3196_v59  ;;  %3096 = vmatprep.subr.bf16.mxu1 %v3196_v59  ;;  %v2792_v19 = vsel %vm947_vm8, 1.0, %v3265_v56  ;;  %vm841_vm10 = vcmp.eq.s32.totalorder %v3373_v10, %v5605_v42  ;;  %vm1171_vm2 = vcmp.eq.s32.totalorder %v3373_v10, %v5609_v53  ;;  %vm1065_vm13 = vcmp.eq.s32.totalorder %v3373_v10, %v4050_v51 }
 0x1e6   : > { %v4363_v24 = vpop.permute.xlu0 %1275  ;;  %3009 = vmatpush3.bf16.msra.mxu0 %v3196_v59  ;;  %3104 = vmatpush3.bf16.msra.mxu1 %v3196_v59  ;;  %v2783_v59 = vsel %vm842_vm3, 1.0, %v3265_v56  ;;  %v995_v9 = vadd.f32 %v2792_v19, %v883_v33  ;;  %v5611_v33 = vld [vmem:[#allocation101_spill] sm:$0xff]  ;;  %v2824_v34 = vsel %vm1171_vm2, 1.0, %v3265_v56  ;;  %vm1177_vm2 = vcmp.eq.s32.totalorder %v3373_v10, %v4055_v47 }
 0x1e7   : > { %3010 = vmatprep.subr.bf16.mxu0 %v3197_v1  ;;  %3097 = vmatprep.subr.bf16.mxu1 %v3197_v1  ;;  %v4410_v49 = vadd.f32 %v2783_v59, %v778_v8  ;;  %v3199_v59 = vld [vmem:[%s4324_s20 + $0x18] sm:$0xff]   ;;  %vm953_vm5 = vcmp.eq.s32.totalorder %v3373_v10, %v5611_v33 }
 0x1e8   : > { %3185 = vset.pattern.permute.xlu1 %v5603_v39  ;;  %1802 = vperm.xlu0 %3194, %v3432_v23   ;;  %v4400_v23 = vadd.f32 %v2774_v11, %v769_v45  ;;  %v992_v11 = vadd.f32 %v2789_v50, %v880_v61 }
 0x1e9   : > { %1793 = vperm.xlu1 %3185, %v3427_v22   ;;  %v4398_v20 = vpop.permute.xlu1 %1163  ;;  %v2775_v22 = vsel %vm834_vm7, 1.0, %v3265_v56 }
 0x1ea   : > { %3011 = vmatpush3.bf16.msra.mxu0 %v3197_v1  ;;  %3105 = vmatpush3.bf16.msra.mxu1 %v3197_v1  ;;  %v1104_v3 = vadd.f32 %v2805_v2, %v992_v11  ;;  %v4434_v57 = vadd.f32 %v2775_v22, %v4329_v46  ;;  %v2782_v1 = vsel %vm841_vm10, 1.0, %v3265_v56  ;;  %v5608_v46 = vld [vmem:[#allocation111_spill] sm:$0xff]  ;;  %v5610_v11 = vld [vmem:[#allocation100_spill] sm:$0xff]  ;;  %vm1284_vm10 = vcmp.eq.s32.totalorder %v3373_v10, %v4189_v12 }
 0x1eb   : > { %v1346_v45 = vpop.permute.xlu0 %1345  ;;  %3012 = vmatprep.subr.bf16.mxu0 %v3198_v62  ;;  %3098 = vmatprep.subr.bf16.mxu1 %v3198_v62  ;;  %vm1060_vm1 = vcmp.eq.s32.totalorder %v3373_v10, %v5608_v46  ;;  %v889_v22 = vadd.f32 %v2782_v1, %v4327_v15  ;;  %vm845_vm3 = vcmp.eq.s32.totalorder %v3373_v10, %v5610_v11  ;;  %v5614_v1 = vld [vmem:[#allocation103_spill] sm:$0xff]  ;;  %v2841_v11 = vsel %vm1284_vm10, 1.0, %v3265_v56 }
 0x1ec   : > { %1808 = vperm.xlu0 %3194, %v3440_v25   ;;  %vm1392_vm12 = vcmp.eq.s32.totalorder %v3373_v10, %v1346_v45  ;;  %v1216_v8 = vadd.f32 %v2821_v17, %v1104_v3  ;;  %v1107_v15 = vadd.f32 %v2808_v26, %v995_v9  ;;  %v4484_v17 = vadd.f32 %v2784_v35, %v4337_v4  ;;  %v5613_v9 = vld [vmem:[#allocation102_spill] sm:$0xff] }
 0x1ed   : > { %1817 = vperm.xlu1 %3185, %v3459_v30   ;;  %v2853_v50 = vsel %vm1392_vm12, 1.0, %v3265_v56  ;;  %v996_v3 = vadd.f32 %v2793_v54, %v884_v41  ;;  %vm847_vm7 = vcmp.eq.s32.totalorder %v3373_v10, %v5613_v9  ;;  %v2825_v4 = vsel %vm1172_vm4, 1.0, %v3265_v56  ;;  %v3202_v9 = vld [vmem:[%s4324_s20 + $0x30] sm:$0xff]  }
 0x1ee   : > { %v1234_v60 = vpop.permute.xlu1 %1233  ;;  %3013 = vmatpush3.bf16.msra.mxu0 %v3198_v62  ;;  %3106 = vmatpush3.bf16.msra.mxu1 %v3198_v62  ;;  %v3200_v62 = vld [vmem:[%s4324_s20 + $0x20] sm:$0xff]   ;;  %v2798_v41 = vsel %vm953_vm5, 1.0, %v3265_v56  ;;  %vm955_vm9 = vcmp.eq.s32.totalorder %v3373_v10, %v5614_v1  ;;  %v1219_v46 = vadd.f32 %v2824_v34, %v1107_v15  ;;  %vm1286_vm5 = vcmp.eq.s32.totalorder %v3373_v10, %v4219_v48 }
 0x1ef   : > { %vm1280_vm15 = vcmp.eq.s32.totalorder %v3373_v10, %v1234_v60  ;;  %v1355_v30 = vpop.permute.xlu0 %1354  ;;  %3014 = vmatprep.subr.bf16.mxu0 %v3199_v59  ;;  %3099 = vmatprep.subr.bf16.mxu1 %v3199_v59  ;;  %v2786_v60 = vsel %vm845_vm3, 1.0, %v3265_v56  ;;  %v1001_v53 = vadd.f32 %v2798_v41, %v889_v22  ;;  %v5616_v22 = vld [vmem:[#allocation104_spill] sm:$0xff]  ;;  %vm1067_vm3 = vcmp.eq.s32.totalorder %v3373_v10, %v4067_v52  ;;  %v5618_v52 = vld [vmem:[#allocation106_spill] sm:$0xff] }
 0x1f0   : > { %v2837_v61 = vsel %vm1280_vm15, 1.0, %v3265_v56  ;;  %1811 = vperm.xlu0 %3194, %v3451_v28   ;;  %vm1395_vm8 = vcmp.eq.s32.totalorder %v3373_v10, %v1355_v30  ;;  %v2800_v30 = vsel %vm955_vm9, 1.0, %v3265_v56  ;;  %vm945_vm14 = vcmp.eq.s32.totalorder %v3373_v10, %v5616_v22 }
 0x1f1   : > { %v1328_v2 = vadd.f32 %v2837_v61, %v1216_v8  ;;  %1820 = vperm.xlu1 %3185, %v3456_v29   ;;  %v2809_v29 = vsel %vm1060_vm1, 1.0, %v3265_v56  ;;  %v2856_v35 = vsel %vm1395_vm8, 1.0, %v3265_v56  ;;  %vm1174_vm15 = vcmp.eq.s32.totalorder %v3373_v10, %v4243_v38 }
 0x1f2   : > { %v4470_v45 = vpop.permute.xlu1 %1239  ;;  %3015 = vmatpush3.bf16.msra.mxu0 %v3199_v59  ;;  %3107 = vmatpush3.bf16.msra.mxu1 %v3199_v59  ;;  %v1108_v8 = vadd.f32 %v2809_v29, %v996_v3  ;;  %v5615_v59 = vld [vmem:[#allocation113_spill] sm:$0xff]  ;;  %v2814_v3 = vsel %vm1065_vm13, 1.0, %v3265_v56  ;;  %v2790_v51 = vsel %vm945_vm14, 1.0, %v3265_v56  ;;  %v2827_v41 = vsel %vm1174_vm15, 1.0, %v3265_v56 }
 0x1f3   : > { %v4479_v19 = vpop.permute.xlu0 %1372  ;;  %v4481_v42 = vadd.f32 %v2853_v50, %v1328_v2  ;;  %3016 = vmatprep.subr.bf16.mxu0 %v3200_v62  ;;  %3100 = vmatprep.subr.bf16.mxu1 %v3200_v62  ;;  %vm1062_vm11 = vcmp.eq.s32.totalorder %v3373_v10, %v5615_v59  ;;  %v3201_v50 = vld [vmem:[%s4324_s20 + $0x28] sm:$0xff]   ;;  %v2788_v2 = vsel %vm847_vm7, 1.0, %v3265_v56  ;;  %v5617_v29 = vld [vmem:[#allocation105_spill] sm:$0xff]  ;;  %v893_v59 = vadd.f32 %v2786_v60, %v4358_v43 }
 0x1f4   : > { %1835 = vperm.xlu0 %3194, %v3483_v36   ;;  %v1220_v61 = vadd.f32 %v2825_v4, %v1108_v8  ;;  %v2811_v33 = vsel %vm1062_vm11, 1.0, %v3265_v56  ;;  %vm957_vm1 = vcmp.eq.s32.totalorder %v3373_v10, %v5617_v29  ;;  %v1003_v43 = vadd.f32 %v2800_v30, %v4484_v17  ;;  %v5620_v29 = vld [vmem:[#allocation109_spill] sm:$0xff] }
 0x1f5   : > { %3186 = vset.pattern.permute.xlu1 %v5534_v18  ;;  %v2795_v18 = vsel %vm950_vm6, 1.0, %v3265_v56  ;;  %v2802_v8 = vsel %vm957_vm1, 1.0, %v3265_v56  ;;  %vm1179_vm6 = vcmp.eq.s32.totalorder %v3373_v10, %v4075_v6  ;;  %vm1069_vm7 = vcmp.eq.s32.totalorder %v3373_v10, %v4096_v14  ;;  %v5619_v6 = vld [vmem:[#allocation107_spill] sm:$0xff] }
 0x1f6   : > { %1366 = vperm.xlu1 %3186, %v3448_v27   ;;  %v1243_v16 = vpop.permute.xlu1 %1242  ;;  %3017 = vmatpush3.bf16.msra.mxu0 %v3200_v62  ;;  %v998_v15 = vadd.f32 %v2795_v18, %v4402_v44  ;;  %v1332_v4 = vadd.f32 %v2841_v11, %v1220_v61  ;;  %v2816_v61 = vsel %vm1067_vm3, 1.0, %v3265_v56  ;;  %v1005_v60 = vadd.f32 %v2802_v8, %v893_v59  ;;  %v5621_v59 = vld [vmem:[#allocation112_spill] sm:$0xff] }
 0x1f7   : > { %vm1283_vm12 = vcmp.eq.s32.totalorder %v3373_v10, %v1243_v16  ;;  %v4521_v26 = vpop.permute.xlu0 %1378  ;;  %3108 = vmatpush3.bf16.msra.mxu1 %v3200_v62  ;;  %3018 = vmatprep.subr.bf16.mxu0 %v3201_v50  ;;  %v1113_v16 = vadd.f32 %v2814_v3, %v1001_v53  ;;  %vm1401_vm8 = vcmp.eq.s32.totalorder %v3373_v10, %v4479_v19  ;;  %v2832_v53 = vsel %vm1179_vm6, 1.0, %v3265_v56 }
 0x1f8   : > { %v2840_v54 = vsel %vm1283_vm12, 1.0, %v3265_v56  ;;  %3101 = vmatprep.subr.bf16.mxu1 %v3201_v50  ;;  %v1110_v44 = vadd.f32 %v2811_v33, %v998_v15  ;;  %vm946_vm9 = vcmp.eq.s32.totalorder %v3373_v10, %v5618_v52  ;;  %vm959_vm10 = vcmp.eq.s32.totalorder %v3373_v10, %v5619_v6  ;;  %v5624_v6 = vld [vmem:[#allocation114_spill] sm:$0xff] }
 0x1f9   : > { %v1331_v62 = vadd.f32 %v2840_v54, %v1219_v46  ;;  %v895_v46 = vadd.f32 %v2788_v2, %v4365_v40  ;;  %v3203_v54 = vld [vmem:[%s4324_s20 + $0x38] sm:$0xff]   ;;  %v993_v40 = vadd.f32 %v2790_v51, %v4400_v23  ;;  %v1115_v17 = vadd.f32 %v2816_v61, %v1003_v43 }
 0x1fa   : > { %1387 = vperm.xlu1 %3186, %v3483_v36   ;;  %v4551_v12 = vpop.permute.xlu1 %1248  ;;  %3019 = vmatpush3.bf16.msra.mxu0 %v3201_v50  ;;  %v1222_v47 = vadd.f32 %v2827_v41, %v1110_v44  ;;  %v2818_v48 = vsel %vm1069_vm7, 1.0, %v3265_v56  ;;  %vm1181_vm11 = vcmp.eq.s32.totalorder %v3373_v10, %v4102_v13  ;;  %v2862_v11 = vsel %vm1401_vm8, 1.0, %v3265_v56 }
 0x1fb   : > { %v1358_v63 = vpop.permute.xlu0 %1357  ;;  %v4560_v34 = vadd.f32 %v2856_v35, %v1331_v62  ;;  %3109 = vmatpush3.bf16.msra.mxu1 %v3201_v50  ;;  %3020 = vmatprep.subr.bf16.mxu0 %v3202_v9  ;;  %v2830_v50 = vsel %vm1177_vm2, 1.0, %v3265_v56  ;;  %vm1071_vm14 = vcmp.eq.s32.totalorder %v3373_v10, %v4123_v5  ;;  %vm1403_vm15 = vcmp.eq.s32.totalorder %v3373_v10, %v4521_v26 }
 0x1fc   : > { %vm1396_vm4 = vcmp.eq.s32.totalorder %v3373_v10, %v1358_v63  ;;  %3102 = vmatprep.subr.bf16.mxu1 %v3202_v9  ;;  %v1225_v14 = vadd.f32 %v2830_v50, %v1113_v16  ;;  %v2791_v19 = vsel %vm946_vm9, 1.0, %v3265_v56  ;;  %v2804_v33 = vsel %vm959_vm10, 1.0, %v3265_v56 }
 0x1fd   : > { %v2857_v1 = vsel %vm1396_vm4, 1.0, %v3265_v56  ;;  %vm1057_vm1 = vcmp.eq.s32.totalorder %v3373_v10, %v5620_v29  ;;  %v1227_v63 = vadd.f32 %v2832_v53, %v1115_v17  ;;  %v2834_v44 = vsel %vm1181_vm11, 1.0, %v3265_v56  ;;  %v5626_v17 = vld [vmem:[#allocation39_spill] sm:$0xff] }
 0x1fe   : > { %v4583_v18 = vadd.f32 %v2857_v1, %v1332_v4  ;;  %3188 = vset.pattern.permute.xlu1 %v5603_v39  ;;  %v4586_v38 = vpop.permute.xlu1 %1254  ;;  %3021 = vmatpush3.bf16.msra.mxu0 %v3202_v9  ;;  %v2820_v41 = vsel %vm1071_vm14, 1.0, %v3265_v56  ;;  %v2864_v1 = vsel %vm1403_vm15, 1.0, %v3265_v56  ;;  %v1007_v8 = vadd.f32 %v2804_v33, %v895_v46 }
 0x1ff   : > { %1799 = vperm.xlu1 %3188, %v3424_v21   ;;  %v4599_v35 = vpop.permute.xlu0 %1384  ;;  %3110 = vmatpush3.bf16.msra.mxu1 %v3202_v9  ;;  %v2843_v21 = vsel %vm1286_vm5, 1.0, %v3265_v56  ;;  %v1117_v9 = vadd.f32 %v2818_v48, %v1005_v60  ;;  %vm1183_vm3 = vcmp.eq.s32.totalorder %v3373_v10, %v4129_v37  ;;  %v994_v16 = vadd.f32 %v2791_v19, %v4434_v57  ;;  %v5623_v57 = vld [vmem:[#allocation115_spill] sm:$0xff] }
 0x200   : > { %3022 = vmatprep.subr.bf16.mxu0 %v3203_v54  ;;  %3103 = vmatprep.subr.bf16.mxu1 %v3203_v54  ;;  %v1334_v30 = vadd.f32 %v2843_v21, %v1222_v47  ;;  %vm1405_vm4 = vcmp.eq.s32.totalorder %v3373_v10, %v4599_v35  ;;  %v2806_v5 = vsel %vm1057_vm1, 1.0, %v3265_v56  ;;  %vm952_vm5 = vcmp.eq.s32.totalorder %v3373_v10, %v5621_v59 }
 0x201   : > { %vm1169_vm6 = vcmp.eq.s32.totalorder %v3373_v10, %v4159_v58  ;;  %v1229_v46 = vadd.f32 %v2834_v44, %v1117_v9  ;;  %v1119_v37 = vadd.f32 %v2820_v41, %v1007_v8  ;;  %v5622_v50 = vmov 12   ;;  %v5630_v8 = vld [vmem:[#allocation42_spill] sm:$0xff] }
 0x202   : > { %v1261_v23 = vpop.permute.xlu1 %1260  ;;  %3023 = vmatpush3.bf16.msra.mxu0 %v3203_v54  ;;  %vm1064_vm8 = vcmp.eq.s32.totalorder %v3373_v10, %v5623_v57  ;;  %v2836_v35 = vsel %vm1183_vm3, 1.0, %v3265_v56  ;;  %v1105_v47 = vadd.f32 %v2806_v5, %v993_v40  ;;  %v2822_v60 = vsel %vm1169_vm6, 1.0, %v3265_v56 }
 0x203   : > { %vm1289_vm12 = vcmp.eq.s32.totalorder %v3373_v10, %v1261_v23  ;;  %1823 = vperm.xlu1 %3188, %v3467_v32   ;;  %v1364_v2 = vpop.permute.xlu0 %1363  ;;  %3111 = vmatpush3.bf16.msra.mxu1 %v3203_v54  ;;  %v2866_v54 = vsel %vm1405_vm4, 1.0, %v3265_v56  ;;  %v2797_v52 = vsel %vm952_vm5, 1.0, %v3265_v56  ;;  %vm954_vm10 = vcmp.eq.s32.totalorder %v3373_v10, %v5624_v6 }
 0x204   : > { %v2846_v62 = vsel %vm1289_vm12, 1.0, %v3265_v56  ;;  %vm1398_vm13 = vcmp.eq.s32.totalorder %v3373_v10, %v1364_v2  ;;  %vm1281_vm12 = vcmp.eq.s32.totalorder %v3373_v10, %v5626_v17  ;;  %v2813_v23 = vsel %vm1064_vm8, 1.0, %v3265_v56 }
 0x205   : > { %v1337_v22 = vadd.f32 %v2846_v62, %v1225_v14  ;;  %v2859_v32 = vsel %vm1398_vm13, 1.0, %v3265_v56  ;;  %v5625_v14 = vld [vmem:[#allocation121_spill] sm:$0xff]  ;;  %v1231_v53 = vadd.f32 %v2836_v35, %v1119_v37  ;;  %v1217_v2 = vadd.f32 %v2822_v60, %v1105_v47 }
 0x206   : > { %v4645_v15 = vadd.f32 %v2859_v32, %v1334_v30  ;;  %v1267_v3 = vpop.permute.xlu1 %1266  ;;  %vm1058_vm11 = vcmp.eq.s32.totalorder %v3373_v10, %v5625_v14  ;;  %v1000_v32 = vadd.f32 %v2797_v52, %v4408_v55  ;;  %v2838_v33 = vsel %vm1281_vm12, 1.0, %v3265_v56  ;;  %v5629_v55 = vld [vmem:[#allocation117_spill] sm:$0xff]  ;;  %v5632_v14 = vld [vmem:[#allocation44_spill] sm:$0xff] }
 0x207   : > { %vm1291_vm2 = vcmp.eq.s32.totalorder %v3373_v10, %v1267_v3  ;;  %1826 = vperm.xlu1 %3188, %v3464_v31   ;;  %v1391_v4 = vpop.permute.xlu0 %1390  ;;  %v4649_v51 = vadd.f32 %v2862_v11, %v1337_v22  ;;  %v5627_v11 = vld [vmem:[#allocation41_spill] sm:$0xff]  ;;  %v2807_v19 = vsel %vm1058_vm11, 1.0, %v3265_v56  ;;  %v2799_v3 = vsel %vm954_vm10, 1.0, %v3265_v56 }
 0x208   : > { %v2848_v31 = vsel %vm1291_vm2, 1.0, %v3265_v56  ;;  %vm1407_vm9 = vcmp.eq.s32.totalorder %v3373_v10, %v1391_v4  ;;  %vm1170_vm14 = vcmp.eq.s32.totalorder %v3373_v10, %v5627_v11  ;;  %vm1282_vm1 = vcmp.eq.s32.totalorder %v3373_v10, %v4470_v45  ;;  %v5631_v37 = vld [vmem:[#allocation45_spill] sm:$0xff] }
 0x209   : > { %v1339_v13 = vadd.f32 %v2848_v31, %v1227_v63  ;;  %v2868_v62 = vsel %vm1407_vm9, 1.0, %v3265_v56  ;;  %v5628_v63 = vld [vmem:[#allocation43_spill] sm:$0xff]  ;;  %v1112_v9 = vadd.f32 %v2813_v23, %v1000_v32  ;;  %vm1066_vm3 = vcmp.eq.s32.totalorder %v3373_v10, %v5629_v55 }
 0x20a   : > { %v1273_v26 = vpop.permute.xlu1 %1272  ;;  %vm1176_vm15 = vcmp.eq.s32.totalorder %v3373_v10, %v5628_v63  ;;  %v2823_v4 = vsel %vm1170_vm14, 1.0, %v3265_v56  ;;  %v1329_v31 = vadd.f32 %v2838_v33, %v1217_v2  ;;  %vm1288_vm4 = vcmp.eq.s32.totalorder %v3373_v10, %v5630_v8  ;;  %v5634_v33 = vld [vmem:[#allocation22_spill] sm:$0xff] }
 0x20b   : > { %vm1293_vm7 = vcmp.eq.s32.totalorder %v3373_v10, %v1273_v26  ;;  %3189 = vset.pattern.permute.xlu1 %v5622_v50  ;;  %v4679_v61 = vadd.f32 %v2864_v1, %v1339_v13  ;;  %v1106_v1 = vadd.f32 %v2807_v19, %v994_v16  ;;  %v2829_v13 = vsel %vm1176_vm15, 1.0, %v3265_v56 }
 0x20c   : > { %v2850_v43 = vsel %vm1293_vm7, 1.0, %v3265_v56  ;;  %1472 = vperm.xlu1 %3189, %v3440_v25   ;;  %v1461_v58 = vpop.permute.xlu0 %1460  ;;  %v2839_v5 = vsel %vm1282_vm1, 1.0, %v3265_v56  ;;  %vm1178_vm6 = vcmp.eq.s32.totalorder %v3373_v10, %v5631_v37  ;;  %v1002_v50 = vadd.f32 %v2799_v3, %v4410_v49  ;;  %v5636_v37 = vld [vmem:[#allocation25_spill] sm:$0xff] }
 0x20d   : > { %v1341_v21 = vadd.f32 %v2850_v43, %v1229_v46  ;;  %vm1505_vm2 = vcmp.eq.s32.totalorder %v3373_v10, %v1461_v58  ;;  %v1218_v46 = vadd.f32 %v2823_v4, %v1106_v1  ;;  %v2815_v57 = vsel %vm1066_vm3, 1.0, %v3265_v56 }
 0x20e   : > { %v1279_v40 = vpop.permute.xlu1 %1278  ;;  %v2870_v59 = vsel %vm1505_vm2, 1.0, %v3265_v56  ;;  %v2845_v35 = vsel %vm1288_vm4, 1.0, %v3265_v56  ;;  %v1224_v43 = vadd.f32 %v2829_v13, %v1112_v9  ;;  %v1114_v6 = vadd.f32 %v2815_v57, %v1002_v50 }
 0x20f   : > { %vm1295_vm13 = vcmp.eq.s32.totalorder %v3373_v10, %v1279_v40  ;;  %v4701_v48 = vadd.f32 %v2866_v54, %v1341_v21  ;;  %v1330_v58 = vadd.f32 %v2839_v5, %v1218_v46  ;;  %v2831_v21 = vsel %vm1178_vm6, 1.0, %v3265_v56 }
 0x210   : > { %v2852_v30 = vsel %vm1295_vm13, 1.0, %v3265_v56  ;;  %1493 = vperm.xlu1 %3189, %v5598_v7   ;;  %v1464_v22 = vpop.permute.xlu0 %1463  ;;  %vm1290_vm10 = vcmp.eq.s32.totalorder %v3373_v10, %v5632_v14  ;;  %v1226_v2 = vadd.f32 %v2831_v21, %v1114_v6  ;;  %v1336_v11 = vadd.f32 %v2845_v35, %v1224_v43 }
 0x211   : > { %v1343_v29 = vadd.f32 %v2852_v30, %v1231_v53  ;;  %vm1506_vm7 = vcmp.eq.s32.totalorder %v3373_v10, %v1464_v22  ;;  %v2847_v32 = vsel %vm1290_vm10, 1.0, %v3265_v56  ;;  %v5637_v57 = vmov 14  }
 0x212   : > { %v2871_v49 = vsel %vm1506_vm7, 1.0, %v3265_v56  ;;  %v1338_v9 = vadd.f32 %v2847_v32, %v1226_v2  ;;  %v5643_v32 = vld [vmem:[#allocation34_spill] sm:$0xff] }
 0x213   : > { %v1349_v44 = vpop.permute.xlu1 %1348  ;;  %v4723_v41 = vadd.f32 %v2868_v62, %v1343_v29  ;;  %v5633_v62 = vmov 13   ;;  %vm389_vm10 = vcmp.eq.s32.totalorder %v3373_v10, %v5643_v32 }
 0x214   : > { %vm1393_vm5 = vcmp.eq.s32.totalorder %v3373_v10, %v1349_v44  ;;  %1475 = vperm.xlu1 %3189, %v3451_v28   ;;  %v1488_v45 = vpop.permute.xlu0 %1487 }
 0x215   : > { %v2854_v26 = vsel %vm1393_vm5, 1.0, %v3265_v56  ;;  %vm1514_vm13 = vcmp.eq.s32.totalorder %v3373_v10, %v1488_v45 }
 0x216   : > { %v1441_v16 = vadd.f32 %v2854_v26, %v1329_v31  ;;  %v2879_v4 = vsel %vm1514_vm13, 1.0, %v3265_v56 }
 0x217   : > { %v1352_v54 = vpop.permute.xlu1 %1351 }
 0x218   : > { %vm1394_vm8 = vcmp.eq.s32.totalorder %v3373_v10, %v1352_v54  ;;  %1499 = vperm.xlu1 %3189, %v3483_v36   ;;  %v1470_v47 = vpop.permute.xlu0 %1469  ;;  %v4744_v60 = vadd.f32 %v2870_v59, %v1441_v16 }
 0x219   : > { %v2855_v52 = vsel %vm1394_vm8, 1.0, %v3265_v56  ;;  %vm1508_vm9 = vcmp.eq.s32.totalorder %v3373_v10, %v1470_v47 }
 0x21a   : > { %v1442_v17 = vadd.f32 %v2855_v52, %v1330_v58  ;;  %v2873_v40 = vsel %vm1508_vm9, 1.0, %v3265_v56 }
 0x21b   : > { %v4754_v23 = vadd.f32 %v2873_v40, %v4583_v18  ;;  %v1370_v53 = vpop.permute.xlu1 %1369 }
 0x21c   : > { %vm1400_vm11 = vcmp.eq.s32.totalorder %v3373_v10, %v1370_v53  ;;  %3191 = vset.pattern.permute.xlu1 %v5633_v62  ;;  %v1497_v30 = vpop.permute.xlu0 %1496  ;;  %v4758_v22 = vadd.f32 %v2871_v49, %v1442_v17  ;;  %v5639_v62 = vld [vmem:[#allocation26_spill] sm:$0xff] }
 0x21d   : > { %v2861_v19 = vsel %vm1400_vm11, 1.0, %v3265_v56  ;;  %vm1517_vm12 = vcmp.eq.s32.totalorder %v3373_v10, %v1497_v30  ;;  %1581 = vperm.xlu1 %3191, %v5634_v33   ;;  %vm165_vm6 = vcmp.eq.s32.totalorder %v3373_v10, %v5639_v62  ;;  %v5640_v30 = vld [vmem:[#allocation31_spill] sm:$0xff] }
 0x21e   : > { %v4765_v18 = vadd.f32 %v2861_v19, %v1336_v11  ;;  %v2882_v29 = vsel %vm1517_vm12, 1.0, %v3265_v56  ;;  %v5638_v11 = vld [vmem:[#allocation30_spill] sm:$0xff]  ;;  %vm279_vm7 = vcmp.eq.s32.totalorder %v3373_v10, %v5640_v30  ;;  %v5644_v19 = vld [vmem:[#allocation29_spill] sm:$0xff] }
 0x21f   : > { %v4769_v3 = vadd.f32 %v2882_v29, %v4701_v48  ;;  %v1376_v63 = vpop.permute.xlu1 %1375  ;;  %v5635_v48 = vld [vmem:[#allocation23_spill] sm:$0xff]  ;;  %vm277_vm5 = vcmp.eq.s32.totalorder %v3373_v10, %v5638_v11  ;;  %vm174_vm11 = vcmp.eq.s32.totalorder %v3373_v10, %v5644_v19  ;;  %v5645_v29 = vld [vmem:[#allocation32_spill] sm:$0xff] }
 0x220   : > { %vm1402_vm14 = vcmp.eq.s32.totalorder %v3373_v10, %v1376_v63  ;;  %v4772_v55 = vpop.permute.xlu0 %1478  ;;  %vm284_vm12 = vcmp.eq.s32.totalorder %v3373_v10, %v5645_v29  ;;  %v2682_v63 = vsel %vm165_vm6, 1.0, %v3265_v56  ;;  %v5652_v11 = vld [vmem:[#allocation68_spill] sm:$0xff] }
 0x221   : > { %v2863_v44 = vsel %vm1402_vm14, 1.0, %v3265_v56  ;;  %1605 = vperm.xlu1 %3191, %v5598_v7   ;;  %v5654_v19 = vld [vmem:[#allocation60_spill] sm:$0xff] }
 0x222   : > { %v1450_v1 = vadd.f32 %v2863_v44, %v1338_v9  ;;  %v5646_v9 = vld [vmem:[#allocation38_spill] sm:$0xff]  ;;  %vm620_vm6 = vcmp.eq.s32.totalorder %v3373_v10, %v5654_v19 }
 0x223   : > { %vm501_vm13 = vcmp.eq.s32.totalorder %v3373_v10, %v5646_v9 }
 0x224   : > { %v4777_v31 = vpop.permute.xlu1 %1457  ;;  %v1503_v8 = vpop.permute.xlu0 %1502  ;;  %v4779_v45 = vadd.f32 %v2879_v4, %v1450_v1 }
 0x225   : > { %vm1519_vm15 = vcmp.eq.s32.totalorder %v3373_v10, %v1503_v8  ;;  %1608 = vperm.xlu1 %3191, %v5635_v48  }
 0x226   : > { %v2884_v13 = vsel %vm1519_vm15, 1.0, %v3265_v56 }
 0x227   : > { %v4785_v5 = vadd.f32 %v2884_v13, %v4723_v41  ;;  %v2714_v13 = vsel %vm389_vm10, 1.0, %v3265_v56 }
 0x228   : > { %v4787_v59 = vpop.permute.xlu1 %1481 }
 0x229   : > { %1590 = vperm.xlu1 %3191, %v3448_v27   ;;  %v4790_v26 = vpop.permute.xlu0 %1569 }
 0x22c   : > { %v4792_v46 = vpop.permute.xlu1 %1484 }
 0x22d   : > { %1614 = vperm.xlu1 %3191, %v5636_v37   ;;  %v4795_v16 = vpop.permute.xlu0 %1596 }
 0x230   : > { %v1467_v50 = vpop.permute.xlu1 %1466 }
 0x231   : > { %vm1507_vm1 = vcmp.eq.s32.totalorder %v3373_v10, %v1467_v50  ;;  %3193 = vset.pattern.permute.xlu1 %v5637_v57  ;;  %v1579_v35 = vpop.permute.xlu0 %1578  ;;  %v5647_v50 = vld [vmem:[#allocation36_spill] sm:$0xff]  ;;  %v2691_v57 = vsel %vm174_vm11, 1.0, %v3265_v56 }
 0x232   : > { %v2872_v41 = vsel %vm1507_vm1, 1.0, %v3265_v56  ;;  %1696 = vperm.xlu1 %3193, %v3440_v25   ;;  %vm1619_vm2 = vcmp.eq.s32.totalorder %v3373_v10, %v1579_v35  ;;  %vm396_vm14 = vcmp.eq.s32.totalorder %v3373_v10, %v5647_v50 }
 0x233   : > { %v1555_v54 = vadd.f32 %v2872_v41, %v4560_v34  ;;  %v2888_v43 = vsel %vm1619_vm2, 1.0, %v3265_v56  ;;  %v2705_v41 = vsel %vm284_vm12, 1.0, %v3265_v56 }
 0x234   : > { %v1491_v58 = vpop.permute.xlu1 %1490 }
 0x235   : > { %v4804_v47 = vadd.f32 %v2888_v43, %v1555_v54  ;;  %vm1515_vm3 = vcmp.eq.s32.totalorder %v3373_v10, %v1491_v58  ;;  %v1603_v21 = vpop.permute.xlu0 %1602  ;;  %v5648_v54 = vld [vmem:[#allocation59_spill] sm:$0xff]  ;;  %v5649_v58 = vld [vmem:[#allocation33_spill] sm:$0xff] }
 0x236   : > { %v2880_v49 = vsel %vm1515_vm3, 1.0, %v3265_v56  ;;  %1717 = vperm.xlu1 %3193, %v5598_v7   ;;  %vm1627_vm4 = vcmp.eq.s32.totalorder %v3373_v10, %v1603_v21  ;;  %vm613_vm15 = vcmp.eq.s32.totalorder %v3373_v10, %v5648_v54  ;;  %vm286_vm1 = vcmp.eq.s32.totalorder %v3373_v10, %v5649_v58 }
 0x237   : > { %v1563_v25 = vadd.f32 %v2880_v49, %v4679_v61  ;;  %v2896_v52 = vsel %vm1627_vm4, 1.0, %v3265_v56  ;;  %v2730_v21 = vsel %vm501_vm13, 1.0, %v3265_v56  ;;  %v5650_v49 = vld [vmem:[#allocation49_spill] sm:$0xff]  ;;  %vm725_vm4 = vcmp.eq.s32.totalorder %v3373_v10, %v5652_v11 }
 0x238   : > { %vm508_vm2 = vcmp.eq.s32.totalorder %v3373_v10, %v5650_v49  ;;  %v2746_v32 = vsel %vm613_vm15, 1.0, %v3265_v56 }
 0x239   : > { %v4812_v6 = vadd.f32 %v2896_v52, %v1563_v25  ;;  %v4814_v34 = vpop.permute.xlu1 %1572  ;;  %v4816_v14 = vpop.permute.xlu0 %1584  ;;  %v5651_v52 = vld [vmem:[#allocation35_spill] sm:$0xff] }
 0x23a   : > { %1699 = vperm.xlu1 %3193, %v3451_v28   ;;  %vm391_vm3 = vcmp.eq.s32.totalorder %v3373_v10, %v5651_v52 }
 0x23b   : > { %v2716_v9 = vsel %vm391_vm3, 1.0, %v3265_v56 }
 0x23d   : > { %v4819_v17 = vpop.permute.xlu1 %1593  ;;  %v4821_v40 = vpop.permute.xlu0 %1587 }
 0x23e   : > { %1723 = vperm.xlu1 %3193, %v3483_v36   ;;  %v5641_v36 = vld [vmem:[#allocation27_spill] sm:$0xff] }
 0x23f   : > { %vm167_vm8 = vcmp.eq.s32.totalorder %v3373_v10, %v5641_v36 }
 0x240   : > { %v2684_v1 = vsel %vm167_vm8, 1.0, %v3265_v56 }
 0x241   : > { %v4824_v53 = vpop.permute.xlu1 %1575  ;;  %v4826_v2 = vpop.permute.xlu0 %1611 }
 0x242   : > { %3195 = vset.pattern.permute.xlu1 %v5603_v39  ;;  %v5642_v39 = vld [vmem:[#allocation28_spill] sm:$0xff] }
 0x243   : > { %1805 = vperm.xlu1 %3195, %v5634_v33   ;;  %vm172_vm9 = vcmp.eq.s32.totalorder %v3373_v10, %v5642_v39  ;;  %v2698_v33 = vsel %vm277_vm5, 1.0, %v3265_v56  ;;  %v5653_v39 = vld [vmem:[#allocation37_spill] sm:$0xff] }
 0x244   : > { %v2689_v8 = vsel %vm172_vm9, 1.0, %v3265_v56  ;;  %v325_v35 = vadd.f32 %v2698_v33, %v2682_v63  ;;  %vm398_vm5 = vcmp.eq.s32.totalorder %v3373_v10, %v5653_v39  ;;  %v2707_v33 = vsel %vm286_vm1, 1.0, %v3265_v56  ;;  %v5659_v39 = vld [vmem:[#allocation123_spill] sm:$0xff] }
 0x245   : > { %v4830_v61 = vpop.permute.xlu1 %1599  ;;  %v332_v36 = vadd.f32 %v2705_v41, %v2689_v8  ;;  %v2737_v63 = vsel %vm508_vm2, 1.0, %v3265_v56  ;;  %v2762_v8 = vsel %vm725_vm4, 1.0, %v3265_v56  ;;  %v2723_v50 = vsel %vm398_vm5, 1.0, %v3265_v56  ;;  %v5657_v41 = vld [vmem:[#allocation97_spill] sm:$0xff] }
 0x246   : > { %v4834_v28 = vpop.permute.xlu0 %1684  ;;  %v437_v25 = vadd.f32 %v2714_v13, %v325_v35  ;;  %v5656_v13 = vld [vmem:[#allocation83_spill] sm:$0xff]  ;;  %vm949_vm9 = vcmp.eq.s32.totalorder %v3373_v10, %v5657_v41  ;;  %vm1061_vm11 = vcmp.eq.s32.totalorder %v3373_v10, %v5659_v39  ;;  %vm1180_vm4 = vcmp.eq.s32.totalorder %v3373_v10, %v4356_v0 }
 0x247   : > { %1829 = vperm.xlu1 %3195, %v5598_v7   ;;  %v2700_v7 = vsel %vm279_vm7, 1.0, %v3265_v56  ;;  %vm732_vm8 = vcmp.eq.s32.totalorder %v3373_v10, %v5656_v13  ;;  %v5664_v13 = vld [vmem:[#allocation119_spill] sm:$0xff]  ;;  %vm1285_vm5 = vcmp.eq.s32.totalorder %v3373_v10, %v4551_v12 }
 0x248   : > { %v327_v43 = vadd.f32 %v2700_v7, %v2684_v1  ;;  %v549_v29 = vadd.f32 %v2730_v21, %v437_v25  ;;  %v5655_v7 = vld [vmem:[#allocation92_spill] sm:$0xff]  ;;  %v334_v21 = vadd.f32 %v2707_v33, %v2691_v57  ;;  %v5658_v25 = vld [vmem:[#allocation89_spill] sm:$0xff]  ;;  %vm1068_vm1 = vcmp.eq.s32.totalorder %v3373_v10, %v5664_v13  ;;  %v5669_v13 = vld [vmem:[#allocation46_spill] sm:$0xff] }
 0x249   : > { %vm837_vm7 = vcmp.eq.s32.totalorder %v3373_v10, %v5655_v7  ;;  %vm844_vm10 = vcmp.eq.s32.totalorder %v3373_v10, %v5658_v25  ;;  %v5660_v57 = vld [vmem:[#allocation116_spill] sm:$0xff] }
 0x24a   : > { %v4856_v4 = vpop.permute.xlu1 %1681  ;;  %v4858_v44 = vpop.permute.xlu0 %1687  ;;  %v661_v35 = vadd.f32 %v2746_v32, %v549_v29  ;;  %v2778_v52 = vsel %vm837_vm7, 1.0, %v3265_v56  ;;  %v446_v32 = vadd.f32 %v2723_v50, %v334_v21  ;;  %v2794_v29 = vsel %vm949_vm9, 1.0, %v3265_v56  ;;  %v5661_v33 = vld [vmem:[#allocation40_spill] sm:$0xff] }
 0x24b   : > { %1832 = vperm.xlu1 %3195, %v5635_v48   ;;  %v2721_v48 = vsel %vm396_vm14, 1.0, %v3265_v56  ;;  %vm956_vm12 = vcmp.eq.s32.totalorder %v3373_v10, %v5660_v57  ;;  %vm503_vm13 = vcmp.eq.s32.totalorder %v3373_v10, %v5661_v33  ;;  %v2810_v50 = vsel %vm1061_vm11, 1.0, %v3265_v56  ;;  %v5666_v21 = vld [vmem:[#allocation124_spill] sm:$0xff]  ;;  %v5667_v33 = vld [vmem:[#allocation70_spill] sm:$0xff] }
 0x24c   : > { %v444_v1 = vadd.f32 %v2721_v48, %v332_v36  ;;  %v439_v48 = vadd.f32 %v2716_v9, %v327_v43  ;;  %v773_v11 = vadd.f32 %v2762_v8, %v661_v35  ;;  %v2769_v36 = vsel %vm732_vm8, 1.0, %v3265_v56  ;;  %v5665_v35 = vld [vmem:[#allocation62_spill] sm:$0xff] }
 0x24d   : > { %vm622_vm2 = vcmp.eq.s32.totalorder %v3373_v10, %v5665_v35  ;;  %v2801_v41 = vsel %vm956_vm12, 1.0, %v3265_v56  ;;  %vm1173_vm3 = vcmp.eq.s32.totalorder %v3373_v10, %v5666_v21  ;;  %vm1292_vm8 = vcmp.eq.s32.totalorder %v3373_v10, %v5669_v13  ;;  %v5672_v13 = vld [vmem:[#allocation99_spill] sm:$0xff] }
 0x24e   : > { %v4880_v62 = vpop.permute.xlu1 %1705  ;;  %v4882_v30 = vpop.permute.xlu0 %1711  ;;  %v556_v49 = vadd.f32 %v2737_v63, %v444_v1  ;;  %v5662_v63 = vld [vmem:[#allocation51_spill] sm:$0xff]  ;;  %v885_v43 = vadd.f32 %v2778_v52, %v773_v11  ;;  %v5663_v1 = vld [vmem:[#allocation61_spill] sm:$0xff]  ;;  %v2755_v57 = vsel %vm622_vm2, 1.0, %v3265_v56  ;;  %v2826_v0 = vsel %vm1173_vm3, 1.0, %v3265_v56 }
 0x24f   : > { %1814 = vperm.xlu1 %3195, %v3448_v27   ;;  %v2753_v27 = vsel %vm620_vm6, 1.0, %v3265_v56  ;;  %vm510_vm14 = vcmp.eq.s32.totalorder %v3373_v10, %v5662_v63  ;;  %vm615_vm15 = vcmp.eq.s32.totalorder %v3373_v10, %v5663_v1  ;;  %vm727_vm6 = vcmp.eq.s32.totalorder %v3373_v10, %v5667_v33  ;;  %v5668_v1 = vld [vmem:[#allocation85_spill] sm:$0xff] }
 0x250   : > { %v668_v19 = vadd.f32 %v2753_v27, %v556_v49  ;;  %v997_v27 = vadd.f32 %v2794_v29, %v885_v43  ;;  %v2732_v49 = vsel %vm503_vm13, 1.0, %v3265_v56  ;;  %v2739_v25 = vsel %vm510_vm14, 1.0, %v3265_v56 }
 0x251   : > { %v2748_v11 = vsel %vm615_vm15, 1.0, %v3265_v56  ;;  %v558_v43 = vadd.f32 %v2739_v25, %v446_v32  ;;  %vm734_vm7 = vcmp.eq.s32.totalorder %v3373_v10, %v5668_v1  ;;  %v2764_v21 = vsel %vm727_vm6, 1.0, %v3265_v56  ;;  %v5670_v32 = vld [vmem:[#allocation91_spill] sm:$0xff] }
 0x252   : > { %v4902_v54 = vpop.permute.xlu1 %1708  ;;  %v4904_v58 = vpop.permute.xlu0 %1693  ;;  %v780_v8 = vadd.f32 %v2769_v36, %v668_v19  ;;  %v2817_v36 = vsel %vm1068_vm1, 1.0, %v3265_v56  ;;  %v1109_v39 = vadd.f32 %v2810_v50, %v997_v27  ;;  %v2842_v50 = vsel %vm1285_vm5, 1.0, %v3265_v56 }
 0x253   : > { %1838 = vperm.xlu1 %3195, %v5636_v37   ;;  %v2785_v37 = vsel %vm844_vm10, 1.0, %v3265_v56  ;;  %v670_v27 = vadd.f32 %v2755_v57, %v558_v43  ;;  %vm846_vm9 = vcmp.eq.s32.totalorder %v3373_v10, %v5670_v32  ;;  %vm1504_vm10 = vcmp.eq.s32.totalorder %v3373_v10, %v4777_v31 }
 0x254   : > { %v892_v52 = vadd.f32 %v2785_v37, %v780_v8  ;;  %v551_v37 = vadd.f32 %v2732_v49, %v439_v48  ;;  %v2833_v8 = vsel %vm1180_vm4, 1.0, %v3265_v56  ;;  %v2771_v48 = vsel %vm734_vm7, 1.0, %v3265_v56 }
 0x255   : > { %vm1616_vm13 = vcmp.eq.s32.totalorder %v3373_v10, %v4790_v26  ;;  %vm1617_vm14 = vcmp.eq.s32.totalorder %v3373_v10, %v4814_v34  ;;  %v2787_v31 = vsel %vm846_vm9, 1.0, %v3265_v56  ;;  %vm1729_vm15 = vcmp.eq.s32.totalorder %v3373_v10, %v4834_v28 }
 0x256   : > { %v4921_v7 = vpop.permute.xlu1 %1690  ;;  %v4923_v9 = vpop.permute.xlu0 %1720  ;;  %v1004_v63 = vadd.f32 %v2801_v41, %v892_v52  ;;  %v663_v35 = vadd.f32 %v2748_v11, %v551_v37  ;;  %v1221_v41 = vadd.f32 %v2826_v0, %v1109_v39  ;;  %v2849_v11 = vsel %vm1292_vm8, 1.0, %v3265_v56 }
 0x257   : > { %v2869_v0 = vsel %vm1504_vm10, 1.0, %v3265_v56  ;;  %vm1728_vm1 = vcmp.eq.s32.totalorder %v3373_v10, %v4856_v4  ;;  %vm1513_vm2 = vcmp.eq.s32.totalorder %v3373_v10, %v4792_v46  ;;  %vm951_vm4 = vcmp.eq.s32.totalorder %v3373_v10, %v5672_v13 }
 0x258   : > { %v1116_v12 = vadd.f32 %v2817_v36, %v1004_v63  ;;  %v5671_v36 = vld [vmem:[#allocation94_spill] sm:$0xff]  ;;  %v1333_v57 = vadd.f32 %v2842_v50, %v1221_v41  ;;  %v775_v39 = vadd.f32 %v2764_v21, %v663_v35  ;;  %v782_v63 = vadd.f32 %v2771_v48, %v670_v27 }
 0x259   : > { %vm839_vm11 = vcmp.eq.s32.totalorder %v3373_v10, %v5671_v36  ;;  %v1552_v28 = vadd.f32 %v2869_v0, %v4481_v42  ;;  %v2902_v35 = vsel %vm1729_vm15, 1.0, %v3265_v56  ;;  %v2901_v27 = vsel %vm1728_vm1, 1.0, %v3265_v56 }
 0x25a   : > { %v4943_v19 = vpop.permute.xlu1 %1714  ;;  %v4945_v29 = vpop.permute.xlu0 %1702  ;;  %v1228_v49 = vadd.f32 %v2833_v8, %v1116_v12  ;;  %v2780_v43 = vsel %vm839_vm11, 1.0, %v3265_v56  ;;  %v2885_v8 = vsel %vm1616_vm13, 1.0, %v3265_v56  ;;  %v2886_v12 = vsel %vm1617_vm14, 1.0, %v3265_v56 }
 0x25b   : > { %v894_v4 = vadd.f32 %v2787_v31, %v782_v63  ;;  %vm1512_vm6 = vcmp.eq.s32.totalorder %v3373_v10, %v4787_v59  ;;  %v1664_v46 = vadd.f32 %v2885_v8, %v1552_v28  ;;  %v2878_v41 = vsel %vm1513_vm2, 1.0, %v3265_v56  ;;  %v5673_v59 = vld [vmem:[#allocation125_spill] sm:$0xff]  ;;  %v5674_v63 = vld [vmem:[#allocation118_spill] sm:$0xff]  ;;  %v5675_v31 = vld [vmem:[#allocation120_spill] sm:$0xff] }
 0x25c   : > { %v1340_v1 = vadd.f32 %v2849_v11, %v1228_v49  ;;  %v1665_v48 = vadd.f32 %v2886_v12, %v4744_v60  ;;  %v887_v42 = vadd.f32 %v2780_v43, %v775_v39  ;;  %v2796_v32 = vsel %vm951_vm4, 1.0, %v3265_v56 }
 0x25d   : > { %vm1625_vm7 = vcmp.eq.s32.totalorder %v3373_v10, %v4795_v16  ;;  %vm1624_vm8 = vcmp.eq.s32.totalorder %v3373_v10, %v4819_v17  ;;  %v1776_v11 = vadd.f32 %v2901_v27, %v1664_v46  ;;  %vm1063_vm10 = vcmp.eq.s32.totalorder %v3373_v10, %v5673_v59 }
 0x25e   : > { %v4958_v52 = vpop.permute.xlu0 %1726  ;;  %v1777_v36 = vadd.f32 %v2902_v35, %v1665_v48  ;;  %v2877_v60 = vsel %vm1512_vm6, 1.0, %v3265_v56  ;;  %vm1736_vm11 = vcmp.eq.s32.totalorder %v3373_v10, %v4880_v62  ;;  %vm958_vm13 = vcmp.eq.s32.totalorder %v3373_v10, %v5674_v63 }
 0x25f   : > { %v1361_v25 = vpop.permute.xlu1 %1360  ;;  %vm1070_vm14 = vcmp.eq.s32.totalorder %v3373_v10, %v5675_v31  ;;  %v2893_v0 = vsel %vm1624_vm8, 1.0, %v3265_v56  ;;  %v2812_v62 = vsel %vm1063_vm10, 1.0, %v3265_v56  ;;  %v2909_v8 = vsel %vm1736_vm11, 1.0, %v3265_v56 }
 0x260   : > { %vm1397_vm12 = vcmp.eq.s32.totalorder %v3373_v10, %v1361_v25  ;;  %v2803_v16 = vsel %vm958_vm13, 1.0, %v3265_v56  ;;  %v2819_v13 = vsel %vm1070_vm14, 1.0, %v3265_v56  ;;  %vm1182_vm2 = vcmp.eq.s32.totalorder %v3373_v10, %v4398_v20 }
 0x261   : > { %v2858_v33 = vsel %vm1397_vm12, 1.0, %v3265_v56  ;;  %vm1737_vm12 = vcmp.eq.s32.totalorder %v3373_v10, %v4902_v54  ;;  %v1560_v54 = vadd.f32 %v2877_v60, %v4765_v18  ;;  %vm1511_vm6 = vcmp.eq.s32.totalorder %v3373_v10, %v4772_v55 }
 0x262   : > { %v4976_v37 = vadd.f32 %v2858_v33, %v1333_v57  ;;  %v1561_v57 = vadd.f32 %v2878_v41, %v4649_v51  ;;  %v2894_v51 = vsel %vm1625_vm7, 1.0, %v3265_v56  ;;  %v2910_v12 = vsel %vm1737_vm12, 1.0, %v3265_v56 }
 0x263   : > { %v1382_v26 = vpop.permute.xlu1 %1381  ;;  %v1797_v34 = vpop.permute.xlu0 %1796  ;;  %vm1618_vm8 = vcmp.eq.s32.totalorder %v3373_v10, %v4824_v53  ;;  %vm1731_vm10 = vcmp.eq.s32.totalorder %v3373_v10, %v4921_v7  ;;  %vm1626_vm13 = vcmp.eq.s32.totalorder %v3373_v10, %v4830_v61 }
 0x264   : > { %vm1404_vm3 = vcmp.eq.s32.totalorder %v3373_v10, %v1382_v26  ;;  %vm1841_vm5 = vcmp.eq.s32.totalorder %v3373_v10, %v1797_v34  ;;  %v5676_v34 = vld [vmem:[#allocation126_spill] sm:$0xff]  ;;  %v1673_v28 = vadd.f32 %v2894_v51, %v1561_v57  ;;  %v2887_v31 = vsel %vm1618_vm8, 1.0, %v3265_v56 }
 0x265   : > { %v2865_v50 = vsel %vm1404_vm3, 1.0, %v3265_v56  ;;  %v2918_v49 = vsel %vm1841_vm5, 1.0, %v3265_v56  ;;  %vm1175_vm1 = vcmp.eq.s32.totalorder %v3373_v10, %v5676_v34  ;;  %vm1287_vm3 = vcmp.eq.s32.totalorder %v3373_v10, %v4586_v38 }
 0x266   : > { %v4995_v21 = vadd.f32 %v2865_v50, %v1340_v1  ;;  %v1889_v33 = vadd.f32 %v2918_v49, %v1777_v36  ;;  %v999_v1 = vadd.f32 %v2796_v32, %v887_v42  ;;  %v1672_v50 = vadd.f32 %v2893_v0, %v1560_v54 }
 0x267   : > { %v2828_v46 = vsel %vm1175_vm1, 1.0, %v3265_v56  ;;  %v1785_v48 = vadd.f32 %v2910_v12, %v1673_v28  ;;  %v1006_v42 = vadd.f32 %v2803_v16, %v894_v4  ;;  %v2835_v49 = vsel %vm1182_vm2, 1.0, %v3265_v56 }
 0x268   : > { %v1794_v25 = vpop.permute.xlu1 %1793  ;;  %v1111_v35 = vadd.f32 %v2812_v62, %v999_v1  ;;  %v1784_v41 = vadd.f32 %v2909_v8, %v1672_v50  ;;  %vm1294_vm5 = vcmp.eq.s32.totalorder %v3373_v10, %v4363_v24  ;;  %v2876_v24 = vsel %vm1511_vm6, 1.0, %v3265_v56 }
 0x269   : > { %vm1840_vm9 = vcmp.eq.s32.totalorder %v3373_v10, %v1794_v25  ;;  %v2844_v25 = vsel %vm1287_vm3, 1.0, %v3265_v56  ;;  %v2851_v4 = vsel %vm1294_vm5, 1.0, %v3265_v56  ;;  %v2904_v62 = vsel %vm1731_vm10, 1.0, %v3265_v56 }
 0x26a   : > { %v2917_v39 = vsel %vm1840_vm9, 1.0, %v3265_v56  ;;  %v1223_v38 = vadd.f32 %v2828_v46, %v1111_v35  ;;  %vm1730_vm9 = vcmp.eq.s32.totalorder %v3373_v10, %v4858_v44  ;;  %v1666_v54 = vadd.f32 %v2887_v31, %v4758_v22 }
 0x26b   : > { %v1888_v17 = vadd.f32 %v2917_v39, %v1776_v11  ;;  %v1118_v11 = vadd.f32 %v2819_v13, %v1006_v42  ;;  %v1779_v34 = vadd.f32 %v2904_v62, %v4804_v47  ;;  %vm1739_vm1 = vcmp.eq.s32.totalorder %v3373_v10, %v4943_v19 }
 0x26c   : > { %v1818_v43 = vpop.permute.xlu1 %1817  ;;  %v1335_v39 = vadd.f32 %v2844_v25, %v1223_v38  ;;  %v2895_v16 = vsel %vm1626_vm13, 1.0, %v3265_v56  ;;  %v2912_v28 = vsel %vm1739_vm1, 1.0, %v3265_v56  ;;  %vm1622_vm6 = vcmp.eq.s32.totalorder %v3373_v10, %v4821_v40 }
 0x26d   : > { %vm1848_vm15 = vcmp.eq.s32.totalorder %v3373_v10, %v1818_v43  ;;  %v1920_v26 = vpack.c.bf16 %v1889_v33, %v1888_v17  ;;  %v1230_v57 = vadd.f32 %v2835_v49, %v1118_v11  ;;  %v1803_v33 = vpop.permute.xlu0 %1802  ;;  %v2903_v43 = vsel %vm1730_vm9, 1.0, %v3265_v56 }
 0x26e   : > { %v2925_v18 = vsel %vm1848_vm15, 1.0, %v3265_v56  ;;  %vm1843_vm12 = vcmp.eq.s32.totalorder %v3373_v10, %v1803_v33  ;;  %v1778_v1 = vadd.f32 %v2903_v43, %v1666_v54  ;;  %vm1738_vm15 = vcmp.eq.s32.totalorder %v3373_v10, %v4882_v30 }
 0x26f   : > { %3024 = vmatprep.mubr.bf16.mxu0 %v1920_v26  ;;  %v1896_v20 = vadd.f32 %v2925_v18, %v1784_v41  ;;  %v1342_v51 = vadd.f32 %v2851_v4, %v1230_v57  ;;  %v2920_v7 = vsel %vm1843_vm12, 1.0, %v3265_v56  ;;  %v2911_v47 = vsel %vm1738_vm15, 1.0, %v3265_v56 }
 0x270   : > { %v1821_v27 = vpop.permute.xlu1 %1820  ;;  %v1891_v22 = vadd.f32 %v2920_v7, %v1779_v34  ;;  %v1674_v50 = vadd.f32 %v2895_v16, %v4779_v45  ;;  %v1787_v19 = vadd.f32 %v2912_v28, %v4812_v6  ;;  %v2891_v11 = vsel %vm1622_vm6, 1.0, %v3265_v56 }
 0x271   : > { %vm1849_vm4 = vcmp.eq.s32.totalorder %v3373_v10, %v1821_v27  ;;  %vm1630_vm8 = vcmp.eq.s32.totalorder %v3373_v10, %v4826_v2  ;;  %vm1732_vm10 = vcmp.eq.s32.totalorder %v3373_v10, %v4904_v58  ;;  %vm1741_vm12 = vcmp.eq.s32.totalorder %v3373_v10, %v4923_v9 }
 0x272   : > { %v2926_v32 = vsel %vm1849_vm4, 1.0, %v3265_v56  ;;  %v1786_v18 = vadd.f32 %v2911_v47, %v1674_v50  ;;  %vm1621_vm4 = vcmp.eq.s32.totalorder %v3373_v10, %v4816_v14  ;;  %v2899_v40 = vsel %vm1630_vm8, 1.0, %v3265_v56 }
 0x273   : > { %v1897_v36 = vadd.f32 %v2926_v32, %v1785_v48  ;;  %v2890_v6 = vsel %vm1621_vm4, 1.0, %v3265_v56  ;;  %v2914_v58 = vsel %vm1741_vm12, 1.0, %v3265_v56  ;;  %vm1743_vm1 = vcmp.eq.s32.totalorder %v3373_v10, %v4958_v52 }
 0x275   : > { %v1367_v59 = vpop.permute.xlu1 %1366  ;;  %v1924_v60 = vpack.c.bf16 %v1897_v36, %v1896_v20 }
 0x276   : > { %vm1399_vm7 = vcmp.eq.s32.totalorder %v3373_v10, %v1367_v59 }
 0x277   : > { %v2860_v17 = vsel %vm1399_vm7, 1.0, %v3265_v56  ;;  %3032 = vmatprep.mubr.bf16.mxu1 %v1924_v60 }
 0x278   : > { %v1447_v63 = vadd.f32 %v2860_v17, %v1335_v39  ;;  %v2905_v39 = vsel %vm1732_vm10, 1.0, %v3265_v56 }
 0x279   : > { %v1388_v55 = vpop.permute.xlu1 %1387 }
 0x27a   : > { %vm1406_vm11 = vcmp.eq.s32.totalorder %v3373_v10, %v1388_v55  ;;  %v5061_v53 = vadd.f32 %v2876_v24, %v1447_v63 }
 0x27b   : > { %v2867_v0 = vsel %vm1406_vm11, 1.0, %v3265_v56 }
 0x27c   : > { %v1454_v44 = vadd.f32 %v2867_v0, %v1342_v51 }
 0x27e   : > { %v1800_v26 = vpop.permute.xlu1 %1799 }
 0x27f   : > { %vm1842_vm14 = vcmp.eq.s32.totalorder %v3373_v10, %v1800_v26 }
 0x280   : > { %v2919_v8 = vsel %vm1842_vm14, 1.0, %v3265_v56  ;;  %vm1735_vm14 = vcmp.eq.s32.totalorder %v3373_v10, %v4945_v29 }
 0x281   : > { %v1890_v12 = vadd.f32 %v2919_v8, %v1778_v1  ;;  %v2908_v0 = vsel %vm1735_vm14, 1.0, %v3265_v56 }
 0x282   : > { %v1824_v13 = vpop.permute.xlu1 %1823 }
 0x283   : > { %vm1850_vm2 = vcmp.eq.s32.totalorder %v3373_v10, %v1824_v13  ;;  %v1921_v61 = vpack.c.bf16 %v1891_v22, %v1890_v12 }
 0x284   : > { %v2927_v30 = vsel %vm1850_vm2, 1.0, %v3265_v56 }
 0x285   : > { %3025 = vmatmul.mubr.bf16.vlgmr.msra.gmra.mrb[0].mxu0 %v1921_v61  ;;  %v1898_v46 = vadd.f32 %v2927_v30, %v1786_v18 }
 0x286   : > { %v1827_v35 = vpop.permute.xlu1 %1826 }
 0x287   : > { %vm1851_vm3 = vcmp.eq.s32.totalorder %v3373_v10, %v1827_v35 }
 0x288   : > { %v2928_v27 = vsel %vm1851_vm3, 1.0, %v3265_v56 }
 0x289   : > { %v1899_v41 = vadd.f32 %v2928_v27, %v1787_v19 }
 0x28b   : > { %v1473_v48 = vpop.permute.xlu1 %1472  ;;  %v1925_v42 = vpack.c.bf16 %v1899_v41, %v1898_v46 }
 0x28c   : > { %vm1509_vm5 = vcmp.eq.s32.totalorder %v3373_v10, %v1473_v48 }
 0x28d   : > { %v2874_v45 = vsel %vm1509_vm5, 1.0, %v3265_v56  ;;  %3033 = vmatmul.mubr.bf16.vlgmr.msra.gmra.mrb[0].mxu1 %v1925_v42 }
 0x28e   : > { %v1557_v32 = vadd.f32 %v2874_v45, %v4976_v37 }
 0x28f   : > { %v1494_v49 = vpop.permute.xlu1 %1493 }
 0x290   : > { %v1669_v25 = vadd.f32 %v2890_v6, %v1557_v32  ;;  %vm1516_vm5 = vcmp.eq.s32.totalorder %v3373_v10, %v1494_v49 }
 0x291   : > { %v2881_v12 = vsel %vm1516_vm5, 1.0, %v3265_v56 }
 0x292   : > { %v1564_v30 = vadd.f32 %v2881_v12, %v4995_v21 }
 0x293   : > { %v1476_v20 = vpop.permute.xlu1 %1475 }
 0x294   : > { %vm1510_vm7 = vcmp.eq.s32.totalorder %v3373_v10, %v1476_v20 }
 0x295   : > { %v2875_v36 = vsel %vm1510_vm7, 1.0, %v3265_v56 }
 0x296   : > { %v1558_v14 = vadd.f32 %v2875_v36, %v4645_v15 }
 0x297   : > { %v1500_v38 = vpop.permute.xlu1 %1499 }
 0x298   : > { %vm1518_vm9 = vcmp.eq.s32.totalorder %v3373_v10, %v1500_v38  ;;  %v5102_v37 = vadd.f32 %v2891_v11, %v1558_v14 }
 0x299   : > { %v2883_v59 = vsel %vm1518_vm9, 1.0, %v3265_v56 }
 0x29a   : > { %v1566_v60 = vadd.f32 %v2883_v59, %v1454_v44  ;;  %v2916_v44 = vsel %vm1743_vm1, 1.0, %v3265_v56 }
 0x29c   : > { %v1582_v57 = vpop.permute.xlu1 %1581  ;;  %v5108_v15 = vadd.f32 %v2899_v40, %v1566_v60 }
 0x29d   : > { %vm1620_vm11 = vcmp.eq.s32.totalorder %v3373_v10, %v1582_v57 }
 0x29e   : > { %v2889_v2 = vsel %vm1620_vm11, 1.0, %v3265_v56 }
 0x29f   : > { %v1668_v4 = vadd.f32 %v2889_v2, %v4754_v23 }
 0x2a0   : > { %v1606_v17 = vpop.permute.xlu1 %1605 }
 0x2a1   : > { %v1780_v33 = vadd.f32 %v2905_v39, %v1668_v4  ;;  %vm1628_vm6 = vcmp.eq.s32.totalorder %v3373_v10, %v1606_v17  ;;  %v1906_v17 = vld [vmem:[#allocation2 + $0x10] sm:$0xff] }
 0x2a2   : > { %v2897_v47 = vsel %vm1628_vm6, 1.0, %v3265_v56 }
 0x2a3   : > { %v1676_v19 = vadd.f32 %v2897_v47, %v1564_v30 }
 0x2a4   : > { %v1609_v63 = vpop.permute.xlu1 %1608 }
 0x2a5   : > { %vm1629_vm13 = vcmp.eq.s32.totalorder %v3373_v10, %v1609_v63 }
 0x2a6   : > { %v2898_v24 = vsel %vm1629_vm13, 1.0, %v3265_v56 }
 0x2a7   : > { %v1677_v55 = vadd.f32 %v2898_v24, %v4769_v3 }
 0x2a8   : > { %v1591_v31 = vpop.permute.xlu1 %1590 }
 0x2a9   : > { %vm1623_vm15 = vcmp.eq.s32.totalorder %v3373_v10, %v1591_v31  ;;  %v1789_v23 = vadd.f32 %v2914_v58, %v1677_v55  ;;  %v1907_v58 = vld [vmem:[#allocation2 + $0x18] sm:$0xff]  ;;  %v1905_v55 = vld [vmem:[#allocation2 + $0x8] sm:$0xff] }
 0x2aa   : > { %v2892_v51 = vsel %vm1623_vm15, 1.0, %v3265_v56 }
 0x2ab   : > { %v1671_v9 = vadd.f32 %v2892_v51, %v5061_v53  ;;  %v1809_v53 = vpop.permute.xlu0 %1808 }
 0x2ac   : > { %v1615_v43 = vpop.permute.xlu1 %1614  ;;  %vm1845_vm4 = vcmp.eq.s32.totalorder %v3373_v10, %v1809_v53 }
 0x2ad   : > { %vm1631_vm2 = vcmp.eq.s32.totalorder %v3373_v10, %v1615_v43  ;;  %v1783_v3 = vadd.f32 %v2908_v0, %v1671_v9  ;;  %v2922_v22 = vsel %vm1845_vm4, 1.0, %v3265_v56  ;;  %v1914_v0 = vld [vmem:[#allocation2 + $0x50] sm:$0xff]  ;;  %v1912_v43 = vld [vmem:[#allocation2 + $0x40] sm:$0xff] }
 0x2ae   : > { %v2900_v62 = vsel %vm1631_vm2, 1.0, %v3265_v56 }
 0x2af   : > { %v1679_v29 = vadd.f32 %v2900_v62, %v4785_v5  ;;  %v1812_v28 = vpop.permute.xlu0 %1811  ;;  %v1915_v62 = vld [vmem:[#allocation2 + $0x58] sm:$0xff] }
 0x2b0   : > { %vm1846_vm11 = vcmp.eq.s32.totalorder %v3373_v10, %v1812_v28  ;;  %v1918_v28 = vld [vmem:[#allocation2 + $0x70] sm:$0xff] }
 0x2b1   : > { %v1697_v54 = vpop.permute.xlu1 %1696  ;;  %v1791_v7 = vadd.f32 %v2916_v44, %v1679_v29  ;;  %v2923_v49 = vsel %vm1846_vm11, 1.0, %v3265_v56 }
 0x2b2   : > { %vm1733_vm3 = vcmp.eq.s32.totalorder %v3373_v10, %v1697_v54  ;;  %v1913_v54 = vld [vmem:[#allocation2 + $0x48] sm:$0xff] }
 0x2b3   : > { %v2906_v8 = vsel %vm1733_vm3, 1.0, %v3265_v56  ;;  %v1836_v21 = vpop.permute.xlu0 %1835 }
 0x2b4   : > { %v1781_v52 = vadd.f32 %v2906_v8, %v1669_v25  ;;  %vm1854_vm14 = vcmp.eq.s32.totalorder %v3373_v10, %v1836_v21  ;;  %v1910_v8 = vld [vmem:[#allocation2 + $0x30] sm:$0xff] }
 0x2b5   : > { %v1718_v26 = vpop.permute.xlu1 %1717 }
 0x2b6   : > { %v1893_v13 = vadd.f32 %v2922_v22, %v1781_v52  ;;  %vm1740_vm8 = vcmp.eq.s32.totalorder %v3373_v10, %v1718_v26  ;;  %v1908_v52 = vld [vmem:[#allocation2 + $0x20] sm:$0xff] }
 0x2b7   : > { %v2913_v18 = vsel %vm1740_vm8, 1.0, %v3265_v56 }
 0x2b8   : > { %v1788_v48 = vadd.f32 %v2913_v18, %v1676_v19 }
 0x2b9   : > { %v1700_v1 = vpop.permute.xlu1 %1699 }
 0x2ba   : > { %vm1734_vm9 = vcmp.eq.s32.totalorder %v3373_v10, %v1700_v1 }
 0x2bb   : > { %v2907_v27 = vsel %vm1734_vm9, 1.0, %v3265_v56 }
 0x2bc   : > { %v1782_v45 = vadd.f32 %v2907_v27, %v5102_v37  ;;  %v2931_v37 = vsel %vm1854_vm14, 1.0, %v3265_v56  ;;  %v1919_v27 = vld [vmem:[#allocation2 + $0x78] sm:$0xff] }
 0x2bd   : > { %v1724_v34 = vpop.permute.xlu1 %1723 }
 0x2be   : > { %vm1742_vm12 = vcmp.eq.s32.totalorder %v3373_v10, %v1724_v34  ;;  %v1894_v11 = vadd.f32 %v2923_v49, %v1782_v45  ;;  %v3204_v49 = vld [vmem:[%s5355_s2] sm:$0xff] (%p90_p0)  }
 0x2bf   : > { %v2915_v25 = vsel %vm1742_vm12, 1.0, %v3265_v56  ;;  %3040 = vmatprep.subr.bf16.mxu0 (%p90_p0), %v3204_v49 }
 0x2c0   : > { %v1790_v38 = vadd.f32 %v2915_v25, %v5108_v15  ;;  %v3205_v25 = vld [vmem:[%s5355_s2 + $0x8] sm:$0xff] (%p90_p0)   ;;  %3041 = vmatpush3.bf16.msra.mxu0 (%p90_p0), %v3204_v49 }
 0x2c1   :  { %3042 = vmatprep.subr.bf16.mxu0 (%p90_p0), %v3205_v25 }
 0x2c2   : > { %v1806_v5 = vpop.permute.xlu1 %1805  ;;  %v1902_v39 = vadd.f32 %v2931_v37, %v1790_v38 }
 0x2c3   : > { %vm1844_vm7 = vcmp.eq.s32.totalorder %v3373_v10, %v1806_v5  ;;  %v1911_v5 = vld [vmem:[#allocation2 + $0x38] sm:$0xff] }
 0x2c4   : > { %v2921_v16 = vsel %vm1844_vm7, 1.0, %v3265_v56  ;;  %3043 = vmatpush3.bf16.msra.mxu0 (%p90_p0), %v3205_v25 }
 0x2c5   : > { %v1892_v61 = vadd.f32 %v2921_v16, %v1780_v33  ;;  %v1904_v33 = vld [vmem:[#allocation2] sm:$0xff] }
 0x2c6   : > { %v1830_v50 = vpop.permute.xlu1 %1829 }
 0x2c7   : > { %vm1852_vm10 = vcmp.eq.s32.totalorder %v3373_v10, %v1830_v50  ;;  %v1922_v35 = vpack.c.bf16 %v1893_v13, %v1892_v61  ;;  %v1909_v13 = vld [vmem:[#allocation2 + $0x28] sm:$0xff] }
 0x2c8   : > { %v2929_v46 = vsel %vm1852_vm10, 1.0, %v3265_v56 }
 0x2c9   : > { %3028 = vmatprep.mubr.bf16.mxu0 %v1922_v35  ;;  %v1900_v32 = vadd.f32 %v2929_v46, %v1788_v48  ;;  %v1916_v35 = vld [vmem:[#allocation2 + $0x60] sm:$0xff]  ;;  %v1917_v48 = vld [vmem:[#allocation2 + $0x68] sm:$0xff] }
 0x2ca   : > { %v1833_v41 = vpop.permute.xlu1 %1832 }
 0x2cb   : > { %vm1853_vm13 = vcmp.eq.s32.totalorder %v3373_v10, %v1833_v41 }
 0x2cc   : > { %v2930_v42 = vsel %vm1853_vm13, 1.0, %v3265_v56 }
 0x2cd   : > { %v1901_v6 = vadd.f32 %v2930_v42, %v1789_v23 }
 0x2ce   : > { %v1815_v20 = vpop.permute.xlu1 %1814 }
 0x2cf   : > { %vm1847_vm15 = vcmp.eq.s32.totalorder %v3373_v10, %v1815_v20  ;;  %v1926_v36 = vpack.c.bf16 %v1901_v6, %v1900_v32  ;;  %v3206_v20 = vld [vmem:[%s5355_s2 + $0x10] sm:$0xff] (%p90_p0)  }
 0x2d0   : > { %v2924_v14 = vsel %vm1847_vm15, 1.0, %v3265_v56  ;;  %3044 = vmatprep.subr.bf16.mxu0 (%p90_p0), %v3206_v20 }
 0x2d1   : > { %v1895_v59 = vadd.f32 %v2924_v14, %v1783_v3  ;;  %3036 = vmatprep.mubr.bf16.mxu1 %v1926_v36  ;;  %3045 = vmatpush3.bf16.msra.mxu0 (%p90_p0), %v3206_v20 }
 0x2d2   : > { %v1839_v60 = vpop.permute.xlu1 %1838 }
 0x2d3   : > { %vm1855_vm1 = vcmp.eq.s32.totalorder %v3373_v10, %v1839_v60  ;;  %v1923_v40 = vpack.c.bf16 %v1895_v59, %v1894_v11 }
 0x2d4   : > { %v2932_v57 = vsel %vm1855_vm1, 1.0, %v3265_v56 }
 0x2d5   : > { %v1903_v2 = vadd.f32 %v2932_v57, %v1791_v7  ;;  %3029 = vmatmul.mubr.bf16.gmra.mrb[4].mxu0 %v1923_v40  ;;  %v3207_v57 = vld [vmem:[%s5355_s2 + $0x18] sm:$0xff] (%p90_p0)  }
 0x2d6   :  { %3046 = vmatprep.subr.bf16.mxu0 (%p90_p0), %v3207_v57 }
 0x2d7   : > { %v1927_v4 = vpack.c.bf16 %v1903_v2, %v1902_v39  ;;  %3047 = vmatpush3.bf16.msra.mxu0 (%p90_p0), %v3207_v57 }
 0x2d9   : > { %3037 = vmatmul.mubr.bf16.gmra.mrb[4].mxu1 %v1927_v4 }
 0x358   : > { %v3026_v63 = vpop.f32.mrb[0].mxu0 }
 0x359   : > { %v2095_v15 = vadd.f32 %v3026_v63, %v1906_v17  ;;  %v2030_v24 = vpop.f32.mrb[1].mxu0 }
 0x35a   : > { %v2093_v31 = vadd.f32 %v2030_v24, %v1904_v33  ;;  %v3027_v23 = vpop.f32.mrb[2].mxu0 }
 0x35b   : > { %2112 = vst.msk [vmem:[#allocation2 + $0x10] sm:$0xff] %vm35_vm0, %v2095_v15  ;;  %v2096_v51 = vadd.f32 %v3027_v23, %v1907_v58  ;;  %v2033_v9 = vpop.f32.mrb[3].mxu0 }
 0x35c   : > { %2110 = vst.msk [vmem:[#allocation2] sm:$0xff] %vm35_vm0, %v2093_v31  ;;  %v2094_v56 = vadd.f32 %v2033_v9, %v1905_v55 }
 0x35d   : > { %2113 = vst.msk [vmem:[#allocation2 + $0x18] sm:$0xff] %vm35_vm0, %v2096_v51 }
 0x35e   : > { %2111 = vst.msk [vmem:[#allocation2 + $0x8] sm:$0xff] %vm35_vm0, %v2094_v56 }
 0x360   : > { %v3034_v3 = vpop.f32.mrb[0].mxu1 }
 0x361   : > { %v2103_v29 = vadd.f32 %v3034_v3, %v1914_v0  ;;  %v2062_v44 = vpop.f32.mrb[1].mxu1 }
 0x362   : > { %v2101_v7 = vadd.f32 %v2062_v44, %v1912_v43  ;;  %v3035_v26 = vpop.f32.mrb[2].mxu1  ;;  %v2131_v59 = vld [vmem:[#allocation2 + $0x10] sm:$0xff] (%p90_p0) }
 0x363   : > { %2120 = vst.msk [vmem:[#allocation2 + $0x50] sm:$0xff] %vm35_vm0, %v2103_v29  ;;  %v2104_v1 = vadd.f32 %v3035_v26, %v1915_v62  ;;  %v2065_v53 = vpop.f32.mrb[3].mxu1  ;;  %v2129_v36 = vld [vmem:[#allocation2] sm:$0xff] (%p90_p0)  ;;  %v2147_v39 = vmul.f32 (%p90_p0), 0.0625, %v2131_v59 }
 0x364   : > { %2118 = vst.msk [vmem:[#allocation2 + $0x40] sm:$0xff] %vm35_vm0, %v2101_v7  ;;  %v2102_v34 = vadd.f32 %v2065_v53, %v1913_v54  ;;  %v2145_v11 = vmul.f32 (%p90_p0), 0.0625, %v2129_v36  ;;  %v2132_v10 = vld [vmem:[#allocation2 + $0x18] sm:$0xff] (%p90_p0) }
 0x365   : > { %2121 = vst.msk [vmem:[#allocation2 + $0x58] sm:$0xff] %vm35_vm0, %v2104_v1  ;;  %v2130_v14 = vld [vmem:[#allocation2 + $0x8] sm:$0xff] (%p90_p0)  ;;  %v2148_v2 = vmul.f32 (%p90_p0), 0.0625, %v2132_v10 }
 0x366   : > { %2119 = vst.msk [vmem:[#allocation2 + $0x48] sm:$0xff] %vm35_vm0, %v2102_v34  ;;  %v2146_v38 = vmul.f32 (%p90_p0), 0.0625, %v2130_v14 }
 0x367   :  { %v2162_v33 = vpack.c.bf16 (%p90_p0), %v2148_v2, %v2147_v39 }
 0x368   :  { %v2161_v37 = vpack.c.bf16 (%p90_p0), %v2146_v38, %v2145_v11 }
 0x36a   :  { %3048 = vmatprep.mubr.msk.bf16.mxu0 (%p90_p0), %vm35_vm0, %v2161_v37  ;;  %v2139_v43 = vld [vmem:[#allocation2 + $0x50] sm:$0xff] (%p90_p0) }
 0x36b   :  { %v2137_v24 = vld [vmem:[#allocation2 + $0x40] sm:$0xff] (%p90_p0)  ;;  %3049 = vmatmul.mubr.msk.bf16.vlgmr.msra.gmra.mrb[0].mxu0 (%p90_p0), %vm35_vm0, %v2162_v33  ;;  %v2155_v44 = vmul.f32 (%p90_p0), 0.0625, %v2139_v43 }
 0x36c   :  { %v2153_v51 = vmul.f32 (%p90_p0), 0.0625, %v2137_v24  ;;  %v2140_v3 = vld [vmem:[#allocation2 + $0x58] sm:$0xff] (%p90_p0) }
 0x36d   :  { %v2138_v55 = vld [vmem:[#allocation2 + $0x48] sm:$0xff] (%p90_p0)  ;;  %v2156_v54 = vmul.f32 (%p90_p0), 0.0625, %v2140_v3 }
 0x36e   :  { %v2154_v9 = vmul.f32 (%p90_p0), 0.0625, %v2138_v55 }
 0x36f   :  { %v2166_v1 = vpack.c.bf16 (%p90_p0), %v2156_v54, %v2155_v44 }
 0x370   :  { %v2165_v0 = vpack.c.bf16 (%p90_p0), %v2154_v9, %v2153_v51 }
 0x3a8   : > { %v3030_v22 = vpop.f32.mrb[4].mxu0 }
 0x3a9   : > { %v2099_v12 = vadd.f32 %v3030_v22, %v1910_v8  ;;  %v2046_v16 = vpop.f32.mrb[5].mxu0 }
 0x3aa   : > { %v2097_v61 = vadd.f32 %v2046_v16, %v1908_v52  ;;  %v3031_v47 = vpop.f32.mrb[6].mxu0  ;;  %v3209_v16 = vld [vmem:[%s5359_s6 + $0x8] sm:$0xff] (%p90_p0)  }
 0x3ab   : > { %2116 = vst.msk [vmem:[#allocation2 + $0x30] sm:$0xff] %vm35_vm0, %v2099_v12  ;;  %v2100_v50 = vadd.f32 %v3031_v47, %v1911_v5  ;;  %v2049_v30 = vpop.f32.mrb[7].mxu0  ;;  %v3208_v12 = vld [vmem:[%s5359_s6] sm:$0xff] (%p90_p0)  }
 0x3ac   : > { %2114 = vst.msk [vmem:[#allocation2 + $0x20] sm:$0xff] %vm35_vm0, %v2097_v61  ;;  %v2098_v18 = vadd.f32 %v2049_v30, %v1909_v13  ;;  %v3038_v19 = vpop.f32.mrb[4].mxu1  ;;  %92 = sbr.rel (!%p90_p0) target bundleno = 17 (0x11), region = 68  ;;  %3064 = vmatprep.subr.bf16.mxu0 (%p90_p0), %v3208_v12  ;;  %3112 = vmatprep.subr.bf16.mxu1 (%p90_p0), %v3208_v12  ;;  %v3210_v13 = vld [vmem:[%s5359_s6 + $0x10] sm:$0xff] (%p90_p0)   ;;  %v3211_v61 = vld [vmem:[%s5359_s6 + $0x18] sm:$0xff] (%p90_p0)   ;;  %v3212_v47 = vld [vmem:[%s5359_s6 + $0x20] sm:$0xff] (%p90_p0)  }
 0x3ad   : > { %2117 = vst.msk [vmem:[#allocation2 + $0x38] sm:$0xff] %vm35_vm0, %v2100_v50  ;;  %v2107_v46 = vadd.f32 %v3038_v19, %v1918_v28  ;;  %v2078_v41 = vpop.f32.mrb[5].mxu1  ;;  %3065 = vmatpush3.bf16.msra.mxu0 (%p90_p0), %v3208_v12  ;;  %3120 = vmatpush3.bf16.msra.mxu1 (%p90_p0), %v3208_v12  ;;  %v3213_v28 = vld [vmem:[%s5359_s6 + $0x28] sm:$0xff] (%p90_p0)   ;;  %v3214_v50 = vld [vmem:[%s5359_s6 + $0x30] sm:$0xff] (%p90_p0)   ;;  %v3215_v30 = vld [vmem:[%s5359_s6 + $0x38] sm:$0xff] (%p90_p0)  }
 0x3ae   : > { %2115 = vst.msk [vmem:[#allocation2 + $0x28] sm:$0xff] %vm35_vm0, %v2098_v18  ;;  %v2105_v21 = vadd.f32 %v2078_v41, %v1916_v35  ;;  %v3039_v42 = vpop.f32.mrb[6].mxu1  ;;  %3066 = vmatprep.subr.bf16.mxu0 (%p90_p0), %v3209_v16  ;;  %3113 = vmatprep.subr.bf16.mxu1 (%p90_p0), %v3209_v16  ;;  %v5229_v35 = vld [vmem:[%s5356_s3] ss:$0 sm:$0xff] (%p90_p0) }
 0x3af   : > { %2124 = vst.msk [vmem:[#allocation2 + $0x70] sm:$0xff] %vm35_vm0, %v2107_v46  ;;  %v2108_v45 = vadd.f32 %v3039_v42, %v1919_v27  ;;  %v2081_v32 = vpop.f32.mrb[7].mxu1 }
 0x3b0   : > { %2122 = vst.msk [vmem:[#allocation2 + $0x60] sm:$0xff] %vm35_vm0, %v2105_v21  ;;  %v2106_v6 = vadd.f32 %v2081_v32, %v1917_v48 }
 0x3b1   : > { %2125 = vst.msk [vmem:[#allocation2 + $0x78] sm:$0xff] %vm35_vm0, %v2108_v45  ;;  %3067 = vmatpush3.bf16.msra.mxu0 (%p90_p0), %v3209_v16  ;;  %3121 = vmatpush3.bf16.msra.mxu1 (%p90_p0), %v3209_v16 }
 0x3b2   : > { %2123 = vst.msk [vmem:[#allocation2 + $0x68] sm:$0xff] %vm35_vm0, %v2106_v6  ;;  %v2135_v58 = vld [vmem:[#allocation2 + $0x30] sm:$0xff] (%p90_p0)  ;;  %3068 = vmatprep.subr.bf16.mxu0 (%p90_p0), %v3210_v13  ;;  %3114 = vmatprep.subr.bf16.mxu1 (%p90_p0), %v3210_v13 }
 0x3b3   :  { %v2133_v60 = vld [vmem:[#allocation2 + $0x20] sm:$0xff]  ;;  %v2151_v31 = vmul.f32 0.0625, %v2135_v58 }
 0x3b4   :  { %v2149_v4 = vmul.f32 0.0625, %v2133_v60  ;;  %v2136_v15 = vld [vmem:[#allocation2 + $0x38] sm:$0xff] }
 0x3b5   :  { %v2134_v40 = vld [vmem:[#allocation2 + $0x28] sm:$0xff]  ;;  %v2152_v23 = vmul.f32 0.0625, %v2136_v15  ;;  %3069 = vmatpush3.bf16.msra.mxu0 %v3210_v13  ;;  %3122 = vmatpush3.bf16.msra.mxu1 %v3210_v13 }
 0x3b6   :  { %v2150_v17 = vmul.f32 0.0625, %v2134_v40  ;;  %v2143_v34 = vld [vmem:[#allocation2 + $0x70] sm:$0xff]  ;;  %3070 = vmatprep.subr.bf16.mxu0 %v3211_v61  ;;  %3115 = vmatprep.subr.bf16.mxu1 %v3211_v61 }
 0x3b7   :  { %v2164_v56 = vpack.c.bf16 %v2152_v23, %v2151_v31  ;;  %v2141_v62 = vld [vmem:[#allocation2 + $0x60] sm:$0xff]  ;;  %v2159_v52 = vmul.f32 0.0625, %v2143_v34 }
 0x3b8   :  { %v2163_v63 = vpack.c.bf16 %v2150_v17, %v2149_v4  ;;  %v2157_v7 = vmul.f32 0.0625, %v2141_v62  ;;  %v2144_v8 = vld [vmem:[#allocation2 + $0x78] sm:$0xff] }
 0x3b9   :  { %v2142_v29 = vld [vmem:[#allocation2 + $0x68] sm:$0xff]  ;;  %v2160_v22 = vmul.f32 0.0625, %v2144_v8  ;;  %3071 = vmatpush3.bf16.msra.mxu0 %v3211_v61  ;;  %3123 = vmatpush3.bf16.msra.mxu1 %v3211_v61 }
 0x3ba   :  { %3052 = vmatprep.mubr.msk.bf16.mxu0 %vm35_vm0, %v2163_v63  ;;  %v2158_v26 = vmul.f32 0.0625, %v2142_v29  ;;  %3072 = vmatprep.subr.bf16.mxu0 %v3212_v47 }
 0x3bb   :  { %3053 = vmatmul.mubr.msk.bf16.gmra.mrb[4].mxu0 %vm35_vm0, %v2164_v56  ;;  %v2168_v5 = vpack.c.bf16 %v2160_v22, %v2159_v52  ;;  %3116 = vmatprep.subr.bf16.mxu1 %v3212_v47 }
 0x3bc   :  { %3056 = vmatprep.mubr.msk.bf16.mxu0 %vm35_vm0, %v2165_v0  ;;  %v2167_v53 = vpack.c.bf16 %v2158_v26, %v2157_v7 }
 0x3bd   :  { %3073 = vmatpush3.bf16.msra.mxu0 %v3212_v47  ;;  %3124 = vmatpush3.bf16.msra.mxu1 %v3212_v47 }
 0x3be   :  { %3074 = vmatprep.subr.bf16.mxu0 %v3213_v28  ;;  %3117 = vmatprep.subr.bf16.mxu1 %v3213_v28 }
 0x3c1   :  { %3075 = vmatpush3.bf16.msra.mxu0 %v3213_v28  ;;  %3125 = vmatpush3.bf16.msra.mxu1 %v3213_v28 }
 0x3c2   :  { %3076 = vmatprep.subr.bf16.mxu0 %v3214_v50  ;;  %3118 = vmatprep.subr.bf16.mxu1 %v3214_v50 }
 0x3c3   :  { %3057 = vmatmul.mubr.msk.bf16.gmra.mrb[8].mxu0 %vm35_vm0, %v2166_v1 }
 0x3c4   :  { %3060 = vmatprep.mubr.msk.bf16.mxu0 %vm35_vm0, %v2167_v53 }
 0x3c5   :  { %3077 = vmatpush3.bf16.msra.mxu0 %v3214_v50  ;;  %3126 = vmatpush3.bf16.msra.mxu1 %v3214_v50 }
 0x3c6   :  { %3078 = vmatprep.subr.bf16.mxu0 %v3215_v30  ;;  %3119 = vmatprep.subr.bf16.mxu1 %v3215_v30 }
 0x3c9   :  { %3079 = vmatpush3.bf16.msra.mxu0 %v3215_v30  ;;  %3127 = vmatpush3.bf16.msra.mxu1 %v3215_v30 }
 0x3cb   :  { %3061 = vmatmul.mubr.msk.bf16.gmra.mrb[12].mxu0 %vm35_vm0, %v2168_v5 }
 0x43e   :  { %v3050_v18 = vpop.f32.mrb[0].mxu0 }
 0x43f   :  { %v2267_v19 = vpop.f32.mrb[1].mxu0  ;;  %v5235_v48 = vadd.f32 %v3050_v18, %v5229_v35 }
 0x440   :  { %v5232_v27 = vadd.f32 %v5229_v35, %v2267_v19  ;;  %v3051_v46 = vpop.f32.mrb[2].mxu0 }
 0x441   :  { %v2270_v41 = vpop.f32.mrb[3].mxu0  ;;  %v5243_v45 = vadd.f32 %v3051_v46, %v5229_v35  ;;  %v2355_v49 = vmul.f32 %v5235_v48, %v5235_v48 }
 0x442   :  { %v5238_v21 = vadd.f32 %v5229_v35, %v2270_v41  ;;  %v2353_v42 = vmul.f32 %v5232_v27, %v5232_v27 }
 0x443   :  { %v2356_v11 = vmul.f32 %v5243_v45, %v5243_v45 }
 0x444   :  { %v2330_v32 = vadd.f32 %v5238_v21, %v5232_v27  ;;  %v2354_v6 = vmul.f32 %v5238_v21, %v5238_v21 }
 0x446   :  { %v2331_v25 = vadd.f32 %v2330_v32, %v5235_v48  ;;  %v2369_v20 = vadd.f32 %v2354_v6, %v2353_v42 }
 0x448   :  { %v2370_v38 = vadd.f32 %v2369_v20, %v2355_v49  ;;  %v2332_v10 = vadd.f32 %v2331_v25, %v5243_v45 }
 0x44a   :  { %v2371_v2 = vadd.f32 %v2370_v38, %v2356_v11 }
 0x48e   :  { %v3054_v36 = vpop.f32.mrb[4].mxu0 }
 0x48f   :  { %v2283_v14 = vpop.f32.mrb[5].mxu0  ;;  %v5259_v60 = vadd.f32 %v3054_v36, %v5229_v35 }
 0x490   :  { %v5255_v59 = vadd.f32 %v5229_v35, %v2283_v14  ;;  %v3055_v37 = vpop.f32.mrb[6].mxu0 }
 0x491   :  { %v2286_v40 = vpop.f32.mrb[7].mxu0  ;;  %v5268_v33 = vadd.f32 %v3055_v37, %v5229_v35  ;;  %v2359_v15 = vmul.f32 %v5259_v60, %v5259_v60 }
 0x492   :  { %v2333_v57 = vadd.f32 %v2332_v10, %v5255_v59  ;;  %v2357_v39 = vmul.f32 %v5255_v59, %v5255_v59  ;;  %v5265_v4 = vadd.f32 %v5229_v35, %v2286_v40 }
 0x493   :  { %v2360_v51 = vmul.f32 %v5268_v33, %v5268_v33 }
 0x494   :  { %v2372_v17 = vadd.f32 %v2371_v2, %v2357_v39  ;;  %v2334_v63 = vadd.f32 %v2333_v57, %v5265_v4  ;;  %v2358_v58 = vmul.f32 %v5265_v4, %v5265_v4 }
 0x496   :  { %v2335_v24 = vadd.f32 %v2334_v63, %v5259_v60  ;;  %v2373_v55 = vadd.f32 %v2372_v17, %v2358_v58  ;;  %v3058_v31 = vpop.f32.mrb[8].mxu0 }
 0x497   :  { %v2299_v23 = vpop.f32.mrb[9].mxu0  ;;  %v5283_v3 = vadd.f32 %v3058_v31, %v5229_v35 }
 0x498   :  { %v2374_v9 = vadd.f32 %v2373_v55, %v2359_v15  ;;  %v5279_v56 = vadd.f32 %v5229_v35, %v2299_v23  ;;  %v2336_v0 = vadd.f32 %v2335_v24, %v5268_v33  ;;  %v3059_v43 = vpop.f32.mrb[10].mxu0 }
 0x499   :  { %v2302_v62 = vpop.f32.mrb[11].mxu0  ;;  %v5292_v1 = vadd.f32 %v3059_v43, %v5229_v35  ;;  %v2363_v8 = vmul.f32 %v5283_v3, %v5283_v3 }
 0x49a   :  { %v2337_v29 = vadd.f32 %v2336_v0, %v5279_v56  ;;  %v2361_v44 = vmul.f32 %v5279_v56, %v5279_v56  ;;  %v2375_v54 = vadd.f32 %v2374_v9, %v2360_v51  ;;  %v5289_v7 = vadd.f32 %v5229_v35, %v2302_v62 }
 0x49b   :  { %v2364_v16 = vmul.f32 %v5292_v1, %v5292_v1  ;;  %v5677_v62 = vlaneseq }
 0x49c   :  { %v2376_v26 = vadd.f32 %v2375_v54, %v2361_v44  ;;  %v2338_v53 = vadd.f32 %v2337_v29, %v5289_v7  ;;  %v2362_v34 = vmul.f32 %v5289_v7, %v5289_v7  ;;  %v2394_v44 = vld [vmem:[%s5357_s4] sm:$0x1] }
 0x49d   :  { %v2403_v29 = vshrl.u32 %v5677_v62, 7 }
 0x49e   :  { %v2339_v52 = vadd.f32 %v2338_v53, %v5283_v3  ;;  %v2377_v22 = vadd.f32 %v2376_v26, %v2362_v34  ;;  %v3062_v5 = vpop.f32.mrb[12].mxu0  ;;  %v2398_v34 = vld [vmem:[%s5358_s5] sm:$0x1] }
 0x49f   :  { %v2315_v12 = vpop.f32.mrb[13].mxu0  ;;  %v5305_v50 = vadd.f32 %v3062_v5, %v5229_v35  ;;  %v2404_v54 = vsub.s32 0, %v2403_v29 }
 0x4a0   :  { %v2378_v13 = vadd.f32 %v2377_v22, %v2363_v8  ;;  %v2316_v61 = vadd.f32 %v5229_v35, %v2315_v12  ;;  %v2340_v47 = vadd.f32 %v2339_v52, %v5292_v1  ;;  %v3063_v28 = vpop.f32.mrb[14].mxu0 }
 0x4a1   :  { %v2318_v30 = vpop.f32.mrb[15].mxu0  ;;  %v5309_v32 = vadd.f32 %v3063_v28, %v5229_v35  ;;  %v2367_v25 = vmul.f32 %v5305_v50, %v5305_v50 }
 0x4a2   :  { %v2341_v18 = vadd.f32 %v2340_v47, %v2316_v61  ;;  %v2365_v19 = vmul.f32 %v2316_v61, %v2316_v61  ;;  %v2379_v46 = vadd.f32 %v2378_v13, %v2364_v16  ;;  %v2319_v41 = vadd.f32 %v5229_v35, %v2318_v30 }
 0x4a3   :  { %v2368_v14 = vmul.f32 %v5309_v32, %v5309_v32 }
 0x4a4   :  { %v2380_v42 = vadd.f32 %v2379_v46, %v2365_v19  ;;  %v2342_v6 = vadd.f32 %v2341_v18, %v2319_v41  ;;  %v2366_v49 = vmul.f32 %v2319_v41, %v2319_v41 }
 0x4a6   :  { %v2343_v20 = vadd.f32 %v2342_v6, %v5305_v50  ;;  %v2381_v36 = vadd.f32 %v2380_v42, %v2366_v49 }
 0x4a8   :  { %v2344_v11 = vadd.f32 %v2343_v20, %v5309_v32  ;;  %v2382_v38 = vadd.f32 %v2381_v36, %v2367_v25 }
 0x4aa   :  { %v2345_v10 = vrot.slane %v2344_v11, 4  ;;  %v2383_v37 = vadd.f32 %v2382_v38, %v2368_v14 }
 0x4ac   :  { %v2346_v40 = vadd.f32 %v2345_v10, %v2344_v11  ;;  %v2384_v57 = vrot.slane %v2383_v37, 4 }
 0x4ae   :  { %v2347_v35 = vrot.slane %v2346_v40, 2  ;;  %v2385_v39 = vadd.f32 %v2384_v57, %v2383_v37 }
 0x4b0   :  { %v2348_v2 = vadd.f32 %v2347_v35, %v2346_v40  ;;  %v2386_v17 = vrot.slane %v2385_v39, 2 }
 0x4b2   :  { %v2349_v63 = vrot.slane %v2348_v2, 1  ;;  %v2387_v58 = vadd.f32 %v2386_v17, %v2385_v39 }
 0x4b4   :  { %v2350_v15 = vadd.f32 %v2349_v63, %v2348_v2  ;;  %v2388_v24 = vrot.slane %v2387_v58, 1 }
 0x4b6   :  { %v2352_v55 = vmul.f32 0.0078125, %v2350_v15  ;;  %v2389_v31 = vadd.f32 %v2388_v24, %v2387_v58 }
 0x4b8   :  { %v2390_v23 = vmul.f32 0.0078125, %v2389_v31  ;;  %v2391_v51 = vmul.f32 %v2352_v55, %v2352_v55 }
 0x4ba   :  { %v2392_v9 = vsub.f32 %v2390_v23, %v2391_v51 }
 0x4bc   :  { %v2393_v0 = vmax.f32 %v2392_v9, 0.0 }
 0x4be   :  { %v2395_v43 = vadd.f32 1e-05, %v2393_v0 }
 0x4c0   :  { %3216 = vrsqrt.f32 %v2395_v43 }
 0x4ca   :  { %v3217_v26 = vpop.eup %3216 }
 0x4cb   :  { %v2397_v53 = vmul.f32 %v3217_v26, %v2394_v44 }
 0x4cd   :  { %v2399_v8 = vmul.f32 %v2397_v53, %v2352_v55  ;;  %v2405_v52 = vrot.slane %v2397_v53, %v2404_v54 }
 0x4cf   :  { %v2400_v22 = vsub.f32 %v2398_v34, %v2399_v8  ;;  %v2420_v5 = vmul.f32 %v2405_v52, %v2319_v41  ;;  %v2407_v12 = vmul.f32 %v2405_v52, %v5232_v27  ;;  %v2408_v16 = vmul.f32 %v2405_v52, %v5238_v21 }
 0x4d0   :  { %v2411_v13 = vmul.f32 %v2405_v52, %v5255_v59  ;;  %v2412_v47 = vmul.f32 %v2405_v52, %v5265_v4  ;;  %v2409_v28 = vmul.f32 %v2405_v52, %v5235_v48  ;;  %v2410_v30 = vmul.f32 %v2405_v52, %v5243_v45 }
 0x4d1   :  { %v2427_v18 = vrot.slane %v2400_v22, %v2404_v54  ;;  %v2413_v19 = vmul.f32 %v2405_v52, %v5259_v60  ;;  %v2414_v46 = vmul.f32 %v2405_v52, %v5268_v33  ;;  %v2415_v42 = vmul.f32 %v2405_v52, %v5279_v56 }
 0x4d2   :  { %v2416_v41 = vmul.f32 %v2405_v52, %v5289_v7  ;;  %v2417_v27 = vmul.f32 %v2405_v52, %v5283_v3  ;;  %v2418_v21 = vmul.f32 %v2405_v52, %v5292_v1  ;;  %v2419_v59 = vmul.f32 %v2405_v52, %v2316_v61 }
 0x4d3   :  { %v2429_v6 = vadd.f32 %v2427_v18, %v2407_v12  ;;  %v2430_v4 = vadd.f32 %v2427_v18, %v2408_v16  ;;  %v2433_v49 = vadd.f32 %v2427_v18, %v2411_v13  ;;  %v2434_v48 = vadd.f32 %v2427_v18, %v2412_v47 }
 0x4d4   :  { %v2431_v25 = vadd.f32 %v2427_v18, %v2409_v28  ;;  %v2432_v45 = vadd.f32 %v2427_v18, %v2410_v30  ;;  %v2435_v20 = vadd.f32 %v2427_v18, %v2413_v19  ;;  %v2436_v36 = vadd.f32 %v2427_v18, %v2414_v46 }
 0x4d5   :  { %v2445_v60 = vmax.f32 %v2429_v6, 0.0  ;;  %v2446_v14 = vmax.f32 %v2430_v4, 0.0  ;;  %v2449_v33 = vmax.f32 %v2433_v49, 0.0  ;;  %v2450_v11 = vmax.f32 %v2434_v48, 0.0 }
 0x4d6   :  { %v2447_v56 = vmax.f32 %v2431_v25, 0.0  ;;  %v2448_v38 = vmax.f32 %v2432_v45, 0.0  ;;  %v2451_v7 = vmax.f32 %v2435_v20, 0.0  ;;  %v2452_v10 = vmax.f32 %v2436_v36, 0.0 }
 0x4d7   :  { %v2461_v3 = vpack.c.bf16 %v2446_v14, %v2445_v60  ;;  %v2463_v37 = vpack.c.bf16 %v2450_v11, %v2449_v33  ;;  %v2437_v1 = vadd.f32 %v2427_v18, %v2415_v42  ;;  %v2438_v61 = vadd.f32 %v2427_v18, %v2416_v41 }
 0x4d8   :  { %v2462_v40 = vpack.c.bf16 %v2448_v38, %v2447_v56  ;;  %v2464_v57 = vpack.c.bf16 %v2452_v10, %v2451_v7  ;;  %v2439_v35 = vadd.f32 %v2427_v18, %v2417_v27  ;;  %v2440_v39 = vadd.f32 %v2427_v18, %v2418_v21 }
 0x4d9   :  { %3080 = vmatprep.mubr.bf16.mxu0 %v2461_v3  ;;  %3084 = vmatprep.mubr.bf16.mxu1 %v2463_v37  ;;  %v2453_v2 = vmax.f32 %v2437_v1, 0.0  ;;  %v2454_v17 = vmax.f32 %v2438_v61, 0.0  ;;  %v2441_v63 = vadd.f32 %v2427_v18, %v2419_v59  ;;  %v2442_v58 = vadd.f32 %v2427_v18, %v2420_v5 }
 0x4da   :  { %3081 = vmatmul.mubr.bf16.vlgmr.msra.gmra.mrb[16].mxu0 %v2462_v40  ;;  %3085 = vmatmul.mubr.bf16.vlgmr.msra.gmra.mrb[0].mxu1 %v2464_v57  ;;  %v2455_v15 = vmax.f32 %v2439_v35, 0.0  ;;  %v2456_v24 = vmax.f32 %v2440_v39, 0.0  ;;  %v2421_v55 = vmul.f32 %v2405_v52, %v5305_v50  ;;  %v2422_v31 = vmul.f32 %v2405_v52, %v5309_v32  ;;  %v2955_v50 = vld [vmem:[%s5360_s7] ss:$0 sm:$0xff]  ;;  %s3268_s7 = smov [#allocation3]  }
 0x4db   :  { %v2465_v23 = vpack.c.bf16 %v2454_v17, %v2453_v2  ;;  %v2457_v51 = vmax.f32 %v2441_v63, 0.0  ;;  %v2458_v9 = vmax.f32 %v2442_v58, 0.0  ;;  %s2658_s24 = sshll.u32 %s3268_s7, 4  ;;  %s2659_s24 = int_to_ptr.vmem [resolvable:$true] %s2658_s24 }
 0x4dc   :  { %v2466_v0 = vpack.c.bf16 %v2456_v24, %v2455_v15  ;;  %v2443_v43 = vadd.f32 %v2427_v18, %v2421_v55  ;;  %v2444_v62 = vadd.f32 %v2427_v18, %v2422_v31  ;;  %s3218_s25 = scalar_lea.vmem %s2659_s24, 2048  ;;  %p3223_p2 = scmp.lt.s32.totalorder %s2659_s24, %s2659_s24 }
 0x4dd   :  { %3088 = vmatprep.mubr.bf16.mxu1 %v2465_v23  ;;  %v2467_v29 = vpack.c.bf16 %v2458_v9, %v2457_v51  ;;  %p3219_p1 = scmp.ne.s32.totalorder %s2659_s24, %s3218_s25  ;;  %p3224_p3 = scmp.lt.s32.totalorder %s3218_s25, %s3218_s25 }
 0x4de   :  { %v2459_v44 = vmax.f32 %v2443_v43, 0.0  ;;  %v2460_v54 = vmax.f32 %v2444_v62, 0.0 }
 0x4df   :  { %p3225_p4 = por %p3224_p3, %p3223_p2 }
 0x4e0   :  { %v2468_v26 = vpack.c.bf16 %v2460_v54, %v2459_v44 }
 0x4e1   :  { %p3226_p5 = pnand %p3225_p4, %p3219_p1 }
 0x4e2   :  { %3089 = vmatmul.mubr.bf16.gmra.mrb[4].mxu1 %v2466_v0 }
 0x4e3   :  { %3092 = vmatprep.mubr.bf16.mxu1 %v2467_v29 }
 0x4ea   :  { %3093 = vmatmul.mubr.bf16.gmra.mrb[8].mxu1 %v2468_v26 }
 0x5ad   :  { %v3082_v53 = vpop.f32.mrb[16].mxu0  ;;  %v3086_v32 = vpop.f32.mrb[0].mxu1 }
 0x5ae   :  { %v2583_v34 = vadd.f32 %v3082_v53, %v2955_v50  ;;  %v2599_v8 = vadd.f32 %v3086_v32, %v2955_v50  ;;  %v2574_v52 = vpop.f32.mrb[17].mxu0  ;;  %v2590_v22 = vpop.f32.mrb[1].mxu1 }
 0x5af   :  { %v2575_v5 = vadd.f32 %v2955_v50, %v2574_v52  ;;  %v2591_v12 = vadd.f32 %v2955_v50, %v2590_v22  ;;  %v3083_v16 = vpop.f32.mrb[18].mxu0  ;;  %v3087_v13 = vpop.f32.mrb[2].mxu1 }
 0x5b0   :  { %2639 = vst [vmem:[#allocation3 + $0x10] sm:$0xff] %v2583_v34  ;;  %2643 = vst [vmem:[#allocation3 + $0x30] sm:$0xff] %v2599_v8  ;;  %v2586_v47 = vadd.f32 %v3083_v16, %v2955_v50  ;;  %v2602_v28 = vadd.f32 %v3087_v13, %v2955_v50  ;;  %v2577_v30 = vpop.f32.mrb[19].mxu0  ;;  %v2593_v18 = vpop.f32.mrb[3].mxu1 }
 0x5b1   :  { %2637 = vst [vmem:[#allocation3] sm:$0xff] %v2575_v5  ;;  %2641 = vst [vmem:[#allocation3 + $0x20] sm:$0xff] %v2591_v12  ;;  %v2578_v19 = vadd.f32 %v2955_v50, %v2577_v30  ;;  %v2594_v46 = vadd.f32 %v2955_v50, %v2593_v18 }
 0x5b2   :  { %2640 = vst [vmem:[#allocation3 + $0x18] sm:$0xff] %v2586_v47  ;;  %2644 = vst [vmem:[#allocation3 + $0x38] sm:$0xff] %v2602_v28 }
 0x5b3   :  { %2638 = vst [vmem:[#allocation3 + $0x8] sm:$0xff] %v2578_v19  ;;  %2642 = vst [vmem:[#allocation3 + $0x28] sm:$0xff] %v2594_v46 }
 0x5b5   :  { %v3090_v42 = vpop.f32.mrb[4].mxu1 }
 0x5b6   :  { %v2615_v41 = vadd.f32 %v3090_v42, %v2955_v50  ;;  %v2606_v27 = vpop.f32.mrb[5].mxu1 }
 0x5b7   :  { %v2607_v21 = vadd.f32 %v2955_v50, %v2606_v27  ;;  %v3091_v59 = vpop.f32.mrb[6].mxu1 }
 0x5b8   :  { %2647 = vst [vmem:[#allocation3 + $0x50] sm:$0xff] %v2615_v41  ;;  %v2618_v6 = vadd.f32 %v3091_v59, %v2955_v50  ;;  %v2609_v4 = vpop.f32.mrb[7].mxu1 }
 0x5b9   :  { %2645 = vst [vmem:[#allocation3 + $0x40] sm:$0xff] %v2607_v21  ;;  %v2610_v49 = vadd.f32 %v2955_v50, %v2609_v4 }
 0x5ba   :  { %2648 = vst [vmem:[#allocation3 + $0x58] sm:$0xff] %v2618_v6 }
 0x5bb   :  { %2646 = vst [vmem:[#allocation3 + $0x48] sm:$0xff] %v2610_v49 }
 0x5bd   :  { %v3094_v48 = vpop.f32.mrb[8].mxu1 }
 0x5be   :  { %v2631_v25 = vadd.f32 %v3094_v48, %v2955_v50  ;;  %v2622_v45 = vpop.f32.mrb[9].mxu1 }
 0x5bf   :  { %v2623_v20 = vadd.f32 %v2955_v50, %v2622_v45  ;;  %v3095_v36 = vpop.f32.mrb[10].mxu1 }
 0x5c0   :  { %2651 = vst [vmem:[#allocation3 + $0x70] sm:$0xff] %v2631_v25  ;;  %v2634_v60 = vadd.f32 %v3095_v36, %v2955_v50  ;;  %v2625_v14 = vpop.f32.mrb[11].mxu1 }
 0x5c1   :  { %2649 = vst [vmem:[#allocation3 + $0x60] sm:$0xff] %v2623_v20  ;;  %v2626_v33 = vadd.f32 %v2955_v50, %v2625_v14 }
 0x5c2   :  { %2652 = vst [vmem:[#allocation3 + $0x78] sm:$0xff] %v2634_v60 }
 0x5c3   :  { %2650 = vst [vmem:[#allocation3 + $0x68] sm:$0xff] %v2626_v33 }
 0x5c4   :  { %3229 = shalt.err (!%p3226_p5)
}
 0x5c5   :  { %s3230_s27 = scalar_lea.hbm %s5361_s8, 2048 }
 0x5c6   :  { %p3231_p6 = scmp.ne.s32.totalorder %s5361_s8, %s3230_s27  ;;  %p3234_p7 = scmp.lt.u32.totalorder %s3230_s27, %s5361_s8 }
 0x5c8   :  { %p3236_p8 = pnand %p3234_p7, %p3231_p6 }
 0x5ca   :  { %3239 = shalt.err (!%p3236_p8)
}
 0x5cb   :  { %s3269_s9 = smov 128   ;;  %s3270_s10 = smov 8  }
 0x5cc   :  { %2664 = dma.vmem_to_hbm [thread:$0]  %s2659_s24, 2048, %s5361_s8, [#allocation4], %s3269_s9, %s3269_s9, %s3270_s10  }
 0x5cd   :  { %3244 = dma.done.wait [#allocation4], 2048  }
 0x5ce   :  { %3245 = vsyncadd [#allocation4], 4294965248 }
 0x5cf   :  { %2668 = vsyncpa [#allocation4], 1 }

</bundles_post_ra>
